<compile_context>
chip_gen: v6e
topology: v6e:2x2x1
jax: 0.10.0
libtpu: 0.0.40
codegen_flags: <defaults>
</compile_context>

<pallas_src>
import functools

import numpy as np

import jax
import jax.numpy as jnp
from jax.experimental import pallas as pl
from jax.experimental.pallas import tpu as pltpu


def _round_up(n, m):
    return ((n + m - 1) // m) * m


def _num_tensorcores():
    """TensorCores per device: 1 on v5e/v6e, 2 on v7x. Conservative default 1."""
    try:
        kind = jax.devices()[0].device_kind.lower()
    except Exception:
        return 1
    if "v7" in kind or "7x" in kind:
        return 2
    return 1


# --------------------------------------------------------------------------
# Kernel
# --------------------------------------------------------------------------
def _vae_kernel(
    x_ref, eps_ref,
    w1_ref, b1_ref,        # img_2hid            (in_pad, h_pad)
    wms_ref, bms_ref,      # fused hid_2mu|sigma (h_pad, 2*z_pad)
    wz_ref, bz_ref,        # z_2hid              (z_pad, h_pad)
    wout_ref, bout_ref,    # hid_2img            (h_pad, in_pad)
    xrec_ref, musig_ref,
    *, z_pad,
):
    wdt = w1_ref.dtype                       # matmul-operand dtype (bf16/f32)
    x = x_ref[...]                           # (tile_b, in_pad), already wdt

    # ---- encode ----
    h = jnp.dot(x.astype(wdt), w1_ref[...], preferred_element_type=jnp.float32)
    h = jnp.maximum(h + b1_ref[...], 0.0)                      # ReLU, f32 VPU

    # fused mu|sigma head: one MXU pass, lane-dense (tile_b, 2*z_pad) output
    musig = jnp.dot(h.astype(wdt), wms_ref[...],
                    preferred_element_type=jnp.float32) + bms_ref[...]
    mu = musig[:, :z_pad]                    # 128-aligned static slices (cheap)
    sigma = musig[:, z_pad:]

    # ---- reparameterize: z = mu + sigma * eps (f32, VPU) ----
    z = mu + sigma * eps_ref[...]

    # ---- decode ----
    h2 = jnp.dot(z.astype(wdt), wz_ref[...], preferred_element_type=jnp.float32)
    h2 = jnp.maximum(h2 + bz_ref[...], 0.0)                    # ReLU, f32

    logits = jnp.dot(h2.astype(wdt), wout_ref[...],
                     preferred_element_type=jnp.float32) + bout_ref[...]
    xrec_ref[...] = jax.nn.sigmoid(logits).astype(xrec_ref.dtype)   # EUP
    musig_ref[...] = musig


# --------------------------------------------------------------------------
# Param preparation (one-time): fuse mu|sigma heads, pad feature dims to 128,
# cast matmul operands (weights) to bf16.  Biases stay f32 (added after the
# f32 accumulation), so the math is bf16-in / f32-accumulate everywhere.
# --------------------------------------------------------------------------
def prepare_params(p, *, matmul_dtype=jnp.bfloat16, pad_in_dim=True):
    in_dim, h_dim = p["w1"].shape
    z_dim = p["wmu"].shape[1]
    h_pad = _round_up(h_dim, 128)
    z_pad = _round_up(z_dim, 128)
    in_pad = _round_up(in_dim, 128) if pad_in_dim else in_dim

    def pad2(a, rows, cols):
        return jnp.pad(a, ((0, rows - a.shape[0]), (0, cols - a.shape[1])))

    wms = jnp.concatenate(
        [pad2(p["wmu"], h_pad, z_pad), pad2(p["wsig"], h_pad, z_pad)], axis=1)
    bms = jnp.concatenate(
        [pad2(p["bmu"], 1, z_pad), pad2(p["bsig"], 1, z_pad)], axis=1)

    pp = {
        "w1":   pad2(p["w1"], in_pad, h_pad).astype(matmul_dtype),
        "b1":   pad2(p["b1"], 1, h_pad).astype(jnp.float32),
        "wms":  wms.astype(matmul_dtype),
        "bms":  bms.astype(jnp.float32),
        "wz":   pad2(p["wz"], z_pad, h_pad).astype(matmul_dtype),
        "bz":   pad2(p["bz"], 1, h_pad).astype(jnp.float32),
        "wout": pad2(p["wout"], h_pad, in_pad).astype(matmul_dtype),
        "bout": pad2(p["bout"], 1, in_pad).astype(jnp.float32),
    }
    # TODO(synk): v7x-only fp8 weights with per-column scales would halve the
    # weight stream again; not implemented (needs calibration, not drop-in).
    dims = dict(in_dim=in_dim, h_dim=h_dim, z_dim=z_dim,
                in_pad=in_pad, h_pad=h_pad, z_pad=z_pad)
    return pp, dims


# --------------------------------------------------------------------------
# Wrapper
# --------------------------------------------------------------------------
def vae_forward_pallas(x, eps, pp, dims, *, tile_b=None, max_tile_b=512,
                       xrec_dtype=jnp.float32):
    B, in_dim = x.shape
    assert in_dim == dims["in_dim"]
    in_pad, h_pad = dims["in_pad"], dims["h_pad"]
    z_dim, z_pad = dims["z_dim"], dims["z_pad"]
    mmdt = pp["w1"].dtype

    # Generation-aware batch tile: one tile per TensorCore when B is small
    # (no wasted 0.35us grid steps on v5e/v6e, both v7x TCs busy), capped at
    # max_tile_b so large batches stream with resident weights.
    if tile_b is None:
        B8 = _round_up(B, 8)
        tile_b = _round_up(-(-B8 // _num_tensorcores()), 8)
        tile_b = min(tile_b, max_tile_b)
    tile_b = min(_round_up(tile_b, 8), _round_up(B, 8))
    B_pad = _round_up(B, tile_b)
    grid = (B_pad // tile_b,)

    # Pad batch remainder + feature lanes; cast x to the matmul dtype here so
    # its HBM stream into the kernel is halved (pad + cast fuse into one op).
    x_p = jnp.pad(x, ((0, B_pad - B), (0, in_pad - in_dim))).astype(mmdt)
    eps_p = jnp.pad(eps, ((0, B_pad - B), (0, z_pad - z_dim))).astype(jnp.float32)

    out_shape = (
        jax.ShapeDtypeStruct((B_pad, in_pad), xrec_dtype),      # x_reconstructed
        jax.ShapeDtypeStruct((B_pad, 2 * z_pad), jnp.float32),  # packed [mu|sigma]
    )

    operands = (x_p, eps_p, pp["w1"], pp["b1"], pp["wms"], pp["bms"],
                pp["wz"], pp["bz"], pp["wout"], pp["bout"])
    in_bytes = sum(int(a.size) * a.dtype.itemsize for a in operands)
    out_bytes = (B_pad * in_pad * np.dtype(xrec_dtype).itemsize
                 + B_pad * 2 * z_pad * 4)
    cost = pl.CostEstimate(
        flops=2 * B_pad * (in_pad * h_pad + 2 * h_pad * z_pad
                           + z_pad * h_pad + h_pad * in_pad),
        transcendentals=B_pad * in_pad,           # sigmoid exp
        bytes_accessed=in_bytes + out_bytes,
    )

    def build_and_call(single_buffer_weights):
        # Constant-index weight/bias blocks stay resident across the grid;
        # single-buffer them (a 2nd pipeline buffer is pure VMEM waste).
        wkw = ({"pipeline_mode": pl.Buffered(1)} if single_buffer_weights else {})
        full = lambda shape: pl.BlockSpec(shape, lambda i: (0, 0), **wkw)
        row = lambda last: pl.BlockSpec((tile_b, last), lambda i: (i, 0))
        in_specs = [
            row(in_pad), row(z_pad),                         # x, eps (streamed)
            full((in_pad, h_pad)), full((1, h_pad)),         # img_2hid
            full((h_pad, 2 * z_pad)), full((1, 2 * z_pad)),  # fused hid_2mu|sigma
            full((z_pad, h_pad)), full((1, h_pad)),          # z_2hid
            full((h_pad, in_pad)), full((1, in_pad)),        # hid_2img
        ]
        out_specs = [row(in_pad), row(2 * z_pad)]            # lane-dense stores
        return pl.pallas_call(
            functools.partial(_vae_kernel, z_pad=z_pad),
            out_shape=out_shape,
            grid_spec=pltpu.PrefetchScalarGridSpec(
                num_scalar_prefetch=0, grid=grid,
                in_specs=in_specs, out_specs=out_specs),
            compiler_params=pltpu.CompilerParams(
                dimension_semantics=("parallel",)),   # batch tiles independent
            cost_estimate=cost,
        )(*operands)

    try:
        xrec, musig = build_and_call(True)
    except Exception:
        # pipeline_mode=pl.Buffered(1) unsupported on this jax version; fall
        # back to the default 2-deep pipelining (correctness identical).
        xrec, musig = build_and_call(False)

    xrec = xrec[:B, :in_dim].astype(jnp.float32)
    mu = musig[:B, :z_dim]
    sigma = musig[:B, z_pad:z_pad + z_dim]
    return xrec, mu, sigma


# --------------------------------------------------------------------------
# Synthetic params + pure-JAX reference
# --------------------------------------------------------------------------
def init_params(key, in_dim, h_dim, z_dim):
    """Deterministic synthetic parameters (PyTorch Linear init, pre-transposed
    to (in_features, out_features))."""
    ks = jax.random.split(key, 10)
    scale = lambda fan_in: 1.0 / jnp.sqrt(jnp.float32(fan_in))
    mk_w = lambda k, fi, fo: jax.random.uniform(
        k, (fi, fo), jnp.float32, -1.0, 1.0) * scale(fi)
    mk_b = lambda k, fi, fo: jax.random.uniform(
        k, (1, fo), jnp.float32, -1.0, 1.0) * scale(fi)
    return {
        "w1":   mk_w(ks[0], in_dim, h_dim), "b1":   mk_b(ks[1], in_dim, h_dim),
        "wmu":  mk_w(ks[2], h_dim, z_dim),  "bmu":  mk_b(ks[3], h_dim, z_dim),
        "wsig": mk_w(ks[4], h_dim, z_dim),  "bsig": mk_b(ks[5], h_dim, z_dim),
        "wz":   mk_w(ks[6], z_dim, h_dim),  "bz":   mk_b(ks[7], z_dim, h_dim),
        "wout": mk_w(ks[8], h_dim, in_dim), "bout": mk_b(ks[9], h_dim, in_dim),
    }


def vae_forward_ref(x, eps, p, *, matmul_dtype=jnp.float32):
    """Pure-JAX reference mirroring the PyTorch forward.  matmul_dtype lets the
    reference use the same bf16 operand rounding as the kernel."""
    dot = lambda a, b: jnp.dot(a.astype(matmul_dtype), b.astype(matmul_dtype),
                               preferred_element_type=jnp.float32)
    h = jnp.maximum(dot(x, p["w1"]) + p["b1"], 0.0)
    mu = dot(h, p["wmu"]) + p["bmu"]
    sigma = dot(h, p["wsig"]) + p["bsig"]
    z = mu + sigma * eps                       # sigma used raw, as in the module
    h2 = jnp.maximum(dot(z, p["wz"]) + p["bz"], 0.0)
    xrec = jax.nn.sigmoid(dot(h2, p["wout"]) + p["bout"])
    return xrec, mu, sigma


if __name__ == "__main__":
    # Module defaults (h_dim=200, z_dim=20) on flattened 28x28 images; a small
    # batch keeps the demo tiny: 1 grid step on v5e/v6e, 2 parallel on v7x.
    B, IN_DIM, H_DIM, Z_DIM = 32, 784, 200, 20

    key = jax.random.PRNGKey(0)
    k_params, k_x, k_eps = jax.random.split(key, 3)

    params = init_params(k_params, IN_DIM, H_DIM, Z_DIM)
    x = jax.random.uniform(k_x, (B, IN_DIM), jnp.float32)      # "image" in [0,1)
    eps = jax.random.normal(k_eps, (B, Z_DIM), jnp.float32)    # torch.randn_like(sigma)

    # bf16 matmul operands (native MXU path, half the weight/x HBM bytes),
    # f32 accumulation/elementwise; in_dim lane-padded 784 -> 896.
    pp, dims = prepare_params(params, matmul_dtype=jnp.bfloat16, pad_in_dim=True)

    xrec, mu, sigma = jax.block_until_ready(vae_forward_pallas(x, eps, pp, dims))

    # Structural correctness (padding / head fusion / slicing): compare against
    # a reference that mirrors the kernel's bf16 matmul operands -> tight tol.
    xr_b, mu_b, sg_b = vae_forward_ref(x, eps, params, matmul_dtype=jnp.bfloat16)
    assert jnp.allclose(xrec, xr_b, atol=2e-3, rtol=2e-3)
    assert jnp.allclose(mu, mu_b, atol=2e-3, rtol=2e-3)
    assert jnp.allclose(sigma, sg_b, atol=2e-3, rtol=2e-3)

    # Sanity vs the full-f32 math (loose: bf16 operand rounding).
    xr_f, mu_f, sg_f = vae_forward_ref(x, eps, params, matmul_dtype=jnp.float32)
    assert jnp.allclose(xrec, xr_f, atol=5e-2, rtol=5e-2)
    assert jnp.allclose(mu, mu_f, atol=5e-2, rtol=5e-2)
    assert jnp.allclose(sigma, sg_f, atol=5e-2, rtol=5e-2)

    print("KERNEL_OK")
</pallas_src>

<mosaic_0001>
module attributes {stable_mosaic.version = 11 : i64} {
  func.func @_vae_kernel(%arg0: i32, %arg1: memref<32x896xbf16, #tpu.memory_space<vmem>>, %arg2: memref<32x128xf32, #tpu.memory_space<vmem>>, %arg3: memref<896x256xbf16, #tpu.memory_space<vmem>>, %arg4: memref<1x256xf32, #tpu.memory_space<vmem>>, %arg5: memref<256x256xbf16, #tpu.memory_space<vmem>>, %arg6: memref<1x256xf32, #tpu.memory_space<vmem>>, %arg7: memref<128x256xbf16, #tpu.memory_space<vmem>>, %arg8: memref<1x256xf32, #tpu.memory_space<vmem>>, %arg9: memref<256x896xbf16, #tpu.memory_space<vmem>>, %arg10: memref<1x896xf32, #tpu.memory_space<vmem>>, %arg11: memref<32x896xf32, #tpu.memory_space<vmem>>, %arg12: memref<32x256xf32, #tpu.memory_space<vmem>>) attributes {dimension_semantics = [#tpu.dimension_semantics<parallel>], iteration_bounds = array<i64: 1>, scalar_prefetch = 0 : i64, scratch_operands = 0 : i64, tpu.core_type = #tpu.core_type<tc>, window_params = [{transform_indices = @transform_0, window_bounds = array<i64: 32, 896>}, {transform_indices = @transform_1, window_bounds = array<i64: 32, 128>}, {pipeline_mode = #tpu.pipeline_mode<synchronous>, transform_indices = @transform_2, window_bounds = array<i64: 896, 256>}, {pipeline_mode = #tpu.pipeline_mode<synchronous>, transform_indices = @transform_3, window_bounds = array<i64: 1, 256>}, {pipeline_mode = #tpu.pipeline_mode<synchronous>, transform_indices = @transform_4, window_bounds = array<i64: 256, 256>}, {pipeline_mode = #tpu.pipeline_mode<synchronous>, transform_indices = @transform_5, window_bounds = array<i64: 1, 256>}, {pipeline_mode = #tpu.pipeline_mode<synchronous>, transform_indices = @transform_6, window_bounds = array<i64: 128, 256>}, {pipeline_mode = #tpu.pipeline_mode<synchronous>, transform_indices = @transform_7, window_bounds = array<i64: 1, 256>}, {pipeline_mode = #tpu.pipeline_mode<synchronous>, transform_indices = @transform_8, window_bounds = array<i64: 256, 896>}, {pipeline_mode = #tpu.pipeline_mode<synchronous>, transform_indices = @transform_9, window_bounds = array<i64: 1, 896>}, {transform_indices = @transform_10, window_bounds = array<i64: 32, 896>}, {transform_indices = @transform_11, window_bounds = array<i64: 32, 256>}]} {
    %c0 = arith.constant 0 : index
    %c0_0 = arith.constant 0 : index
    %0 = vector.load %arg1[%c0, %c0_0] : memref<32x896xbf16, #tpu.memory_space<vmem>>, vector<32x896xbf16>
    %c0_1 = arith.constant 0 : index
    %c0_2 = arith.constant 0 : index
    %1 = vector.load %arg3[%c0_1, %c0_2] : memref<896x256xbf16, #tpu.memory_space<vmem>>, vector<896x256xbf16>
    %cst = arith.constant dense<0.000000e+00> : vector<32x256xf32>
    %2 = tpu.matmul %0, %1, %cst {dimension_numbers = #tpu.dot_dimension_numbers<[1], [0], [0], [1], [0, 0, 1, 1], [], []>} : vector<32x896xbf16>, vector<896x256xbf16>, vector<32x256xf32> -> vector<32x256xf32>
    %c0_3 = arith.constant 0 : index
    %c0_4 = arith.constant 0 : index
    %3 = vector.load %arg4[%c0_3, %c0_4] : memref<1x256xf32, #tpu.memory_space<vmem>>, vector<1x256xf32>
    %4 = vector.broadcast %3 : vector<1x256xf32> to vector<32x256xf32>
    %5 = arith.addf %2, %4 : vector<32x256xf32>
    %cst_5 = arith.constant 0.000000e+00 : f32
    %6 = vector.broadcast %cst_5 : f32 to vector<32x256xf32>
    %7 = arith.maximumf %5, %6 : vector<32x256xf32>
    %8 = arith.truncf %7 : vector<32x256xf32> to vector<32x256xbf16>
    %c0_6 = arith.constant 0 : index
    %c0_7 = arith.constant 0 : index
    %9 = vector.load %arg5[%c0_6, %c0_7] : memref<256x256xbf16, #tpu.memory_space<vmem>>, vector<256x256xbf16>
    %cst_8 = arith.constant dense<0.000000e+00> : vector<32x256xf32>
    %10 = tpu.matmul %8, %9, %cst_8 {dimension_numbers = #tpu.dot_dimension_numbers<[1], [0], [0], [1], [0, 0, 1, 1], [], []>} : vector<32x256xbf16>, vector<256x256xbf16>, vector<32x256xf32> -> vector<32x256xf32>
    %c0_9 = arith.constant 0 : index
    %c0_10 = arith.constant 0 : index
    %11 = vector.load %arg6[%c0_9, %c0_10] : memref<1x256xf32, #tpu.memory_space<vmem>>, vector<1x256xf32>
    %12 = vector.broadcast %11 : vector<1x256xf32> to vector<32x256xf32>
    %13 = arith.addf %10, %12 : vector<32x256xf32>
    %14 = vector.extract_strided_slice %13 {offsets = [0, 0], sizes = [32, 128], strides = [1, 1]} : vector<32x256xf32> to vector<32x128xf32>
    %15 = vector.extract_strided_slice %13 {offsets = [0, 128], sizes = [32, 128], strides = [1, 1]} : vector<32x256xf32> to vector<32x128xf32>
    %c0_11 = arith.constant 0 : index
    %c0_12 = arith.constant 0 : index
    %16 = vector.load %arg2[%c0_11, %c0_12] : memref<32x128xf32, #tpu.memory_space<vmem>>, vector<32x128xf32>
    %17 = arith.mulf %15, %16 : vector<32x128xf32>
    %18 = arith.addf %14, %17 : vector<32x128xf32>
    %19 = arith.truncf %18 : vector<32x128xf32> to vector<32x128xbf16>
    %c0_13 = arith.constant 0 : index
    %c0_14 = arith.constant 0 : index
    %20 = vector.load %arg7[%c0_13, %c0_14] : memref<128x256xbf16, #tpu.memory_space<vmem>>, vector<128x256xbf16>
    %cst_15 = arith.constant dense<0.000000e+00> : vector<32x256xf32>
    %21 = tpu.matmul %19, %20, %cst_15 {dimension_numbers = #tpu.dot_dimension_numbers<[1], [0], [0], [1], [0, 0, 1, 1], [], []>} : vector<32x128xbf16>, vector<128x256xbf16>, vector<32x256xf32> -> vector<32x256xf32>
    %c0_16 = arith.constant 0 : index
    %c0_17 = arith.constant 0 : index
    %22 = vector.load %arg8[%c0_16, %c0_17] : memref<1x256xf32, #tpu.memory_space<vmem>>, vector<1x256xf32>
    %23 = vector.broadcast %22 : vector<1x256xf32> to vector<32x256xf32>
    %24 = arith.addf %21, %23 : vector<32x256xf32>
    %cst_18 = arith.constant 0.000000e+00 : f32
    %25 = vector.broadcast %cst_18 : f32 to vector<32x256xf32>
    %26 = arith.maximumf %24, %25 : vector<32x256xf32>
    %27 = arith.truncf %26 : vector<32x256xf32> to vector<32x256xbf16>
    %c0_19 = arith.constant 0 : index
    %c0_20 = arith.constant 0 : index
    %28 = vector.load %arg9[%c0_19, %c0_20] : memref<256x896xbf16, #tpu.memory_space<vmem>>, vector<256x896xbf16>
    %cst_21 = arith.constant dense<0.000000e+00> : vector<32x896xf32>
    %29 = tpu.matmul %27, %28, %cst_21 {dimension_numbers = #tpu.dot_dimension_numbers<[1], [0], [0], [1], [0, 0, 1, 1], [], []>} : vector<32x256xbf16>, vector<256x896xbf16>, vector<32x896xf32> -> vector<32x896xf32>
    %c0_22 = arith.constant 0 : index
    %c0_23 = arith.constant 0 : index
    %30 = vector.load %arg10[%c0_22, %c0_23] : memref<1x896xf32, #tpu.memory_space<vmem>>, vector<1x896xf32>
    %31 = vector.broadcast %30 : vector<1x896xf32> to vector<32x896xf32>
    %32 = arith.addf %29, %31 : vector<32x896xf32>
    %33 = arith.negf %32 : vector<32x896xf32>
    %34 = math.exp %33 : vector<32x896xf32>
    %cst_24 = arith.constant 1.000000e+00 : f32
    %35 = vector.broadcast %cst_24 : f32 to vector<32x896xf32>
    %36 = arith.addf %35, %34 : vector<32x896xf32>
    %37 = arith.divf %35, %36 : vector<32x896xf32>
    %c0_25 = arith.constant 0 : index
    %c0_26 = arith.constant 0 : index
    %38 = vector.load %arg11[%c0_25, %c0_26] : memref<32x896xf32, #tpu.memory_space<vmem>>, vector<32x896xf32>
    tpu.vector_store %arg11[%c0_25, %c0_26], %37 {strides = array<i32>} : memref<32x896xf32, #tpu.memory_space<vmem>>, vector<32x896xf32>,
    %c0_27 = arith.constant 0 : index
    %c0_28 = arith.constant 0 : index
    %39 = vector.load %arg12[%c0_27, %c0_28] : memref<32x256xf32, #tpu.memory_space<vmem>>, vector<32x256xf32>
    tpu.vector_store %arg12[%c0_27, %c0_28], %13 {strides = array<i32>} : memref<32x256xf32, #tpu.memory_space<vmem>>, vector<32x256xf32>,
    return
  }
  func.func @transform_0(%arg0: i32) -> (i32, i32) {
    %c0_i32 = arith.constant 0 : i32
    %c0_i32_0 = arith.constant 0 : i32
    return %arg0, %c0_i32 : i32, i32
  }
  func.func @transform_1(%arg0: i32) -> (i32, i32) {
    %c0_i32 = arith.constant 0 : i32
    %c0_i32_0 = arith.constant 0 : i32
    return %arg0, %c0_i32 : i32, i32
  }
  func.func @transform_2(%arg0: i32) -> (i32, i32) {
    %c0_i32 = arith.constant 0 : i32
    %c0_i32_0 = arith.constant 0 : i32
    %c0_i32_1 = arith.constant 0 : i32
    return %c0_i32, %c0_i32_0 : i32, i32
  }
  func.func @transform_3(%arg0: i32) -> (i32, i32) {
    %c0_i32 = arith.constant 0 : i32
    %c0_i32_0 = arith.constant 0 : i32
    %c0_i32_1 = arith.constant 0 : i32
    return %c0_i32, %c0_i32_0 : i32, i32
  }
  func.func @transform_4(%arg0: i32) -> (i32, i32) {
    %c0_i32 = arith.constant 0 : i32
    %c0_i32_0 = arith.constant 0 : i32
    %c0_i32_1 = arith.constant 0 : i32
    return %c0_i32, %c0_i32_0 : i32, i32
  }
  func.func @transform_5(%arg0: i32) -> (i32, i32) {
    %c0_i32 = arith.constant 0 : i32
    %c0_i32_0 = arith.constant 0 : i32
    %c0_i32_1 = arith.constant 0 : i32
    return %c0_i32, %c0_i32_0 : i32, i32
  }
  func.func @transform_6(%arg0: i32) -> (i32, i32) {
    %c0_i32 = arith.constant 0 : i32
    %c0_i32_0 = arith.constant 0 : i32
    %c0_i32_1 = arith.constant 0 : i32
    return %c0_i32, %c0_i32_0 : i32, i32
  }
  func.func @transform_7(%arg0: i32) -> (i32, i32) {
    %c0_i32 = arith.constant 0 : i32
    %c0_i32_0 = arith.constant 0 : i32
    %c0_i32_1 = arith.constant 0 : i32
    return %c0_i32, %c0_i32_0 : i32, i32
  }
  func.func @transform_8(%arg0: i32) -> (i32, i32) {
    %c0_i32 = arith.constant 0 : i32
    %c0_i32_0 = arith.constant 0 : i32
    %c0_i32_1 = arith.constant 0 : i32
    return %c0_i32, %c0_i32_0 : i32, i32
  }
  func.func @transform_9(%arg0: i32) -> (i32, i32) {
    %c0_i32 = arith.constant 0 : i32
    %c0_i32_0 = arith.constant 0 : i32
    %c0_i32_1 = arith.constant 0 : i32
    return %c0_i32, %c0_i32_0 : i32, i32
  }
  func.func @transform_10(%arg0: i32) -> (i32, i32) {
    %c0_i32 = arith.constant 0 : i32
    %c0_i32_0 = arith.constant 0 : i32
    return %arg0, %c0_i32 : i32, i32
  }
  func.func @transform_11(%arg0: i32) -> (i32, i32) {
    %c0_i32 = arith.constant 0 : i32
    %c0_i32_0 = arith.constant 0 : i32
    return %arg0, %c0_i32 : i32, i32
  }
}

module attributes {stable_mosaic.version = 11 : i64} {
  func.func @_vae_kernel(%arg0: i32, %arg1: memref<32x896xbf16, #tpu.memory_space<vmem>>, %arg2: memref<32x128xf32, #tpu.memory_space<vmem>>, %arg3: memref<896x256xbf16, #tpu.memory_space<vmem>>, %arg4: memref<1x256xf32, #tpu.memory_space<vmem>>, %arg5: memref<256x256xbf16, #tpu.memory_space<vmem>>, %arg6: memref<1x256xf32, #tpu.memory_space<vmem>>, %arg7: memref<128x256xbf16, #tpu.memory_space<vmem>>, %arg8: memref<1x256xf32, #tpu.memory_space<vmem>>, %arg9: memref<256x896xbf16, #tpu.memory_space<vmem>>, %arg10: memref<1x896xf32, #tpu.memory_space<vmem>>, %arg11: memref<32x896xf32, #tpu.memory_space<vmem>>, %arg12: memref<32x256xf32, #tpu.memory_space<vmem>>) attributes {dimension_semantics = [#tpu.dimension_semantics<parallel>], iteration_bounds = array<i64: 1>, scalar_prefetch = 0 : i64, scratch_operands = 0 : i64, tpu.core_type = #tpu.core_type<tc>, window_params = [{transform_indices = @transform_0, window_bounds = array<i64: 32, 896>}, {transform_indices = @transform_1, window_bounds = array<i64: 32, 128>}, {pipeline_mode = #tpu.pipeline_mode<synchronous>, transform_indices = @transform_2, window_bounds = array<i64: 896, 256>}, {pipeline_mode = #tpu.pipeline_mode<synchronous>, transform_indices = @transform_3, window_bounds = array<i64: 1, 256>}, {pipeline_mode = #tpu.pipeline_mode<synchronous>, transform_indices = @transform_4, window_bounds = array<i64: 256, 256>}, {pipeline_mode = #tpu.pipeline_mode<synchronous>, transform_indices = @transform_5, window_bounds = array<i64: 1, 256>}, {pipeline_mode = #tpu.pipeline_mode<synchronous>, transform_indices = @transform_6, window_bounds = array<i64: 128, 256>}, {pipeline_mode = #tpu.pipeline_mode<synchronous>, transform_indices = @transform_7, window_bounds = array<i64: 1, 256>}, {pipeline_mode = #tpu.pipeline_mode<synchronous>, transform_indices = @transform_8, window_bounds = array<i64: 256, 896>}, {pipeline_mode = #tpu.pipeline_mode<synchronous>, transform_indices = @transform_9, window_bounds = array<i64: 1, 896>}, {transform_indices = @transform_10, window_bounds = array<i64: 32, 896>}, {transform_indices = @transform_11, window_bounds = array<i64: 32, 256>}]} {
    %c0 = arith.constant 0 : index
    %c0_0 = arith.constant 0 : index
    %0 = vector.load %arg1[%c0, %c0_0] : memref<32x896xbf16, #tpu.memory_space<vmem>>, vector<32x896xbf16>
    %c0_1 = arith.constant 0 : index
    %c0_2 = arith.constant 0 : index
    %1 = vector.load %arg3[%c0_1, %c0_2] : memref<896x256xbf16, #tpu.memory_space<vmem>>, vector<896x256xbf16>
    %cst = arith.constant dense<0.000000e+00> : vector<32x256xf32>
    %2 = tpu.matmul %0, %1, %cst {dimension_numbers = #tpu.dot_dimension_numbers<[1], [0], [0], [1], [0, 0, 1, 1], [], []>} : vector<32x896xbf16>, vector<896x256xbf16>, vector<32x256xf32> -> vector<32x256xf32>
    %c0_3 = arith.constant 0 : index
    %c0_4 = arith.constant 0 : index
    %3 = vector.load %arg4[%c0_3, %c0_4] : memref<1x256xf32, #tpu.memory_space<vmem>>, vector<1x256xf32>
    %4 = vector.broadcast %3 : vector<1x256xf32> to vector<32x256xf32>
    %5 = arith.addf %2, %4 : vector<32x256xf32>
    %cst_5 = arith.constant 0.000000e+00 : f32
    %6 = vector.broadcast %cst_5 : f32 to vector<32x256xf32>
    %7 = arith.maximumf %5, %6 : vector<32x256xf32>
    %8 = arith.truncf %7 : vector<32x256xf32> to vector<32x256xbf16>
    %c0_6 = arith.constant 0 : index
    %c0_7 = arith.constant 0 : index
    %9 = vector.load %arg5[%c0_6, %c0_7] : memref<256x256xbf16, #tpu.memory_space<vmem>>, vector<256x256xbf16>
    %cst_8 = arith.constant dense<0.000000e+00> : vector<32x256xf32>
    %10 = tpu.matmul %8, %9, %cst_8 {dimension_numbers = #tpu.dot_dimension_numbers<[1], [0], [0], [1], [0, 0, 1, 1], [], []>} : vector<32x256xbf16>, vector<256x256xbf16>, vector<32x256xf32> -> vector<32x256xf32>
    %c0_9 = arith.constant 0 : index
    %c0_10 = arith.constant 0 : index
    %11 = vector.load %arg6[%c0_9, %c0_10] : memref<1x256xf32, #tpu.memory_space<vmem>>, vector<1x256xf32>
    %12 = vector.broadcast %11 : vector<1x256xf32> to vector<32x256xf32>
    %13 = arith.addf %10, %12 : vector<32x256xf32>
    %14 = vector.extract_strided_slice %13 {offsets = [0, 0], sizes = [32, 128], strides = [1, 1]} : vector<32x256xf32> to vector<32x128xf32>
    %15 = vector.extract_strided_slice %13 {offsets = [0, 128], sizes = [32, 128], strides = [1, 1]} : vector<32x256xf32> to vector<32x128xf32>
    %c0_11 = arith.constant 0 : index
    %c0_12 = arith.constant 0 : index
    %16 = vector.load %arg2[%c0_11, %c0_12] : memref<32x128xf32, #tpu.memory_space<vmem>>, vector<32x128xf32>
    %17 = arith.mulf %15, %16 : vector<32x128xf32>
    %18 = arith.addf %14, %17 : vector<32x128xf32>
    %19 = arith.truncf %18 : vector<32x128xf32> to vector<32x128xbf16>
    %c0_13 = arith.constant 0 : index
    %c0_14 = arith.constant 0 : index
    %20 = vector.load %arg7[%c0_13, %c0_14] : memref<128x256xbf16, #tpu.memory_space<vmem>>, vector<128x256xbf16>
    %cst_15 = arith.constant dense<0.000000e+00> : vector<32x256xf32>
    %21 = tpu.matmul %19, %20, %cst_15 {dimension_numbers = #tpu.dot_dimension_numbers<[1], [0], [0], [1], [0, 0, 1, 1], [], []>} : vector<32x128xbf16>, vector<128x256xbf16>, vector<32x256xf32> -> vector<32x256xf32>
    %c0_16 = arith.constant 0 : index
    %c0_17 = arith.constant 0 : index
    %22 = vector.load %arg8[%c0_16, %c0_17] : memref<1x256xf32, #tpu.memory_space<vmem>>, vector<1x256xf32>
    %23 = vector.broadcast %22 : vector<1x256xf32> to vector<32x256xf32>
    %24 = arith.addf %21, %23 : vector<32x256xf32>
    %cst_18 = arith.constant 0.000000e+00 : f32
    %25 = vector.broadcast %cst_18 : f32 to vector<32x256xf32>
    %26 = arith.maximumf %24, %25 : vector<32x256xf32>
    %27 = arith.truncf %26 : vector<32x256xf32> to vector<32x256xbf16>
    %c0_19 = arith.constant 0 : index
    %c0_20 = arith.constant 0 : index
    %28 = vector.load %arg9[%c0_19, %c0_20] : memref<256x896xbf16, #tpu.memory_space<vmem>>, vector<256x896xbf16>
    %cst_21 = arith.constant dense<0.000000e+00> : vector<32x896xf32>
    %29 = tpu.matmul %27, %28, %cst_21 {dimension_numbers = #tpu.dot_dimension_numbers<[1], [0], [0], [1], [0, 0, 1, 1], [], []>} : vector<32x256xbf16>, vector<256x896xbf16>, vector<32x896xf32> -> vector<32x896xf32>
    %c0_22 = arith.constant 0 : index
    %c0_23 = arith.constant 0 : index
    %30 = vector.load %arg10[%c0_22, %c0_23] : memref<1x896xf32, #tpu.memory_space<vmem>>, vector<1x896xf32>
    %31 = vector.broadcast %30 : vector<1x896xf32> to vector<32x896xf32>
    %32 = arith.addf %29, %31 : vector<32x896xf32>
    %33 = arith.negf %32 : vector<32x896xf32>
    %34 = math.exp %33 : vector<32x896xf32>
    %cst_24 = arith.constant 1.000000e+00 : f32
    %35 = vector.broadcast %cst_24 : f32 to vector<32x896xf32>
    %36 = arith.addf %35, %34 : vector<32x896xf32>
    %37 = arith.divf %35, %36 : vector<32x896xf32>
    %c0_25 = arith.constant 0 : index
    %c0_26 = arith.constant 0 : index
    %38 = vector.load %arg11[%c0_25, %c0_26] : memref<32x896xf32, #tpu.memory_space<vmem>>, vector<32x896xf32>
    tpu.vector_store %arg11[%c0_25, %c0_26], %37 {strides = array<i32>} : memref<32x896xf32, #tpu.memory_space<vmem>>, vector<32x896xf32>,
    %c0_27 = arith.constant 0 : index
    %c0_28 = arith.constant 0 : index
    %39 = vector.load %arg12[%c0_27, %c0_28] : memref<32x256xf32, #tpu.memory_space<vmem>>, vector<32x256xf32>
    tpu.vector_store %arg12[%c0_27, %c0_28], %13 {strides = array<i32>} : memref<32x256xf32, #tpu.memory_space<vmem>>, vector<32x256xf32>,
    return
  }
  func.func @transform_0(%arg0: i32) -> (i32, i32) {
    %c0_i32 = arith.constant 0 : i32
    %c0_i32_0 = arith.constant 0 : i32
    return %arg0, %c0_i32 : i32, i32
  }
  func.func @transform_1(%arg0: i32) -> (i32, i32) {
    %c0_i32 = arith.constant 0 : i32
    %c0_i32_0 = arith.constant 0 : i32
    return %arg0, %c0_i32 : i32, i32
  }
  func.func @transform_2(%arg0: i32) -> (i32, i32) {
    %c0_i32 = arith.constant 0 : i32
    %c0_i32_0 = arith.constant 0 : i32
    %c0_i32_1 = arith.constant 0 : i32
    return %c0_i32, %c0_i32_0 : i32, i32
  }
  func.func @transform_3(%arg0: i32) -> (i32, i32) {
    %c0_i32 = arith.constant 0 : i32
    %c0_i32_0 = arith.constant 0 : i32
    %c0_i32_1 = arith.constant 0 : i32
    return %c0_i32, %c0_i32_0 : i32, i32
  }
  func.func @transform_4(%arg0: i32) -> (i32, i32) {
    %c0_i32 = arith.constant 0 : i32
    %c0_i32_0 = arith.constant 0 : i32
    %c0_i32_1 = arith.constant 0 : i32
    return %c0_i32, %c0_i32_0 : i32, i32
  }
  func.func @transform_5(%arg0: i32) -> (i32, i32) {
    %c0_i32 = arith.constant 0 : i32
    %c0_i32_0 = arith.constant 0 : i32
    %c0_i32_1 = arith.constant 0 : i32
    return %c0_i32, %c0_i32_0 : i32, i32
  }
  func.func @transform_6(%arg0: i32) -> (i32, i32) {
    %c0_i32 = arith.constant 0 : i32
    %c0_i32_0 = arith.constant 0 : i32
    %c0_i32_1 = arith.constant 0 : i32
    return %c0_i32, %c0_i32_0 : i32, i32
  }
  func.func @transform_7(%arg0: i32) -> (i32, i32) {
    %c0_i32 = arith.constant 0 : i32
    %c0_i32_0 = arith.constant 0 : i32
    %c0_i32_1 = arith.constant 0 : i32
    return %c0_i32, %c0_i32_0 : i32, i32
  }
  func.func @transform_8(%arg0: i32) -> (i32, i32) {
    %c0_i32 = arith.constant 0 : i32
    %c0_i32_0 = arith.constant 0 : i32
    %c0_i32_1 = arith.constant 0 : i32
    return %c0_i32, %c0_i32_0 : i32, i32
  }
  func.func @transform_9(%arg0: i32) -> (i32, i32) {
    %c0_i32 = arith.constant 0 : i32
    %c0_i32_0 = arith.constant 0 : i32
    %c0_i32_1 = arith.constant 0 : i32
    return %c0_i32, %c0_i32_0 : i32, i32
  }
  func.func @transform_10(%arg0: i32) -> (i32, i32) {
    %c0_i32 = arith.constant 0 : i32
    %c0_i32_0 = arith.constant 0 : i32
    return %arg0, %c0_i32 : i32, i32
  }
  func.func @transform_11(%arg0: i32) -> (i32, i32) {
    %c0_i32 = arith.constant 0 : i32
    %c0_i32_0 = arith.constant 0 : i32
    return %arg0, %c0_i32 : i32, i32
  }
}

</mosaic_0001>

<bundles_post_ra>
// kernel: tpu_custom_call.1
= control target key start
LH: loop header
LB: loop body
LE: loop exit
PB: predicated region body
PF: predicated region fallthrough
CT: control target
= control target key end

     0   :  { %17 = vsyncpa [#allocation3], 0  ;;  %s3997_s0 = inlined_call_operand.hbm [shape: bf16[32,896], index: 0, kind: input, shape index: {}]   ;;  %s3998_s1 = inlined_call_operand.hbm [shape: f32[32,128], index: 1, kind: input, shape index: {}]   ;;  %s3999_s2 = inlined_call_operand.hbm [shape: bf16[896,256], index: 2, kind: input, shape index: {}]   ;;  %s4000_s3 = inlined_call_operand.vmem [shape: f32[1,256], index: 3, kind: input, shape index: {}]   ;;  %s4001_s4 = inlined_call_operand.hbm [shape: bf16[256,256], index: 4, kind: input, shape index: {}]   ;;  %s4002_s5 = inlined_call_operand.vmem [shape: f32[1,256], index: 5, kind: input, shape index: {}]   ;;  %s4003_s6 = inlined_call_operand.hbm [shape: bf16[128,256], index: 6, kind: input, shape index: {}]   ;;  %s4004_s7 = inlined_call_operand.vmem [shape: f32[1,256], index: 7, kind: input, shape index: {}]   ;;  %s4005_s8 = inlined_call_operand.hbm [shape: bf16[256,896], index: 8, kind: input, shape index: {}]   ;;  %s4006_s9 = inlined_call_operand.vmem [shape: f32[1,896], index: 9, kind: input, shape index: {}]   ;;  %s4007_s10 = inlined_call_operand.hbm [shape: f32[32,896], index: 10, kind: output, shape index: {0}]   ;;  %s4008_s11 = inlined_call_operand.hbm [shape: f32[32,256], index: 11, kind: output, shape index: {1}]  }
   0x1   :  { %18 = vsyncpa [#allocation6], 0 }
   0x2   :  { %19 = vsyncpa [#allocation9], 0 }
   0x3   :  { %20 = vsyncpa [#allocation12], 0 }
   0x4   :  { %21 = vsyncpa [#allocation4], 0 }
   0x5   :  { %22 = vsyncpa [#allocation15], 0  ;;  %s3814_s17 = smov [#allocation5]  }
   0x6   :  { %s40_s18 = sshll.u32 %s3814_s17, 4  ;;  %s41_s18 = int_to_ptr.vmem [resolvable:$true] %s40_s18 }
   0x7   :  { %s3650_s19 = scalar_lea.vmem %s41_s18, 512  ;;  %p3655_p1 = scmp.lt.s32.totalorder %s41_s18, %s41_s18 }
   0x8   :  { %p3651_p0 = scmp.ne.s32.totalorder %s41_s18, %s3650_s19  ;;  %p3656_p2 = scmp.lt.s32.totalorder %s3650_s19, %s3650_s19 }
   0xa   :  { %p3657_p3 = por %p3656_p2, %p3655_p1 }
   0xc   :  { %p3658_p4 = pnand %p3657_p3, %p3651_p0 }
   0xe   :  { %3661 = shalt.err (!%p3658_p4)
}
   0xf   :  { %s3815_s20 = smov 128   ;;  %s3816_s21 = smov 8  }
  0x10   :  { %46 = dma.hbm_to_vmem [thread:$0]  %s3998_s1, 512, %s41_s18, [#allocation6], %s3815_s20, %s3815_s20, %s3816_s21  }
  0x11   :  { %s3817_s24 = smov [#allocation8]   ;;  %s3818_s26 = smov [#allocation2]  }
  0x12   :  { %s66_s25 = sshll.u32 %s3817_s24, 4  ;;  %s28_s27 = sshll.u32 %s3818_s26, 4  ;;  %s67_s25 = int_to_ptr.vmem [resolvable:$true] %s66_s25  ;;  %s29_s27 = int_to_ptr.vmem [resolvable:$true] %s28_s27 }
  0x13   :  { %s3670_s28 = scalar_lea.vmem %s67_s25, 4096  ;;  %p3675_p6 = scmp.lt.s32.totalorder %s67_s25, %s67_s25 }
  0x14   :  { %p3671_p5 = scmp.ne.s32.totalorder %s67_s25, %s3670_s28  ;;  %p3676_p7 = scmp.lt.s32.totalorder %s3670_s28, %s3670_s28 }
  0x16   :  { %p3677_p8 = por %p3676_p7, %p3675_p6 }
  0x18   :  { %p3678_p9 = pnand %p3677_p8, %p3671_p5 }
  0x1a   :  { %3681 = shalt.err (!%p3678_p9)
}
  0x1b   :  { %72 = dma.hbm_to_vmem [thread:$0]  %s4001_s4, 4096, %s67_s25, [#allocation9], %s3815_s20, %s3815_s20, %s3816_s21  }
  0x1c   :  { %s3690_s1 = scalar_lea.vmem %s29_s27, 1792  ;;  %p3695_p11 = scmp.lt.s32.totalorder %s29_s27, %s29_s27 }
  0x1d   :  { %p3691_p10 = scmp.ne.s32.totalorder %s29_s27, %s3690_s1  ;;  %p3696_p12 = scmp.lt.s32.totalorder %s3690_s1, %s3690_s1 }
  0x1f   :  { %p3697_p13 = por %p3696_p12, %p3695_p11 }
  0x21   :  { %p3698_p0 = pnand %p3697_p13, %p3691_p10 }
  0x23   :  { %3701 = shalt.err (!%p3698_p0)
}
  0x24   :  { %s3819_s12 = smov 448   ;;  %s3820_s13 = smov 28  }
  0x25   :  { %34 = dma.hbm_to_vmem [thread:$0]  %s3997_s0, 1792, %s29_s27, [#allocation3], %s3819_s12, %s3819_s12, %s3820_s13  }
  0x26   :  { %s3821_s16 = smov [#allocation7]   ;;  %s3822_s4 = smov [#allocation10]  }
  0x27   :  { %s52_s17 = sshll.u32 %s3821_s16, 4  ;;  %s80_s18 = sshll.u32 %s3822_s4, 4  ;;  %s53_s17 = int_to_ptr.vmem [resolvable:$true] %s52_s17  ;;  %s81_s18 = int_to_ptr.vmem [resolvable:$true] %s80_s18 }
  0x28   :  { %s3710_s19 = scalar_lea.vmem %s53_s17, 14336  ;;  %p3715_p2 = scmp.lt.s32.totalorder %s53_s17, %s53_s17 }
  0x29   :  { %p3711_p1 = scmp.ne.s32.totalorder %s53_s17, %s3710_s19  ;;  %p3716_p3 = scmp.lt.s32.totalorder %s3710_s19, %s3710_s19 }
  0x2b   :  { %p3717_p4 = por %p3716_p3, %p3715_p2 }
  0x2d   :  { %p3718_p5 = pnand %p3717_p4, %p3711_p1 }
  0x2f   :  { %3721 = shalt.err (!%p3718_p5)
}
  0x30   :  { %58 = dma.hbm_to_vmem [thread:$0]  %s3999_s2, 14336, %s53_s17, [#allocation6], %s3815_s20, %s3815_s20, %s3816_s21  }
  0x31   :  { %s3730_s0 = scalar_lea.vmem %s81_s18, 2048  ;;  %p3735_p7 = scmp.lt.s32.totalorder %s81_s18, %s81_s18 }
  0x32   :  { %p3731_p6 = scmp.ne.s32.totalorder %s81_s18, %s3730_s0  ;;  %p3736_p8 = scmp.lt.s32.totalorder %s3730_s0, %s3730_s0 }
  0x34   :  { %p3737_p9 = por %p3736_p8, %p3735_p7 }
  0x36   :  { %p3738_p10 = pnand %p3737_p9, %p3731_p6 }
  0x38   :  { %3741 = shalt.err (!%p3738_p10)
}
  0x39   :  { %86 = dma.hbm_to_vmem [thread:$0]  %s4003_s6, 2048, %s81_s18, [#allocation9], %s3815_s20, %s3815_s20, %s3816_s21  }
  0x3a   :  { %s3823_s26 = smov [#allocation11]  }
  0x3b   :  { %s94_s27 = sshll.u32 %s3823_s26, 4  ;;  %s95_s27 = int_to_ptr.vmem [resolvable:$true] %s94_s27 }
  0x3c   :  { %s3750_s28 = scalar_lea.vmem %s95_s27, 14336  ;;  %p3755_p12 = scmp.lt.s32.totalorder %s95_s27, %s95_s27 }
  0x3d   :  { %p3751_p11 = scmp.ne.s32.totalorder %s95_s27, %s3750_s28  ;;  %p3756_p13 = scmp.lt.s32.totalorder %s3750_s28, %s3750_s28 }
  0x3f   :  { %p3757_p0 = por %p3756_p13, %p3755_p12 }
  0x41   :  { %p3758_p1 = pnand %p3757_p0, %p3751_p11 }
  0x43   :  { %3761 = shalt.err (!%p3758_p1)
}
  0x44   :  { %100 = dma.hbm_to_vmem [thread:$0]  %s4005_s8, 14336, %s95_s27, [#allocation12], %s3819_s12, %s3819_s12, %s3820_s13  }
  0x45   :  { %3802 = dma.done.wait [#allocation3], 1792  }
  0x46   :  { %3803 = vsyncadd [#allocation3], 4294965504 }
  0x47   :  { %3804 = dma.done.wait [#allocation6], 14848  }
  0x48   :  { %3805 = vsyncadd [#allocation6], 4294952448 }
  0x49   :  { %3806 = dma.done.wait [#allocation9], 6144  }
  0x4a   :  { %3807 = vsyncadd [#allocation9], 4294961152 }
  0x4b   :  { %3808 = dma.done.wait [#allocation12], 14336  }
  0x4c   :  { %3809 = vsyncadd [#allocation12], 4294952960  ;;  %v3110_v0 = vld [vmem:[#allocation7 + $0x74] ss:$8 sps:$4 sm:$0xff]   ;;  %v3112_v1 = vld [vmem:[#allocation7 + $0x70] ss:$8 sps:$4 sm:$0xff]  }
  0x4d   :  { %894 = vmatprep.subr.bf16.mxu0 %v3110_v0  ;;  %v3113_v2 = vld [vmem:[#allocation7 + $0x174] ss:$8 sps:$4 sm:$0xff]   ;;  %v3115_v3 = vld [vmem:[#allocation7 + $0x170] ss:$8 sps:$4 sm:$0xff]   ;;  %v3116_v4 = vld [vmem:[#allocation7 + $0x64] ss:$8 sps:$4 sm:$0xff]  }
  0x4e   :  { %895 = vmatpush1.bf16.msra.mxu0 %v3112_v1  ;;  %v3118_v5 = vld [vmem:[#allocation7 + $0x60] ss:$8 sps:$4 sm:$0xff]   ;;  %947 = vmatprep.subr.bf16.mxu1 %v3113_v2  ;;  %v3119_v6 = vld [vmem:[#allocation7 + $0x164] ss:$8 sps:$4 sm:$0xff]   ;;  %v3122_v8 = vld [vmem:[#allocation7 + $0x54] ss:$8 sps:$4 sm:$0xff]  }
  0x4f   :  { %948 = vmatpush1.bf16.msra.mxu1 %v3115_v3  ;;  %896 = vmatprep.subr.bf16.mxu0 %v3116_v4  ;;  %v3121_v7 = vld [vmem:[#allocation7 + $0x160] ss:$8 sps:$4 sm:$0xff]   ;;  %v3124_v9 = vld [vmem:[#allocation7 + $0x50] ss:$8 sps:$4 sm:$0xff]   ;;  %v3125_v10 = vld [vmem:[#allocation7 + $0x154] ss:$8 sps:$4 sm:$0xff]  }
  0x50   :  { %949 = vmatprep.subr.bf16.mxu1 %v3119_v6  ;;  %v3128_v11 = vld [vmem:[#allocation7 + $0x44] ss:$8 sps:$4 sm:$0xff]   ;;  %v3127_v12 = vld [vmem:[#allocation7 + $0x150] ss:$8 sps:$4 sm:$0xff]   ;;  %v3130_v14 = vld [vmem:[#allocation7 + $0x40] ss:$8 sps:$4 sm:$0xff]  }
  0x51   :  { %v3131_v13 = vld [vmem:[#allocation7 + $0x144] ss:$8 sps:$4 sm:$0xff]   ;;  %v3134_v15 = vld [vmem:[#allocation7 + $0x34] ss:$8 sps:$4 sm:$0xff]   ;;  %v3133_v16 = vld [vmem:[#allocation7 + $0x140] ss:$8 sps:$4 sm:$0xff]  }
  0x52   :  { %897 = vmatpush1.bf16.msra.mxu0 %v3118_v5  ;;  %v3137_v17 = vld [vmem:[#allocation7 + $0x134] ss:$8 sps:$4 sm:$0xff]   ;;  %v3136_v18 = vld [vmem:[#allocation7 + $0x30] ss:$8 sps:$4 sm:$0xff]   ;;  %v3140_v19 = vld [vmem:[#allocation7 + $0x24] ss:$8 sps:$4 sm:$0xff]  }
  0x53   :  { %898 = vmatprep.subr.bf16.mxu0 %v3122_v8  ;;  %950 = vmatpush1.bf16.msra.mxu1 %v3121_v7  ;;  %v3139_v20 = vld [vmem:[#allocation7 + $0x130] ss:$8 sps:$4 sm:$0xff]   ;;  %v3143_v21 = vld [vmem:[#allocation7 + $0x124] ss:$8 sps:$4 sm:$0xff]   ;;  %v3142_v22 = vld [vmem:[#allocation7 + $0x20] ss:$8 sps:$4 sm:$0xff]  }
  0x54   :  { %951 = vmatprep.subr.bf16.mxu1 %v3125_v10  ;;  %v3146_v23 = vld [vmem:[#allocation7 + $0x14] ss:$8 sps:$4 sm:$0xff]   ;;  %v3145_v24 = vld [vmem:[#allocation7 + $0x120] ss:$8 sps:$4 sm:$0xff]   ;;  %v3148_v26 = vld [vmem:[#allocation7 + $0x10] ss:$8 sps:$4 sm:$0xff]  }
  0x55   :  { %v3149_v25 = vld [vmem:[#allocation7 + $0x114] ss:$8 sps:$4 sm:$0xff]   ;;  %v3152_v27 = vld [vmem:[#allocation7 + $0x4] ss:$8 sps:$4 sm:$0xff]   ;;  %v3151_v28 = vld [vmem:[#allocation7 + $0x110] ss:$8 sps:$4 sm:$0xff]  }
  0x56   :  { %899 = vmatpush1.bf16.msra.mxu0 %v3124_v9  ;;  %v3155_v29 = vld [vmem:[#allocation7 + $0x104] ss:$8 sps:$4 sm:$0xff]   ;;  %v3154_v30 = vld [vmem:[#allocation7] ss:$8 sps:$4 sm:$0xff]   ;;  %v3158_v31 = vld [vmem:[#allocation7 + $0xf4] ss:$8 sps:$4 sm:$0xff]  }
  0x57   :  { %900 = vmatprep.subr.bf16.mxu0 %v3128_v11  ;;  %952 = vmatpush1.bf16.msra.mxu1 %v3127_v12  ;;  %v3157_v32 = vld [vmem:[#allocation7 + $0x100] ss:$8 sps:$4 sm:$0xff]   ;;  %v3161_v33 = vld [vmem:[#allocation7 + $0x1f4] ss:$8 sps:$4 sm:$0xff]   ;;  %v3160_v34 = vld [vmem:[#allocation7 + $0xf0] ss:$8 sps:$4 sm:$0xff]  }
  0x58   :  { %953 = vmatprep.subr.bf16.mxu1 %v3131_v13  ;;  %v3164_v35 = vld [vmem:[#allocation7 + $0xe4] ss:$8 sps:$4 sm:$0xff]   ;;  %v3163_v36 = vld [vmem:[#allocation7 + $0x1f0] ss:$8 sps:$4 sm:$0xff]   ;;  %v3166_v38 = vld [vmem:[#allocation7 + $0xe0] ss:$8 sps:$4 sm:$0xff]  }
  0x59   :  { %v3167_v37 = vld [vmem:[#allocation7 + $0x1e4] ss:$8 sps:$4 sm:$0xff]   ;;  %v3170_v39 = vld [vmem:[#allocation7 + $0xd4] ss:$8 sps:$4 sm:$0xff]   ;;  %v3169_v40 = vld [vmem:[#allocation7 + $0x1e0] ss:$8 sps:$4 sm:$0xff]  }
  0x5a   :  { %901 = vmatpush1.bf16.msra.mxu0 %v3130_v14  ;;  %v3173_v41 = vld [vmem:[#allocation7 + $0x1d4] ss:$8 sps:$4 sm:$0xff]   ;;  %v3172_v42 = vld [vmem:[#allocation7 + $0xd0] ss:$8 sps:$4 sm:$0xff]   ;;  %v3176_v43 = vld [vmem:[#allocation7 + $0xc4] ss:$8 sps:$4 sm:$0xff]  }
  0x5b   :  { %902 = vmatprep.subr.bf16.mxu0 %v3134_v15  ;;  %954 = vmatpush1.bf16.msra.mxu1 %v3133_v16  ;;  %v3175_v44 = vld [vmem:[#allocation7 + $0x1d0] ss:$8 sps:$4 sm:$0xff]   ;;  %v3179_v45 = vld [vmem:[#allocation7 + $0x1c4] ss:$8 sps:$4 sm:$0xff]   ;;  %v3178_v46 = vld [vmem:[#allocation7 + $0xc0] ss:$8 sps:$4 sm:$0xff]  }
  0x5c   :  { %955 = vmatprep.subr.bf16.mxu1 %v3137_v17  ;;  %v3207_v47 = vld [vmem:[#allocation2 + $0x4] ss:$28 sps:$4 sm:$0xff]   ;;  %v3181_v49 = vld [vmem:[#allocation7 + $0x1c0] ss:$8 sps:$4 sm:$0xff]   ;;  %v3214_v51 = vld [vmem:[#allocation2 + $0xc] ss:$28 sps:$4 sm:$0xff]  }
  0x5d   :  { %v3182_v48 = vld [vmem:[#allocation7 + $0xb4] ss:$8 sps:$4 sm:$0xff]   ;;  %926 = vmatprep.mubr.bf16.mxu0 %v3207_v47  ;;  %v3184_v52 = vld [vmem:[#allocation7 + $0xb0] ss:$8 sps:$4 sm:$0xff]   ;;  %v3188_v53 = vld [vmem:[#allocation7 + $0xa4] ss:$8 sps:$4 sm:$0xff]   ;;  %979 = vmatprep.mubr.bf16.mxu1 %v3214_v51 }
  0x5e   :  { %903 = vmatpush1.bf16.msra.mxu0 %v3136_v18  ;;  %v3185_v50 = vld [vmem:[#allocation7 + $0x1b4] ss:$8 sps:$4 sm:$0xff]   ;;  %v3187_v54 = vld [vmem:[#allocation7 + $0x1b0] ss:$8 sps:$4 sm:$0xff]   ;;  %v3191_v55 = vld [vmem:[#allocation7 + $0x1a4] ss:$8 sps:$4 sm:$0xff]  }
  0x5f   :  { %904 = vmatprep.subr.bf16.mxu0 %v3140_v19  ;;  %956 = vmatpush1.bf16.msra.mxu1 %v3139_v20  ;;  %v3190_v56 = vld [vmem:[#allocation7 + $0xa0] ss:$8 sps:$4 sm:$0xff]   ;;  %v3194_v57 = vld [vmem:[#allocation7 + $0x94] ss:$8 sps:$4 sm:$0xff]   ;;  %v3196_v60 = vld [vmem:[#allocation7 + $0x90] ss:$8 sps:$4 sm:$0xff]  }
  0x60   :  { %957 = vmatprep.subr.bf16.mxu1 %v3143_v21  ;;  %v3193_v58 = vld [vmem:[#allocation7 + $0x1a0] ss:$8 sps:$4 sm:$0xff]   ;;  %v3197_v59 = vld [vmem:[#allocation7 + $0x194] ss:$8 sps:$4 sm:$0xff]   ;;  %v3200_v61 = vld [vmem:[#allocation7 + $0x84] ss:$8 sps:$4 sm:$0xff]  }
  0x61   :  { %v3199_v62 = vld [vmem:[#allocation7 + $0x190] ss:$8 sps:$4 sm:$0xff]   ;;  %v3203_v63 = vld [vmem:[#allocation7 + $0x184] ss:$8 sps:$4 sm:$0xff]   ;;  %v3202_v0 = vld [vmem:[#allocation7 + $0x80] ss:$8 sps:$4 sm:$0xff]  }
  0x62   :  { %905 = vmatpush1.bf16.msra.mxu0 %v3142_v22  ;;  %v3211_v1 = vld [vmem:[#allocation7 + $0x274] ss:$8 sps:$4 sm:$0xff]   ;;  %v3208_v2 = vld [vmem:[#allocation7 + $0x180] ss:$8 sps:$4 sm:$0xff]   ;;  %v3205_v3 = vld [vmem:[#allocation2] ss:$28 sps:$4 sm:$0xff]  }
  0x63   :  { %906 = vmatprep.subr.bf16.mxu0 %v3146_v23  ;;  %958 = vmatpush1.bf16.msra.mxu1 %v3145_v24  ;;  %v3238_v4 = vld [vmem:[#allocation7 + $0x374] ss:$8 sps:$4 sm:$0xff]   ;;  %v3209_v5 = vld [vmem:[#allocation7 + $0x270] ss:$8 sps:$4 sm:$0xff]   ;;  %v3217_v7 = vld [vmem:[#allocation7 + $0x264] ss:$8 sps:$4 sm:$0xff]  }
  0x64   :  { %959 = vmatprep.subr.bf16.mxu1 %v3149_v25  ;;  %v3212_v6 = vld [vmem:[#allocation2 + $0x8] ss:$28 sps:$4 sm:$0xff]   ;;  %v3244_v9 = vld [vmem:[#allocation7 + $0x364] ss:$8 sps:$4 sm:$0xff]   ;;  %v3215_v10 = vld [vmem:[#allocation7 + $0x260] ss:$8 sps:$4 sm:$0xff]  }
  0x65   :  { %v3236_v8 = vld [vmem:[#allocation7 + $0x370] ss:$8 sps:$4 sm:$0xff]   ;;  %v3220_v11 = vld [vmem:[#allocation7 + $0x254] ss:$8 sps:$4 sm:$0xff]   ;;  %v3242_v13 = vld [vmem:[#allocation7 + $0x360] ss:$8 sps:$4 sm:$0xff]  }
  0x66   :  { %907 = vmatpush1.bf16.msra.mxu0 %v3148_v26  ;;  %v3218_v12 = vld [vmem:[#allocation7 + $0x250] ss:$8 sps:$4 sm:$0xff]   ;;  %v3223_v14 = vld [vmem:[#allocation7 + $0x244] ss:$8 sps:$4 sm:$0xff]   ;;  %v3250_v15 = vld [vmem:[#allocation7 + $0x354] ss:$8 sps:$4 sm:$0xff]  }
  0x67   :  { %908 = vmatprep.subr.bf16.mxu0 %v3152_v27  ;;  %960 = vmatpush1.bf16.msra.mxu1 %v3151_v28  ;;  %v3248_v16 = vld [vmem:[#allocation7 + $0x350] ss:$8 sps:$4 sm:$0xff]   ;;  %v3269_v17 = vld [vmem:[#allocation2 + $0x3c] ss:$28 sps:$4 sm:$0xff]   ;;  %v3226_v23 = vld [vmem:[#allocation7 + $0x234] ss:$8 sps:$4 sm:$0xff]  }
  0x68   :  { %961 = vmatprep.subr.bf16.mxu1 %v3155_v29  ;;  %v3271_v18 = vld [vmem:[#allocation2 + $0x38] ss:$28 sps:$4 sm:$0xff]   ;;  %v3272_v19 = vld [vmem:[#allocation2 + $0x44] ss:$28 sps:$4 sm:$0xff]   ;;  %v3824_v25 = vmov 0  }
  0x69   :  { %v3274_v20 = vld [vmem:[#allocation2 + $0x40] ss:$28 sps:$4 sm:$0xff]   ;;  %v3221_v22 = vld [vmem:[#allocation7 + $0x240] ss:$8 sps:$4 sm:$0xff]   ;;  %v3262_v26 = vld [vmem:[#allocation7 + $0x334] ss:$8 sps:$4 sm:$0xff]  }
  0x6a   :  { %909 = vmatpush1.bf16.msra.mxu0 %v3154_v30  ;;  %v3256_v21 = vld [vmem:[#allocation7 + $0x344] ss:$8 sps:$4 sm:$0xff]   ;;  %v3254_v24 = vld [vmem:[#allocation7 + $0x340] ss:$8 sps:$4 sm:$0xff]   ;;  %v3224_v27 = vld [vmem:[#allocation7 + $0x230] ss:$8 sps:$4 sm:$0xff]  }
  0x6b   :  { %910 = vmatprep.subr.bf16.mxu0 %v3158_v31  ;;  %962 = vmatpush1.bf16.msra.mxu1 %v3157_v32  ;;  %v3229_v28 = vld [vmem:[#allocation7 + $0x224] ss:$8 sps:$4 sm:$0xff]   ;;  %v3260_v29 = vld [vmem:[#allocation7 + $0x330] ss:$8 sps:$4 sm:$0xff]   ;;  %v3227_v32 = vld [vmem:[#allocation7 + $0x220] ss:$8 sps:$4 sm:$0xff]  }
  0x6c   :  { %963 = vmatprep.subr.bf16.mxu1 %v3161_v33  ;;  %v3268_v30 = vld [vmem:[#allocation7 + $0x324] ss:$8 sps:$4 sm:$0xff]   ;;  %v3232_v33 = vld [vmem:[#allocation7 + $0x214] ss:$8 sps:$4 sm:$0xff]   ;;  %v3257_v51 = vld [vmem:[#allocation7 + $0x2c0] ss:$8 sps:$4 sm:$0xff]  }
  0x6d   :  { %v3293_v31 = vld [vmem:[#allocation2 + $0x14] ss:$28 sps:$4 sm:$0xff]   ;;  %v3253_v47 = vld [vmem:[#allocation7 + $0x2d4] ss:$8 sps:$4 sm:$0xff]  }
  0x6e   :  { %911 = vmatpush2.bf16.msra.mxu0 %v3160_v34  ;;  %v3266_v34 = vld [vmem:[#allocation7 + $0x320] ss:$8 sps:$4 sm:$0xff]  }
  0x6f   :  { %912 = vmatprep.subr.bf16.mxu0 %v3164_v35  ;;  %964 = vmatpush2.bf16.msra.mxu1 %v3163_v36  ;;  %v3280_v35 = vld [vmem:[#allocation7 + $0x314] ss:$8 sps:$4 sm:$0xff]   ;;  %v3230_v36 = vld [vmem:[#allocation7 + $0x210] ss:$8 sps:$4 sm:$0xff]  }
  0x70   :  { %965 = vmatprep.subr.bf16.mxu1 %v3167_v37  ;;  %v3235_v37 = vld [vmem:[#allocation7 + $0x204] ss:$8 sps:$4 sm:$0xff]  }
  0x72   :  { %913 = vmatpush2.bf16.msra.mxu0 %v3166_v38  ;;  %v3278_v38 = vld [vmem:[#allocation7 + $0x310] ss:$8 sps:$4 sm:$0xff]  }
  0x73   :  { %914 = vmatprep.subr.bf16.mxu0 %v3170_v39  ;;  %966 = vmatpush2.bf16.msra.mxu1 %v3169_v40  ;;  %v3286_v39 = vld [vmem:[#allocation7 + $0x304] ss:$8 sps:$4 sm:$0xff]   ;;  %v3233_v40 = vld [vmem:[#allocation7 + $0x200] ss:$8 sps:$4 sm:$0xff]  }
  0x74   :  { %967 = vmatprep.subr.bf16.mxu1 %v3173_v41  ;;  %v3241_v41 = vld [vmem:[#allocation7 + $0x2f4] ss:$8 sps:$4 sm:$0xff]  }
  0x76   :  { %915 = vmatpush2.bf16.msra.mxu0 %v3172_v42  ;;  %v3284_v42 = vld [vmem:[#allocation7 + $0x300] ss:$8 sps:$4 sm:$0xff]  }
  0x77   :  { %916 = vmatprep.subr.bf16.mxu0 %v3176_v43  ;;  %968 = vmatpush2.bf16.msra.mxu1 %v3175_v44  ;;  %v3239_v43 = vld [vmem:[#allocation7 + $0x2f0] ss:$8 sps:$4 sm:$0xff]   ;;  %v3247_v44 = vld [vmem:[#allocation7 + $0x2e4] ss:$8 sps:$4 sm:$0xff]  }
  0x78   :  { %969 = vmatprep.subr.bf16.mxu1 %v3179_v45  ;;  %v3290_v45 = vld [vmem:[#allocation2 + $0x18] ss:$28 sps:$4 sm:$0xff]  }
  0x7a   :  { %917 = vmatpush2.bf16.msra.mxu0 %v3178_v46  ;;  %v3245_v46 = vld [vmem:[#allocation7 + $0x2e0] ss:$8 sps:$4 sm:$0xff]  }
  0x7b   :  { %918 = vmatprep.subr.bf16.mxu0 %v3182_v48  ;;  %970 = vmatpush2.bf16.msra.mxu1 %v3181_v49  ;;  %v3251_v48 = vld [vmem:[#allocation7 + $0x2d0] ss:$8 sps:$4 sm:$0xff]   ;;  %v3259_v49 = vld [vmem:[#allocation7 + $0x2c4] ss:$8 sps:$4 sm:$0xff]  }
  0x7c   :  { %971 = vmatprep.subr.bf16.mxu1 %v3185_v50  ;;  %v3297_v50 = vld [vmem:[#allocation2 + $0x50] ss:$28 sps:$4 sm:$0xff]  }
  0x7e   :  { %919 = vmatpush2.bf16.msra.mxu0 %v3184_v52  ;;  %v3265_v52 = vld [vmem:[#allocation7 + $0x2b4] ss:$8 sps:$4 sm:$0xff]  }
  0x7f   :  { %920 = vmatprep.subr.bf16.mxu0 %v3188_v53  ;;  %972 = vmatpush2.bf16.msra.mxu1 %v3187_v54  ;;  %v3263_v53 = vld [vmem:[#allocation7 + $0x2b0] ss:$8 sps:$4 sm:$0xff]   ;;  %v3277_v54 = vld [vmem:[#allocation7 + $0x2a4] ss:$8 sps:$4 sm:$0xff]  }
  0x80   :  { %973 = vmatprep.subr.bf16.mxu1 %v3191_v55  ;;  %v3275_v55 = vld [vmem:[#allocation7 + $0x2a0] ss:$8 sps:$4 sm:$0xff]  }
  0x82   :  { %921 = vmatpush2.bf16.msra.mxu0 %v3190_v56  ;;  %v3283_v56 = vld [vmem:[#allocation7 + $0x294] ss:$8 sps:$4 sm:$0xff]  }
  0x83   :  { %922 = vmatprep.subr.bf16.mxu0 %v3194_v57  ;;  %974 = vmatpush2.bf16.msra.mxu1 %v3193_v58  ;;  %v3281_v57 = vld [vmem:[#allocation7 + $0x290] ss:$8 sps:$4 sm:$0xff]   ;;  %v3289_v58 = vld [vmem:[#allocation7 + $0x284] ss:$8 sps:$4 sm:$0xff]  }
  0x84   :  { %975 = vmatprep.subr.bf16.mxu1 %v3197_v59  ;;  %v3287_v59 = vld [vmem:[#allocation7 + $0x280] ss:$8 sps:$4 sm:$0xff]  }
  0x86   :  { %923 = vmatpush2.bf16.msra.mxu0 %v3196_v60  ;;  %v3291_v60 = vld [vmem:[#allocation2 + $0x10] ss:$28 sps:$4 sm:$0xff]  }
  0x87   :  { %924 = vmatprep.subr.bf16.mxu0 %v3200_v61  ;;  %976 = vmatpush2.bf16.msra.mxu1 %v3199_v62  ;;  %v3294_v61 = vld [vmem:[#allocation2 + $0x4c] ss:$28 sps:$4 sm:$0xff]  }
  0x88   :  { %977 = vmatprep.subr.bf16.mxu1 %v3203_v63  ;;  %v3296_v62 = vld [vmem:[#allocation2 + $0x48] ss:$28 sps:$4 sm:$0xff]  }
  0x89   :  { %v3298_v63 = vld [vmem:[#allocation8 + $0x70] ss:$8 sps:$4 sm:$0xff]  }
  0x8a   :  { %925 = vmatpush2.bf16.msra.mxu0 %v3202_v0  ;;  %v3300_v0 = vld [vmem:[#allocation8 + $0x74] ss:$8 sps:$4 sm:$0xff]  }
  0x8b   :  { %1000 = vmatprep.subr.bf16.mxu0 %v3211_v1  ;;  %978 = vmatpush2.bf16.msra.mxu1 %v3208_v2  ;;  %v3303_v1 = vld [vmem:[#allocation8 + $0x64] ss:$8 sps:$4 sm:$0xff]   ;;  %v3301_v2 = vld [vmem:[#allocation8 + $0x60] ss:$8 sps:$4 sm:$0xff]  }
  0x8c   :  { %1053 = vmatprep.subr.bf16.mxu1 %v3238_v4  ;;  %v3304_v4 = vld [vmem:[#allocation8 + $0x50] ss:$8 sps:$4 sm:$0xff]  }
  0x8d   :  { %927 = vmatmul.mubr.bf16.vlgmr.msra.gmra.mxu0 %v3205_v3  ;;  %v3306_v3 = vld [vmem:[#allocation8 + $0x54] ss:$8 sps:$4 sm:$0xff]  }
  0x8e   :  { %1001 = vmatpush1.bf16.msra.mxu0 %v3209_v5  ;;  %980 = vmatmul.mubr.bf16.vlgmr.msra.gmra.mxu1 %v3212_v6  ;;  %v3309_v5 = vld [vmem:[#allocation8 + $0x44] ss:$8 sps:$4 sm:$0xff]   ;;  %v3307_v6 = vld [vmem:[#allocation8 + $0x40] ss:$8 sps:$4 sm:$0xff]  }
  0x8f   :  { %1002 = vmatprep.subr.bf16.mxu0 %v3217_v7  ;;  %1054 = vmatpush1.bf16.msra.mxu1 %v3236_v8  ;;  %v3312_v7 = vld [vmem:[#allocation8 + $0x34] ss:$8 sps:$4 sm:$0xff]   ;;  %v3310_v8 = vld [vmem:[#allocation8 + $0x30] ss:$8 sps:$4 sm:$0xff]  }
  0x90   :  { %1055 = vmatprep.subr.bf16.mxu1 %v3244_v9  ;;  %936 = vmatprep.mubr.bf16.mxu0 %v3269_v17  ;;  %v3315_v9 = vld [vmem:[#allocation8 + $0x24] ss:$8 sps:$4 sm:$0xff]  }
  0x91   :  { %989 = vmatprep.mubr.bf16.mxu1 %v3272_v19  ;;  %v3327_v17 = vld [vmem:[#allocation8 + $0xe4] ss:$8 sps:$4 sm:$0xff]   ;;  %v3330_v19 = vld [vmem:[#allocation8 + $0xd4] ss:$8 sps:$4 sm:$0xff]  }
  0x92   :  { %1003 = vmatpush1.bf16.msra.mxu0 %v3215_v10  ;;  %v3313_v10 = vld [vmem:[#allocation8 + $0x20] ss:$8 sps:$4 sm:$0xff]  }
  0x93   :  { %1004 = vmatprep.subr.bf16.mxu0 %v3220_v11  ;;  %1056 = vmatpush1.bf16.msra.mxu1 %v3242_v13  ;;  %v3318_v11 = vld [vmem:[#allocation8 + $0x14] ss:$8 sps:$4 sm:$0xff]   ;;  %v3321_v13 = vld [vmem:[#allocation8 + $0x4] ss:$8 sps:$4 sm:$0xff]  }
  0x94   :  { %1057 = vmatprep.subr.bf16.mxu1 %v3250_v15  ;;  %v3324_v15 = vld [vmem:[#allocation8 + $0xf4] ss:$8 sps:$4 sm:$0xff]  }
  0x95   :  { %937 = vmatmul.mubr.bf16.gmra.mxu0 %v3271_v18  ;;  %v3325_v18 = vld [vmem:[#allocation8 + $0xe0] ss:$8 sps:$4 sm:$0xff]  }
  0x96   :  { %1005 = vmatpush1.bf16.msra.mxu0 %v3218_v12  ;;  %990 = vmatmul.mubr.bf16.gmra.mxu1 %v3274_v20  ;;  %v3316_v12 = vld [vmem:[#allocation8 + $0x10] ss:$8 sps:$4 sm:$0xff]  }
  0x97   :  { %1006 = vmatprep.subr.bf16.mxu0 %v3223_v14  ;;  %1058 = vmatpush1.bf16.msra.mxu1 %v3248_v16  ;;  %v3319_v14 = vld [vmem:[#allocation8] ss:$8 sps:$4 sm:$0xff]   ;;  %v3322_v16 = vld [vmem:[#allocation8 + $0xf0] ss:$8 sps:$4 sm:$0xff]  }
  0x98   :  { %1085 = vmatprep.mubr.bf16.mxu1 %v3824_v25  ;;  %1059 = vmatprep.subr.bf16.mxu1 %v3256_v21  ;;  %v3328_v20 = vld [vmem:[#allocation8 + $0xd0] ss:$8 sps:$4 sm:$0xff]   ;;  %v3333_v21 = vld [vmem:[#allocation8 + $0xc4] ss:$8 sps:$4 sm:$0xff]  }
  0x99   :  { %1032 = vmatprep.mubr.bf16.mxu0 %v3293_v31  ;;  %v3343_v31 = vld [vmem:[#allocation8 + $0x80] ss:$8 sps:$4 sm:$0xff]  }
  0x9a   :  { %1007 = vmatpush1.bf16.msra.mxu0 %v3221_v22  ;;  %v3331_v22 = vld [vmem:[#allocation8 + $0xc0] ss:$8 sps:$4 sm:$0xff]  }
  0x9b   :  { %1008 = vmatprep.subr.bf16.mxu0 %v3226_v23  ;;  %1060 = vmatpush1.bf16.msra.mxu1 %v3254_v24  ;;  %v3336_v23 = vld [vmem:[#allocation8 + $0xb4] ss:$8 sps:$4 sm:$0xff]   ;;  %v3334_v24 = vld [vmem:[#allocation8 + $0xb0] ss:$8 sps:$4 sm:$0xff]  }
  0x9c   :  { %1061 = vmatprep.subr.bf16.mxu1 %v3262_v26  ;;  %v3339_v26 = vld [vmem:[#allocation8 + $0xa4] ss:$8 sps:$4 sm:$0xff]  }
  0x9e   :  { %1009 = vmatpush1.bf16.msra.mxu0 %v3224_v27  ;;  %v3337_v27 = vld [vmem:[#allocation8 + $0xa0] ss:$8 sps:$4 sm:$0xff]  }
  0x9f   :  { %1010 = vmatprep.subr.bf16.mxu0 %v3229_v28  ;;  %1062 = vmatpush1.bf16.msra.mxu1 %v3260_v29  ;;  %v3342_v28 = vld [vmem:[#allocation8 + $0x94] ss:$8 sps:$4 sm:$0xff]   ;;  %v3340_v29 = vld [vmem:[#allocation8 + $0x90] ss:$8 sps:$4 sm:$0xff]  }
  0xa0   :  { %1063 = vmatprep.subr.bf16.mxu1 %v3268_v30  ;;  %v3345_v30 = vld [vmem:[#allocation8 + $0x84] ss:$8 sps:$4 sm:$0xff]  }
  0xa2   :  { %1011 = vmatpush1.bf16.msra.mxu0 %v3227_v32  ;;  %v3346_v32 = vld [vmem:[#allocation10 + $0x70] ss:$8 sps:$4 sm:$0xff]  }
  0xa3   :  { %1012 = vmatprep.subr.bf16.mxu0 %v3232_v33  ;;  %1064 = vmatpush1.bf16.msra.mxu1 %v3266_v34  ;;  %v3348_v33 = vld [vmem:[#allocation10 + $0x74] ss:$8 sps:$4 sm:$0xff]   ;;  %v3351_v34 = vld [vmem:[#allocation10 + $0x64] ss:$8 sps:$4 sm:$0xff]  }
  0xa4   :  { %1065 = vmatprep.subr.bf16.mxu1 %v3280_v35  ;;  %v3349_v35 = vld [vmem:[#allocation10 + $0x60] ss:$8 sps:$4 sm:$0xff]  }
  0xa6   :  { %1013 = vmatpush1.bf16.msra.mxu0 %v3230_v36  ;;  %v3354_v36 = vld [vmem:[#allocation10 + $0x54] ss:$8 sps:$4 sm:$0xff]  }
  0xa7   :  { %1014 = vmatprep.subr.bf16.mxu0 %v3235_v37  ;;  %1066 = vmatpush1.bf16.msra.mxu1 %v3278_v38  ;;  %v3352_v37 = vld [vmem:[#allocation10 + $0x50] ss:$8 sps:$4 sm:$0xff]   ;;  %v3357_v38 = vld [vmem:[#allocation10 + $0x44] ss:$8 sps:$4 sm:$0xff]  }
  0xa8   :  { %1067 = vmatprep.subr.bf16.mxu1 %v3286_v39  ;;  %v3355_v39 = vld [vmem:[#allocation10 + $0x40] ss:$8 sps:$4 sm:$0xff]  }
  0xaa   :  { %1015 = vmatpush1.bf16.msra.mxu0 %v3233_v40  ;;  %v3360_v40 = vld [vmem:[#allocation10 + $0x34] ss:$8 sps:$4 sm:$0xff]  }
  0xab   :  { %1016 = vmatprep.subr.bf16.mxu0 %v3241_v41  ;;  %1068 = vmatpush1.bf16.msra.mxu1 %v3284_v42  ;;  %v3358_v41 = vld [vmem:[#allocation10 + $0x30] ss:$8 sps:$4 sm:$0xff]  }
  0xac   :  { %1322 = vmatprep.subr.bf16.mxu1 %v3300_v0 }
  0xae   :  { %1017 = vmatpush2.bf16.msra.mxu0 %v3239_v43  ;;  %1086 = vmatmul.mubr.bf16.vlgmr.msra.gmra.mxu1 %v3290_v45 }
  0xaf   :  { %1018 = vmatprep.subr.bf16.mxu0 %v3247_v44  ;;  %1095 = vmatprep.mubr.bf16.mxu1 %v3824_v25 }
  0xb0   :  { %1323 = vmatpush1.bf16.msra.mxu1 %v3298_v63 }
  0xb1   :  { %1324 = vmatprep.subr.bf16.mxu1 %v3303_v1 }
  0xb2   :  { %1019 = vmatpush2.bf16.msra.mxu0 %v3245_v46 }
  0xb3   :  { %1020 = vmatprep.subr.bf16.mxu0 %v3253_v47 }
  0xb4   :  { %1325 = vmatpush1.bf16.msra.mxu1 %v3301_v2 }
  0xb5   :  { %1326 = vmatprep.subr.bf16.mxu1 %v3306_v3 }
  0xb6   :  { %1021 = vmatpush2.bf16.msra.mxu0 %v3251_v48  ;;  %1096 = vmatmul.mubr.bf16.gmra.mxu1 %v3297_v50 }
  0xb7   :  { %1022 = vmatprep.subr.bf16.mxu0 %v3259_v49 }
  0xb8   :  { %1327 = vmatpush1.bf16.msra.mxu1 %v3304_v4 }
  0xb9   :  { %1328 = vmatprep.subr.bf16.mxu1 %v3309_v5 }
  0xba   :  { %1023 = vmatpush2.bf16.msra.mxu0 %v3257_v51 }
  0xbb   :  { %1024 = vmatprep.subr.bf16.mxu0 %v3265_v52  ;;  %v252_v52 = vlaneseq }
  0xbc   :  { %1329 = vmatpush1.bf16.msra.mxu1 %v3307_v6 }
  0xbd   :  { %1330 = vmatprep.subr.bf16.mxu1 %v3312_v7 }
  0xbe   :  { %1025 = vmatpush2.bf16.msra.mxu0 %v3263_v53 }
  0xbf   :  { %1026 = vmatprep.subr.bf16.mxu0 %v3277_v54 }
  0xc0   :  { %1331 = vmatpush1.bf16.msra.mxu1 %v3310_v8 }
  0xc1   :  { %1332 = vmatprep.subr.bf16.mxu1 %v3315_v9 }
  0xc2   :  { %1027 = vmatpush2.bf16.msra.mxu0 %v3275_v55  ;;  %v3930_v55 = vshrl.u32 %v252_v52, 7 }
  0xc3   :  { %1028 = vmatprep.subr.bf16.mxu0 %v3283_v56 }
  0xc4   :  { %1333 = vmatpush1.bf16.msra.mxu1 %v3313_v10 }
  0xc5   :  { %1334 = vmatprep.subr.bf16.mxu1 %v3318_v11 }
  0xc6   :  { %1029 = vmatpush2.bf16.msra.mxu0 %v3281_v57 }
  0xc7   :  { %1030 = vmatprep.subr.bf16.mxu0 %v3289_v58  ;;  %v3933_v58 = vsub.s32 1, %v3930_v55 }
  0xc8   :  { %1335 = vmatpush1.bf16.msra.mxu1 %v3316_v12 }
  0xc9   :  { %1336 = vmatprep.subr.bf16.mxu1 %v3321_v13 }
  0xca   :  { %1031 = vmatpush2.bf16.msra.mxu0 %v3287_v59  ;;  %v250_v59 = vld [vmem:[%s4000_s3] sm:$0x3] }
  0xcb   :  { %1497 = vmatprep.subr.bf16.mxu0 %v3348_v33  ;;  %v259_v63 = vrot.slane %v250_v59, %v3933_v58 }
  0xcc   :  { %1337 = vmatpush1.bf16.msra.mxu1 %v3319_v14 }
  0xcd   :  { %1033 = vmatmul.mubr.bf16.vlgmr.msra.gmra.mxu0 %v3291_v60  ;;  %1338 = vmatprep.subr.bf16.mxu1 %v3324_v15  ;;  %v3939_v60 = vsub.s32 0, %v3930_v55 }
  0xce   :  { %1042 = vmatprep.mubr.bf16.mxu0 %v3294_v61  ;;  %1498 = vmatpush1.bf16.msra.mxu0 %v3346_v32 }
  0xcf   :  { %1499 = vmatprep.subr.bf16.mxu0 %v3351_v34  ;;  %v255_v0 = vrot.slane %v250_v59, %v3939_v60 }
  0xd0   :  { %1339 = vmatpush2.bf16.msra.mxu1 %v3322_v16 }
  0xd1   :  { %1340 = vmatprep.subr.bf16.mxu1 %v3327_v17 }
  0xd2   :  { %1500 = vmatpush1.bf16.msra.mxu0 %v3349_v35 }
  0xd3   :  { %1501 = vmatprep.subr.bf16.mxu0 %v3354_v36 }
  0xd4   :  { %1341 = vmatpush2.bf16.msra.mxu1 %v3325_v18 }
  0xd5   :  { %1043 = vmatmul.mubr.bf16.gmra.mxu0 %v3296_v62  ;;  %1342 = vmatprep.subr.bf16.mxu1 %v3330_v19 }
  0xd6   :  { %1529 = vmatprep.mubr.bf16.mxu0 %v3824_v25  ;;  %1502 = vmatpush1.bf16.msra.mxu0 %v3352_v37 }
  0xd7   :  { %1503 = vmatprep.subr.bf16.mxu0 %v3357_v38 }
  0xd8   :  { %1343 = vmatpush2.bf16.msra.mxu1 %v3328_v20 }
  0xd9   :  { %1344 = vmatprep.subr.bf16.mxu1 %v3333_v21 }
  0xda   :  { %1504 = vmatpush1.bf16.msra.mxu0 %v3355_v39 }
  0xdb   :  { %1505 = vmatprep.subr.bf16.mxu0 %v3360_v40 }
  0xdc   :  { %1345 = vmatpush2.bf16.msra.mxu1 %v3331_v22 }
  0xdd   :  { %1346 = vmatprep.subr.bf16.mxu1 %v3336_v23 }
  0xde   :  { %1506 = vmatpush1.bf16.msra.mxu0 %v3358_v41 }
  0xe0   :  { %1347 = vmatpush2.bf16.msra.mxu1 %v3334_v24 }
  0xe1   :  { %1348 = vmatprep.subr.bf16.mxu1 %v3339_v26 }
  0xe4   :  { %1349 = vmatpush2.bf16.msra.mxu1 %v3337_v27 }
  0xe5   :  { %1350 = vmatprep.subr.bf16.mxu1 %v3342_v28 }
  0xe8   :  { %1351 = vmatpush2.bf16.msra.mxu1 %v3340_v29 }
  0xe9   :  { %1352 = vmatprep.subr.bf16.mxu1 %v3345_v30 }
  0xec   :  { %1353 = vmatpush2.bf16.msra.mxu1 %v3343_v31 }
 0x14d   :  { %v928_v46 = vpop.f32.mrf.mxu0 }
 0x14e   :  { %v981_v42 = vpop.f32.mrf.mxu1  ;;  %v929_v4 = vadd.f32 %v928_v46, %v255_v0 }
 0x14f   :  { %v930_v48 = vpop.f32.mrf.mxu0 }
 0x150   :  { %v983_v43 = vpop.f32.mrf.mxu1  ;;  %v931_v3 = vadd.f32 %v930_v48, %v259_v63  ;;  %v982_v11 = vadd.f32 %v981_v42, %v929_v4  ;;  %v3364_v4 = vld [vmem:[#allocation10 + $0x10] ss:$8 sps:$4 sm:$0xff]  }
 0x151   :  { %v932_v50 = vpop.f32.mrf.mxu0 }
 0x152   :  { %v985_v44 = vpop.f32.mrf.mxu1  ;;  %v933_v6 = vadd.f32 %v932_v50, %v255_v0  ;;  %v984_v9 = vadd.f32 %v983_v43, %v931_v3  ;;  %v3366_v3 = vld [vmem:[#allocation10 + $0x14] ss:$8 sps:$4 sm:$0xff]  }
 0x153   :  { %v934_v53 = vpop.f32.mrf.mxu0 }
 0x154   :  { %v987_v45 = vpop.f32.mrf.mxu1  ;;  %v935_v10 = vadd.f32 %v934_v53, %v259_v63  ;;  %v986_v14 = vadd.f32 %v985_v44, %v933_v6  ;;  %v3367_v6 = vld [vmem:[#allocation10] ss:$8 sps:$4 sm:$0xff]  }
 0x155   :  { %v938_v56 = vpop.f32.mrf.mxu0 }
 0x156   :  { %v991_v47 = vpop.f32.mrf.mxu1  ;;  %v988_v18 = vadd.f32 %v987_v45, %v935_v10  ;;  %v939_v21 = vadd.f32 %v938_v56, %v255_v0  ;;  %v3381_v10 = vld [vmem:[#allocation11 + $0x15c] ss:$28 sps:$4 sm:$0xff]  }
 0x157   :  { %v940_v61 = vpop.f32.mrf.mxu0 }
 0x158   :  { %v993_v49 = vpop.f32.mrf.mxu1  ;;  %v941_v19 = vadd.f32 %v940_v61, %v259_v63  ;;  %v992_v34 = vadd.f32 %v991_v47, %v939_v21  ;;  %v3409_v21 = vld [vmem:[#allocation11 + $0x40] ss:$28 sps:$4 sm:$0xff]  }
 0x159   :  { %v942_v1 = vpop.f32.mrf.mxu0 }
 0x15a   :  { %v995_v51 = vpop.f32.mrf.mxu1  ;;  %v943_v24 = vadd.f32 %v942_v1, %v255_v0  ;;  %v994_v31 = vadd.f32 %v993_v49, %v941_v19  ;;  %v3403_v19 = vld [vmem:[#allocation11 + $0x78] ss:$28 sps:$4 sm:$0xff]  }
 0x15b   :  { %v944_v5 = vpop.f32.mrf.mxu0 }
 0x15c   :  { %v997_v54 = vpop.f32.mrf.mxu1  ;;  %v945_v32 = vadd.f32 %v944_v5, %v259_v63  ;;  %v996_v38 = vadd.f32 %v995_v51, %v943_v24  ;;  %v3369_v5 = vld [vmem:[#allocation10 + $0x4] ss:$8 sps:$4 sm:$0xff]   ;;  %v3423_v24 = vld [vmem:[#allocation11 + $0x354] ss:$28 sps:$4 sm:$0xff]  }
 0x15e   :  { %v998_v45 = vadd.f32 %v997_v54, %v945_v32  ;;  %v3363_v54 = vld [vmem:[#allocation10 + $0x24] ss:$8 sps:$4 sm:$0xff]  }
 0x15f   :  { %1507 = vmatprep.subr.bf16.mxu0 %v3363_v54  ;;  %v3439_v32 = vld [vmem:[#allocation11 + $0x2a8] ss:$28 sps:$4 sm:$0xff]  }
 0x16e   :  { %v1087_v57 = vpop.f32.mrf.mxu1 }
 0x170   :  { %v1089_v62 = vpop.f32.mrf.mxu1 }
 0x172   :  { %v1091_v2 = vpop.f32.mrf.mxu1 }
 0x174   :  { %v1093_v8 = vpop.f32.mrf.mxu1 }
 0x176   :  { %v1097_v13 = vpop.f32.mrf.mxu1 }
 0x178   :  { %v1099_v23 = vpop.f32.mrf.mxu1 }
 0x17a   :  { %v1101_v37 = vpop.f32.mrf.mxu1 }
 0x17c   :  { %v1103_v53 = vpop.f32.mrf.mxu1 }
 0x18d   :  { %v1034_v7 = vpop.f32.mrf.mxu0 }
 0x18e   :  { %v1035_v16 = vadd.f32 %v1034_v7, %v982_v11  ;;  %v3372_v7 = vld [vmem:[#allocation11 + $0x18c] ss:$28 sps:$4 sm:$0xff]   ;;  %v3379_v11 = vld [vmem:[#allocation11 + $0x158] ss:$28 sps:$4 sm:$0xff]  }
 0x18f   :  { %v1036_v12 = vpop.f32.mrf.mxu0 }
 0x190   :  { %v1037_v15 = vadd.f32 %v1036_v12, %v984_v9  ;;  %v1088_v29 = vadd.f32 %v1087_v57, %v1035_v16  ;;  %v3375_v9 = vld [vmem:[#allocation11 + $0x194] ss:$28 sps:$4 sm:$0xff]   ;;  %v3387_v12 = vld [vmem:[#allocation11 + $0x124] ss:$28 sps:$4 sm:$0xff]  }
 0x191   :  { %v1038_v17 = vpop.f32.mrf.mxu0  ;;  %2356 = vmatprep.subr.bf16.mxu1 %v3375_v9  ;;  %v3399_v16 = vld [vmem:[#allocation11 + $0xb4] ss:$28 sps:$4 sm:$0xff]  }
 0x192   :  { %v1039_v20 = vadd.f32 %v1038_v17, %v986_v14  ;;  %v1090_v26 = vadd.f32 %v1089_v62, %v1037_v15  ;;  %v1106_v42 = vmax.f32 %v1088_v29, 0.0  ;;  %v3393_v14 = vld [vmem:[#allocation11 + $0xec] ss:$28 sps:$4 sm:$0xff]   ;;  %v3435_v29 = vld [vmem:[#allocation11 + $0x2e4] ss:$28 sps:$4 sm:$0xff]  }
 0x193   :  { %v1040_v22 = vpop.f32.mrf.mxu0  ;;  %v3391_v15 = vld [vmem:[#allocation11 + $0xe8] ss:$28 sps:$4 sm:$0xff]   ;;  %v3397_v17 = vld [vmem:[#allocation11 + $0xb0] ss:$28 sps:$4 sm:$0xff]  }
 0x194   :  { %v1092_v27 = vadd.f32 %v1091_v2, %v1039_v20  ;;  %v1041_v28 = vadd.f32 %v1040_v22, %v988_v18  ;;  %v1107_v39 = vmax.f32 %v1090_v26, 0.0  ;;  %v3361_v2 = vld [vmem:[#allocation10 + $0x20] ss:$8 sps:$4 sm:$0xff]   ;;  %v3405_v18 = vld [vmem:[#allocation11 + $0x7c] ss:$28 sps:$4 sm:$0xff]  }
 0x195   :  { %v1044_v30 = vpop.f32.mrf.mxu0  ;;  %1508 = vmatpush1.bf16.msra.mxu0 %v3361_v2  ;;  %v3411_v20 = vld [vmem:[#allocation11 + $0x44] ss:$28 sps:$4 sm:$0xff]   ;;  %v3417_v22 = vld [vmem:[#allocation11 + $0xc] ss:$28 sps:$4 sm:$0xff]   ;;  %v1378_v2 = vld [vmem:[#allocation5 + $0x18] sm:$0xff] }
 0x196   :  { %v1094_v33 = vadd.f32 %v1093_v8, %v1041_v28  ;;  %v1108_v35 = vmax.f32 %v1092_v27, 0.0  ;;  %v1045_v43 = vadd.f32 %v1044_v30, %v992_v34  ;;  %1509 = vmatprep.subr.bf16.mxu0 %v3366_v3  ;;  %v3373_v8 = vld [vmem:[#allocation11 + $0x190] ss:$28 sps:$4 sm:$0xff]   ;;  %v3429_v27 = vld [vmem:[#allocation11 + $0x31c] ss:$28 sps:$4 sm:$0xff]  }
 0x197   :  { %v1046_v36 = vpop.f32.mrf.mxu0  ;;  %v3421_v26 = vld [vmem:[#allocation11 + $0x350] ss:$28 sps:$4 sm:$0xff]   ;;  %v3427_v28 = vld [vmem:[#allocation11 + $0x318] ss:$28 sps:$4 sm:$0xff]   ;;  %v3433_v30 = vld [vmem:[#allocation11 + $0x2e0] ss:$28 sps:$4 sm:$0xff]  }
 0x198   :  { %v1109_v40 = vmax.f32 %v1094_v33, 0.0  ;;  %v1047_v41 = vadd.f32 %v1046_v36, %v994_v31  ;;  %v1114_v50 = vpack.c.bf16 %v1108_v35, %v1106_v42  ;;  %v1098_v47 = vadd.f32 %v1097_v13, %v1045_v43  ;;  %v3385_v13 = vld [vmem:[#allocation11 + $0x120] ss:$28 sps:$4 sm:$0xff]   ;;  %v3441_v31 = vld [vmem:[#allocation11 + $0x2ac] ss:$28 sps:$4 sm:$0xff]  }
 0x199   :  { %v1048_v44 = vpop.f32.mrf.mxu0  ;;  %1510 = vmatpush1.bf16.msra.mxu0 %v3364_v4  ;;  %v3447_v33 = vld [vmem:[#allocation11 + $0x274] ss:$28 sps:$4 sm:$0xff]   ;;  %v1375_v42 = vld [vmem:[#allocation5] sm:$0xff] }
 0x19a   :  { %v1049_v46 = vadd.f32 %v1048_v44, %v996_v38  ;;  %v1115_v48 = vpack.c.bf16 %v1109_v40, %v1107_v39  ;;  %v1100_v49 = vadd.f32 %v1099_v23, %v1047_v41  ;;  %v1110_v63 = vmax.f32 %v1098_v47, 0.0  ;;  %1511 = vmatprep.subr.bf16.mxu0 %v3369_v5  ;;  %v3415_v23 = vld [vmem:[#allocation11 + $0x8] ss:$28 sps:$4 sm:$0xff]   ;;  %v3445_v34 = vld [vmem:[#allocation11 + $0x270] ss:$28 sps:$4 sm:$0xff]  }
 0x19b   :  { %v1050_v52 = vpop.f32.mrf.mxu0  ;;  %v1150_v35 = vld [vmem:[%s4002_s5] sm:$0x3] }
 0x19c   :  { %v1051_v56 = vadd.f32 %v1050_v52, %v998_v45  ;;  %v1102_v57 = vadd.f32 %v1101_v37, %v1049_v46  ;;  %1354 = vmatprep.mubr.bf16.mxu1 %v1115_v48  ;;  %v1111_v61 = vmax.f32 %v1100_v49, 0.0  ;;  %v1155_v36 = vrot.slane %v1150_v35, %v3939_v60  ;;  %v1376_v46 = vld [vmem:[#allocation5 + $0x8] sm:$0xff] }
 0x19d   :  { %1355 = vmatmul.mubr.bf16.vlgmr.msra.gmra.mxu1 %v1114_v50  ;;  %1512 = vmatpush1.bf16.msra.mxu0 %v3367_v6  ;;  %v1159_v37 = vrot.slane %v1150_v35, %v3933_v58  ;;  %v3376_v5 = vld [vmem:[#allocation11 + $0x150] ss:$28 sps:$4 sm:$0xff]   ;;  %v3451_v35 = vld [vmem:[#allocation11 + $0x238] ss:$28 sps:$4 sm:$0xff]  }
 0x19e   :  { %v1104_v59 = vadd.f32 %v1103_v53, %v1051_v56  ;;  %v1112_v51 = vmax.f32 %v1102_v57, 0.0  ;;  %2303 = vmatprep.subr.bf16.mxu0 %v3372_v7  ;;  %2357 = vmatpush1.bf16.msra.mxu1 %v3373_v8  ;;  %v3384_v7 = vld [vmem:[#allocation11 + $0x11c] ss:$28 sps:$4 sm:$0xff]  }
 0x19f   :  { %2358 = vmatprep.subr.bf16.mxu1 %v3381_v10  ;;  %v3382_v10 = vld [vmem:[#allocation11 + $0x118] ss:$28 sps:$4 sm:$0xff]  }
 0x1a0   :  { %v1113_v62 = vmax.f32 %v1104_v59, 0.0  ;;  %v1116_v1 = vpack.c.bf16 %v1112_v51, %v1110_v63  ;;  %v1377_v51 = vld [vmem:[#allocation5 + $0x10] sm:$0xff] }
 0x1a2   :  { %v1117_v0 = vpack.c.bf16 %v1113_v62, %v1111_v61  ;;  %2359 = vmatpush1.bf16.msra.mxu1 %v3379_v11  ;;  %v3370_v62 = vld [vmem:[#allocation11 + $0x188] ss:$28 sps:$4 sm:$0xff]  }
 0x1a3   :  { %2360 = vmatprep.subr.bf16.mxu1 %v3387_v12  ;;  %v3390_v12 = vld [vmem:[#allocation11 + $0xe4] ss:$28 sps:$4 sm:$0xff]  }
 0x1a4   :  { %1364 = vmatprep.mubr.bf16.mxu1 %v1117_v0 }
 0x1a5   :  { %1365 = vmatmul.mubr.bf16.gmra.mxu1 %v1116_v1  ;;  %v3378_v1 = vld [vmem:[#allocation11 + $0x154] ss:$28 sps:$4 sm:$0xff]  }
 0x1a6   :  { %2361 = vmatpush1.bf16.msra.mxu1 %v3385_v13  ;;  %v3388_v13 = vld [vmem:[#allocation11 + $0xe0] ss:$28 sps:$4 sm:$0xff]  }
 0x1a7   :  { %2362 = vmatprep.subr.bf16.mxu1 %v3393_v14  ;;  %v3396_v14 = vld [vmem:[#allocation11 + $0xac] ss:$28 sps:$4 sm:$0xff]  }
 0x1aa   :  { %2363 = vmatpush1.bf16.msra.mxu1 %v3391_v15  ;;  %v3402_v15 = vld [vmem:[#allocation11 + $0x74] ss:$28 sps:$4 sm:$0xff]  }
 0x1ab   :  { %2364 = vmatprep.subr.bf16.mxu1 %v3399_v16  ;;  %v3400_v16 = vld [vmem:[#allocation11 + $0x70] ss:$28 sps:$4 sm:$0xff]  }
 0x1ae   :  { %2365 = vmatpush1.bf16.msra.mxu1 %v3397_v17  ;;  %v3408_v17 = vld [vmem:[#allocation11 + $0x3c] ss:$28 sps:$4 sm:$0xff]  }
 0x1af   :  { %2366 = vmatprep.subr.bf16.mxu1 %v3405_v18  ;;  %v3406_v18 = vld [vmem:[#allocation11 + $0x38] ss:$28 sps:$4 sm:$0xff]  }
 0x1b2   :  { %2367 = vmatpush1.bf16.msra.mxu1 %v3403_v19  ;;  %v3414_v19 = vld [vmem:[#allocation11 + $0x4] ss:$28 sps:$4 sm:$0xff]  }
 0x1b3   :  { %2368 = vmatprep.subr.bf16.mxu1 %v3411_v20  ;;  %v3412_v20 = vld [vmem:[#allocation11] ss:$28 sps:$4 sm:$0xff]  }
 0x1b6   :  { %2369 = vmatpush1.bf16.msra.mxu1 %v3409_v21  ;;  %v3420_v21 = vld [vmem:[#allocation11 + $0x34c] ss:$28 sps:$4 sm:$0xff]  }
 0x1b7   :  { %2370 = vmatprep.subr.bf16.mxu1 %v3417_v22  ;;  %v3418_v22 = vld [vmem:[#allocation11 + $0x348] ss:$28 sps:$4 sm:$0xff]  }
 0x1ba   :  { %2371 = vmatpush1.bf16.msra.mxu1 %v3415_v23  ;;  %v3426_v23 = vld [vmem:[#allocation11 + $0x314] ss:$28 sps:$4 sm:$0xff]  }
 0x1bb   :  { %2372 = vmatprep.subr.bf16.mxu1 %v3423_v24  ;;  %v3424_v24 = vld [vmem:[#allocation11 + $0x310] ss:$28 sps:$4 sm:$0xff]  }
 0x1be   :  { %2373 = vmatpush2.bf16.msra.mxu1 %v3421_v26  ;;  %v3432_v26 = vld [vmem:[#allocation11 + $0x2dc] ss:$28 sps:$4 sm:$0xff]  }
 0x1bf   :  { %2374 = vmatprep.subr.bf16.mxu1 %v3429_v27  ;;  %v3430_v27 = vld [vmem:[#allocation11 + $0x2d8] ss:$28 sps:$4 sm:$0xff]  }
 0x1c2   :  { %2375 = vmatpush2.bf16.msra.mxu1 %v3427_v28  ;;  %v3438_v28 = vld [vmem:[#allocation11 + $0x2a4] ss:$28 sps:$4 sm:$0xff]  }
 0x1c3   :  { %2376 = vmatprep.subr.bf16.mxu1 %v3435_v29  ;;  %v3436_v29 = vld [vmem:[#allocation11 + $0x2a0] ss:$28 sps:$4 sm:$0xff]  }
 0x1c6   :  { %2377 = vmatpush2.bf16.msra.mxu1 %v3433_v30  ;;  %v3444_v30 = vld [vmem:[#allocation11 + $0x26c] ss:$28 sps:$4 sm:$0xff]  }
 0x1c7   :  { %2378 = vmatprep.subr.bf16.mxu1 %v3441_v31  ;;  %v3442_v31 = vld [vmem:[#allocation11 + $0x268] ss:$28 sps:$4 sm:$0xff]  }
 0x1ca   :  { %2379 = vmatpush2.bf16.msra.mxu1 %v3439_v32  ;;  %v3450_v32 = vld [vmem:[#allocation11 + $0x234] ss:$28 sps:$4 sm:$0xff]  }
 0x1cb   :  { %2380 = vmatprep.subr.bf16.mxu1 %v3447_v33  ;;  %v3453_v33 = vld [vmem:[#allocation11 + $0x23c] ss:$28 sps:$4 sm:$0xff]  }
 0x1ce   :  { %2381 = vmatpush2.bf16.msra.mxu1 %v3445_v34  ;;  %v3448_v34 = vld [vmem:[#allocation11 + $0x230] ss:$28 sps:$4 sm:$0xff]  }
 0x1cf   :  { %2382 = vmatprep.subr.bf16.mxu1 %v3453_v33  ;;  %v3490_v33 = vld [vmem:[#allocation11 + $0xc0] ss:$28 sps:$4 sm:$0xff]  }
 0x1d2   :  { %2383 = vmatpush2.bf16.msra.mxu1 %v3451_v35  ;;  %v3494_v35 = vld [vmem:[#allocation11 + $0x248] ss:$28 sps:$4 sm:$0xff]  }
 0x25d   :  { %v1356_v38 = vpop.f32.mrf.mxu1 }
 0x25e   :  { %v1357_v39 = vadd.f32 %v1356_v38, %v1155_v36  ;;  %v3454_v38 = vld [vmem:[#allocation11 + $0x1f8] ss:$28 sps:$4 sm:$0xff]  }
 0x25f   :  { %v1358_v40 = vpop.f32.mrf.mxu1 }
 0x260   :  { %2707 = vst [vmem:[#allocation14] sm:$0xff] %v1357_v39  ;;  %v1359_v41 = vadd.f32 %v1358_v40, %v1159_v37  ;;  %v3462_v40 = vld [vmem:[#allocation11 + $0x1c4] ss:$28 sps:$4 sm:$0xff]  }
 0x261   :  { %v1360_v43 = vpop.f32.mrf.mxu1 }
 0x262   :  { %2708 = vst [vmem:[#allocation14 + $0x8] sm:$0xff] %v1359_v41  ;;  %v1361_v44 = vadd.f32 %v1360_v43, %v1155_v36  ;;  %v1379_v48 = vmul.f32 %v1375_v42, %v1359_v41  ;;  %v3465_v41 = vld [vmem:[#allocation11 + $0x1cc] ss:$28 sps:$4 sm:$0xff]   ;;  %v3460_v42 = vld [vmem:[#allocation11 + $0x1c0] ss:$28 sps:$4 sm:$0xff]  }
 0x263   :  { %v1362_v45 = vpop.f32.mrf.mxu1  ;;  %v3463_v43 = vld [vmem:[#allocation11 + $0x1c8] ss:$28 sps:$4 sm:$0xff]  }
 0x264   :  { %2709 = vst [vmem:[#allocation14 + $0x10] sm:$0xff] %v1361_v44  ;;  %v1363_v50 = vadd.f32 %v1362_v45, %v1159_v37  ;;  %v1383_v57 = vadd.f32 %v1379_v48, %v1357_v39  ;;  %v3457_v39 = vld [vmem:[#allocation11 + $0x200] ss:$28 sps:$4 sm:$0xff]  }
 0x265   :  { %v1366_v52 = vpop.f32.mrf.mxu1  ;;  %v3469_v45 = vld [vmem:[#allocation11 + $0x360] ss:$28 sps:$4 sm:$0xff]  }
 0x266   :  { %v1380_v53 = vmul.f32 %v1376_v46, %v1363_v50  ;;  %2710 = vst [vmem:[#allocation14 + $0x18] sm:$0xff] %v1363_v50  ;;  %v1367_v49 = vadd.f32 %v1366_v52, %v1155_v36  ;;  %v1405_v46 = vld [vmem:[%s4004_s7] sm:$0x3]  ;;  %s3825_s7 = smov [#allocation14]  }
 0x267   :  { %v1368_v56 = vpop.f32.mrf.mxu1  ;;  %v1414_v50 = vrot.slane %v1405_v46, %v3933_v58  ;;  %v1410_v52 = vrot.slane %v1405_v46, %v3939_v60  ;;  %v3508_v46 = vld [vmem:[#allocation11 + $0x35c] ss:$28 sps:$4 sm:$0xff]   ;;  %s2732_s30 = sshll.u32 %s3825_s7, 4  ;;  %s2733_s30 = int_to_ptr.vmem [resolvable:$true] %s2732_s30 }
 0x268   :  { %v1384_v47 = vadd.f32 %v1380_v53, %v1361_v44  ;;  %2711 = vst [vmem:[#allocation14 + $0x20] sm:$0xff] %v1367_v49  ;;  %v1369_v59 = vadd.f32 %v1368_v56, %v1159_v37  ;;  %v3468_v44 = vld [vmem:[#allocation11 + $0x19c] ss:$28 sps:$4 sm:$0xff]   ;;  %s3762_s1 = scalar_lea.vmem %s2733_s30, 1024  ;;  %p3767_p3 = scmp.lt.s32.totalorder %s2733_s30, %s2733_s30 }
 0x269   :  { %v1370_v61 = vpop.f32.mrf.mxu1  ;;  %p3763_p2 = scmp.ne.s32.totalorder %s2733_s30, %s3762_s1  ;;  %p3768_p4 = scmp.lt.s32.totalorder %s3762_s1, %s3762_s1 }
 0x26a   :  { %v1387_v63 = vpack.c.bf16 %v1384_v47, %v1383_v57  ;;  %2712 = vst [vmem:[#allocation14 + $0x28] sm:$0xff] %v1369_v59  ;;  %v1371_v0 = vadd.f32 %v1370_v61, %v1155_v36  ;;  %v1381_v3 = vmul.f32 %v1377_v51, %v1369_v59  ;;  %v3456_v36 = vld [vmem:[#allocation11 + $0x1fc] ss:$28 sps:$4 sm:$0xff]  }
 0x26b   :  { %v1372_v54 = vpop.f32.mrf.mxu1  ;;  %p3769_p5 = por %p3768_p4, %p3767_p3 }
 0x26c   :  { %2713 = vst [vmem:[#allocation14 + $0x30] sm:$0xff] %v1371_v0  ;;  %v1373_v4 = vadd.f32 %v1372_v54, %v1159_v37  ;;  %1530 = vmatmul.mubr.bf16.vlgmr.msra.gmra.mxu0 %v1387_v63  ;;  %v1385_v8 = vadd.f32 %v1381_v3, %v1367_v49  ;;  %v3459_v37 = vld [vmem:[#allocation11 + $0x204] ss:$28 sps:$4 sm:$0xff]   ;;  %v3466_v3 = vld [vmem:[#allocation11 + $0x198] ss:$28 sps:$4 sm:$0xff]  }
 0x26d   :  { %1539 = vmatprep.mubr.bf16.mxu0 %v3824_v25  ;;  %2304 = vmatpush1.bf16.msra.mxu0 %v3370_v62  ;;  %v3394_v25 = vld [vmem:[#allocation11 + $0xa8] ss:$28 sps:$4 sm:$0xff]   ;;  %p3770_p6 = pnand %p3769_p5, %p3763_p2 }
 0x26e   :  { %v1382_v6 = vmul.f32 %v1378_v2, %v1373_v4  ;;  %2714 = vst [vmem:[#allocation14 + $0x38] sm:$0xff] %v1373_v4  ;;  %2305 = vmatprep.subr.bf16.mxu0 %v3378_v1  ;;  %2384 = vmatprep.subr.bf16.mxu1 %v3459_v37  ;;  %v3470_v4 = vld [vmem:[#allocation11 + $0x1a0] ss:$28 sps:$4 sm:$0xff]   ;;  %v3495_v37 = vld [vmem:[#allocation11 + $0x88] ss:$28 sps:$4 sm:$0xff]  }
 0x26f   :  { %2385 = vmatpush2.bf16.msra.mxu1 %v3457_v39  ;;  %v3499_v39 = vld [vmem:[#allocation11 + $0x210] ss:$28 sps:$4 sm:$0xff]  }
 0x270   :  { %v1386_v9 = vadd.f32 %v1382_v6, %v1371_v0  ;;  %2386 = vmatprep.subr.bf16.mxu1 %v3465_v41  ;;  %v3500_v41 = vld [vmem:[#allocation11 + $0x50] ss:$28 sps:$4 sm:$0xff]  }
 0x271   :  { %2306 = vmatpush1.bf16.msra.mxu0 %v3376_v5 }
 0x272   :  { %v1388_v11 = vpack.c.bf16 %v1386_v9, %v1385_v8  ;;  %2307 = vmatprep.subr.bf16.mxu0 %v3384_v7  ;;  %v3473_v7 = vld [vmem:[#allocation11 + $0x164] ss:$28 sps:$4 sm:$0xff]  }
 0x273   :  { %2387 = vmatpush2.bf16.msra.mxu1 %v3463_v43  ;;  %v3474_v8 = vld [vmem:[#allocation11 + $0x328] ss:$28 sps:$4 sm:$0xff]   ;;  %v3504_v43 = vld [vmem:[#allocation11 + $0x1d8] ss:$28 sps:$4 sm:$0xff]  }
 0x274   :  { %1540 = vmatmul.mubr.bf16.gmra.mxu0 %v1388_v11  ;;  %3065 = vmatprep.subr.bf16.mxu1 %v3469_v45  ;;  %v3505_v45 = vld [vmem:[#allocation11 + $0x18] ss:$28 sps:$4 sm:$0xff]  }
 0x275   :  { %2308 = vmatpush1.bf16.msra.mxu0 %v3382_v10 }
 0x276   :  { %2309 = vmatprep.subr.bf16.mxu0 %v3390_v12 }
 0x279   :  { %2310 = vmatpush1.bf16.msra.mxu0 %v3388_v13 }
 0x27a   :  { %2311 = vmatprep.subr.bf16.mxu0 %v3396_v14  ;;  %v3471_v14 = vld [vmem:[#allocation11 + $0x160] ss:$28 sps:$4 sm:$0xff]  }
 0x27d   :  { %2312 = vmatpush1.bf16.msra.mxu0 %v3394_v25  ;;  %v3475_v25 = vld [vmem:[#allocation11 + $0x168] ss:$28 sps:$4 sm:$0xff]  }
 0x27e   :  { %2313 = vmatprep.subr.bf16.mxu0 %v3402_v15 }
 0x281   :  { %2314 = vmatpush1.bf16.msra.mxu0 %v3400_v16  ;;  %v3478_v16 = vld [vmem:[#allocation11 + $0x12c] ss:$28 sps:$4 sm:$0xff]  }
 0x282   :  { %2315 = vmatprep.subr.bf16.mxu0 %v3408_v17  ;;  %v3479_v17 = vld [vmem:[#allocation11 + $0x2f0] ss:$28 sps:$4 sm:$0xff]  }
 0x285   :  { %2316 = vmatpush1.bf16.msra.mxu0 %v3406_v18 }
 0x286   :  { %2317 = vmatprep.subr.bf16.mxu0 %v3414_v19 }
 0x289   :  { %2318 = vmatpush1.bf16.msra.mxu0 %v3412_v20 }
 0x28a   :  { %2319 = vmatprep.subr.bf16.mxu0 %v3420_v21 }
 0x28d   :  { %2320 = vmatpush2.bf16.msra.mxu0 %v3418_v22  ;;  %v3476_v22 = vld [vmem:[#allocation11 + $0x128] ss:$28 sps:$4 sm:$0xff]  }
 0x28e   :  { %2321 = vmatprep.subr.bf16.mxu0 %v3426_v23  ;;  %v3480_v23 = vld [vmem:[#allocation11 + $0x130] ss:$28 sps:$4 sm:$0xff]  }
 0x291   :  { %2322 = vmatpush2.bf16.msra.mxu0 %v3424_v24 }
 0x292   :  { %2323 = vmatprep.subr.bf16.mxu0 %v3432_v26  ;;  %v3483_v26 = vld [vmem:[#allocation11 + $0xf4] ss:$28 sps:$4 sm:$0xff]  }
 0x295   :  { %2324 = vmatpush2.bf16.msra.mxu0 %v3430_v27  ;;  %v3484_v27 = vld [vmem:[#allocation11 + $0x2b8] ss:$28 sps:$4 sm:$0xff]  }
 0x296   :  { %2325 = vmatprep.subr.bf16.mxu0 %v3438_v28  ;;  %v3481_v28 = vld [vmem:[#allocation11 + $0xf0] ss:$28 sps:$4 sm:$0xff]  }
 0x299   :  { %2326 = vmatpush2.bf16.msra.mxu0 %v3436_v29  ;;  %v3485_v29 = vld [vmem:[#allocation11 + $0xf8] ss:$28 sps:$4 sm:$0xff]  }
 0x29a   :  { %2327 = vmatprep.subr.bf16.mxu0 %v3444_v30  ;;  %v3488_v30 = vld [vmem:[#allocation11 + $0xbc] ss:$28 sps:$4 sm:$0xff]  }
 0x29d   :  { %2328 = vmatpush2.bf16.msra.mxu0 %v3442_v31  ;;  %v3489_v31 = vld [vmem:[#allocation11 + $0x280] ss:$28 sps:$4 sm:$0xff]  }
 0x29e   :  { %2329 = vmatprep.subr.bf16.mxu0 %v3450_v32  ;;  %v3486_v32 = vld [vmem:[#allocation11 + $0xb8] ss:$28 sps:$4 sm:$0xff]  }
 0x2a1   :  { %2330 = vmatpush2.bf16.msra.mxu0 %v3448_v34  ;;  %v3493_v34 = vld [vmem:[#allocation11 + $0x84] ss:$28 sps:$4 sm:$0xff]  }
 0x2a2   :  { %2331 = vmatprep.subr.bf16.mxu0 %v3456_v36  ;;  %v3491_v36 = vld [vmem:[#allocation11 + $0x80] ss:$28 sps:$4 sm:$0xff]  }
 0x2a5   :  { %2332 = vmatpush2.bf16.msra.mxu0 %v3454_v38  ;;  %v3498_v38 = vld [vmem:[#allocation11 + $0x4c] ss:$28 sps:$4 sm:$0xff]  }
 0x2a6   :  { %2333 = vmatprep.subr.bf16.mxu0 %v3462_v40  ;;  %v3496_v40 = vld [vmem:[#allocation11 + $0x48] ss:$28 sps:$4 sm:$0xff]  }
 0x2a9   :  { %2334 = vmatpush2.bf16.msra.mxu0 %v3460_v42  ;;  %v3503_v42 = vld [vmem:[#allocation11 + $0x14] ss:$28 sps:$4 sm:$0xff]  }
 0x2aa   :  { %2409 = vmatprep.subr.bf16.mxu0 %v3468_v44  ;;  %v3501_v44 = vld [vmem:[#allocation11 + $0x10] ss:$28 sps:$4 sm:$0xff]  }
 0x32c   :  { %v1531_v48 = vpop.f32.mrf.mxu0 }
 0x32d   :  { %v1532_v47 = vadd.f32 %v1531_v48, %v1410_v52  ;;  %v3506_v48 = vld [vmem:[#allocation11 + $0x358] ss:$28 sps:$4 sm:$0xff]  }
 0x32e   :  { %v1533_v53 = vpop.f32.mrf.mxu0 }
 0x32f   :  { %v1534_v56 = vadd.f32 %v1533_v53, %v1414_v50  ;;  %v1550_v1 = vmax.f32 %v1532_v47, 0.0  ;;  %v3514_v53 = vld [vmem:[#allocation11 + $0x2ec] ss:$28 sps:$4 sm:$0xff]   ;;  %v3520_v47 = vld [vmem:[#allocation11 + $0x27c] ss:$28 sps:$4 sm:$0xff]  }
 0x330   :  { %v1535_v49 = vpop.f32.mrf.mxu0 }
 0x331   :  { %v1536_v57 = vadd.f32 %v1535_v49, %v1410_v52  ;;  %v1551_v63 = vmax.f32 %v1534_v56, 0.0  ;;  %v3512_v49 = vld [vmem:[#allocation11 + $0x2e8] ss:$28 sps:$4 sm:$0xff]   ;;  %v3517_v56 = vld [vmem:[#allocation11 + $0x2b4] ss:$28 sps:$4 sm:$0xff]  }
 0x332   :  { %v1537_v59 = vpop.f32.mrf.mxu0 }
 0x333   :  { %v1538_v51 = vadd.f32 %v1537_v59, %v1414_v50  ;;  %v1552_v61 = vmax.f32 %v1536_v57, 0.0  ;;  %v3515_v57 = vld [vmem:[#allocation11 + $0x2b0] ss:$28 sps:$4 sm:$0xff]   ;;  %v3518_v59 = vld [vmem:[#allocation11 + $0x278] ss:$28 sps:$4 sm:$0xff]  }
 0x334   :  { %v1541_v62 = vpop.f32.mrf.mxu0 }
 0x335   :  { %v1553_v0 = vmax.f32 %v1538_v51, 0.0  ;;  %v3954_v5 = vpack.c.bf16 %v1552_v61, %v1550_v1  ;;  %v1542_v11 = vadd.f32 %v1541_v62, %v1410_v52  ;;  %v3523_v51 = vld [vmem:[#allocation11 + $0x244] ss:$28 sps:$4 sm:$0xff]   ;;  %v3526_v62 = vld [vmem:[#allocation11 + $0x20c] ss:$28 sps:$4 sm:$0xff]  }
 0x336   :  { %v1543_v54 = vpop.f32.mrf.mxu0  ;;  %v3521_v61 = vld [vmem:[#allocation11 + $0x240] ss:$28 sps:$4 sm:$0xff]   ;;  %v3527_v1 = vld [vmem:[#allocation11 + $0x1d0] ss:$28 sps:$4 sm:$0xff]  }
 0x337   :  { %v1559_v2 = vpack.c.bf16 %v1553_v0, %v1551_v63  ;;  %v1544_v9 = vadd.f32 %v1543_v54, %v1414_v50  ;;  %v1554_v20 = vmax.f32 %v1542_v11, 0.0  ;;  %v3524_v63 = vld [vmem:[#allocation11 + $0x208] ss:$28 sps:$4 sm:$0xff]   ;;  %v3529_v0 = vld [vmem:[#allocation11 + $0x1d4] ss:$28 sps:$4 sm:$0xff]  }
 0x338   :  { %v1545_v6 = vpop.f32.mrf.mxu0 }
 0x339   :  { %v1546_v10 = vadd.f32 %v1545_v6, %v1410_v52  ;;  %2335 = vmatprep.mubr.bf16.mxu0 %v1559_v2  ;;  %2388 = vmatprep.mubr.bf16.mxu1 %v1559_v2  ;;  %v1555_v18 = vmax.f32 %v1544_v9, 0.0  ;;  %v3509_v52 = vld [vmem:[#allocation11 + $0x320] ss:$28 sps:$4 sm:$0xff]  }
 0x33a   :  { %v1547_v12 = vpop.f32.mrf.mxu0  ;;  %2336 = vmatmul.mubr.bf16.vlgmr.msra.gmra.mxu0 %v3954_v5  ;;  %2389 = vmatmul.mubr.bf16.vlgmr.msra.gmra.mxu1 %v3954_v5 }
 0x33b   :  { %v1548_v13 = vadd.f32 %v1547_v12, %v1414_v50  ;;  %2410 = vmatpush1.bf16.msra.mxu0 %v3466_v3  ;;  %3066 = vmatpush3.bf16.msra.mxu1 %v3470_v4  ;;  %v1556_v15 = vmax.f32 %v1546_v10, 0.0  ;;  %v3511_v50 = vld [vmem:[#allocation11 + $0x324] ss:$28 sps:$4 sm:$0xff]  }
 0x33c   :  { %2411 = vmatprep.subr.bf16.mxu0 %v3473_v7  ;;  %3067 = vmatprep.subr.bf16.mxu1 %v3474_v8 }
 0x33d   :  { %v1557_v19 = vmax.f32 %v1548_v13, 0.0  ;;  %v3960_v24 = vpack.c.bf16 %v1556_v15, %v1554_v20 }
 0x33f   :  { %v3958_v21 = vpack.c.bf16 %v1557_v19, %v1555_v18  ;;  %2412 = vmatpush1.bf16.msra.mxu0 %v3471_v14  ;;  %3068 = vmatpush3.bf16.msra.mxu1 %v3475_v25 }
 0x340   :  { %2413 = vmatprep.subr.bf16.mxu0 %v3478_v16  ;;  %3069 = vmatprep.subr.bf16.mxu1 %v3479_v17 }
 0x341   :  { %2345 = vmatprep.mubr.bf16.mxu0 %v3958_v21  ;;  %2398 = vmatprep.mubr.bf16.mxu1 %v3958_v21 }
 0x342   :  { %2346 = vmatmul.mubr.bf16.gmra.mxu0 %v3960_v24  ;;  %2399 = vmatmul.mubr.bf16.gmra.mxu1 %v3960_v24 }
 0x343   :  { %2414 = vmatpush1.bf16.msra.mxu0 %v3476_v22  ;;  %3070 = vmatpush3.bf16.msra.mxu1 %v3480_v23 }
 0x344   :  { %2441 = vmatprep.mubr.bf16.mxu0 %v1559_v2  ;;  %2494 = vmatprep.mubr.bf16.mxu1 %v1559_v2 }
 0x345   :  { %2415 = vmatprep.subr.bf16.mxu0 %v3483_v26  ;;  %3071 = vmatprep.subr.bf16.mxu1 %v3484_v27 }
 0x347   :  { %2416 = vmatpush1.bf16.msra.mxu0 %v3481_v28  ;;  %3072 = vmatpush3.bf16.msra.mxu1 %v3485_v29 }
 0x348   :  { %2417 = vmatprep.subr.bf16.mxu0 %v3488_v30  ;;  %3073 = vmatprep.subr.bf16.mxu1 %v3489_v31 }
 0x34b   :  { %2418 = vmatpush1.bf16.msra.mxu0 %v3486_v32  ;;  %3074 = vmatpush3.bf16.msra.mxu1 %v3490_v33 }
 0x34c   :  { %2419 = vmatprep.subr.bf16.mxu0 %v3493_v34  ;;  %3075 = vmatprep.subr.bf16.mxu1 %v3494_v35 }
 0x34f   :  { %2420 = vmatpush1.bf16.msra.mxu0 %v3491_v36  ;;  %3076 = vmatpush3.bf16.msra.mxu1 %v3495_v37 }
 0x350   :  { %2421 = vmatprep.subr.bf16.mxu0 %v3498_v38  ;;  %3077 = vmatprep.subr.bf16.mxu1 %v3499_v39 }
 0x353   :  { %2422 = vmatpush1.bf16.msra.mxu0 %v3496_v40  ;;  %3078 = vmatpush3.bf16.msra.mxu1 %v3500_v41 }
 0x354   :  { %2423 = vmatprep.subr.bf16.mxu0 %v3503_v42  ;;  %3079 = vmatprep.subr.bf16.mxu1 %v3504_v43 }
 0x357   :  { %2424 = vmatpush1.bf16.msra.mxu0 %v3501_v44  ;;  %3080 = vmatpush3.bf16.msra.mxu1 %v3505_v45 }
 0x358   :  { %2425 = vmatprep.subr.bf16.mxu0 %v3508_v46 }
 0x35a   :  { %2495 = vmatmul.mubr.bf16.vlgmr.msra.gmra.mxu1 %v3954_v5 }
 0x35b   :  { %2426 = vmatpush2.bf16.msra.mxu0 %v3506_v48  ;;  %2502 = vmatprep.mubr.bf16.mxu1 %v3958_v21 }
 0x35c   :  { %2427 = vmatprep.subr.bf16.mxu0 %v3511_v50 }
 0x35f   :  { %2428 = vmatpush2.bf16.msra.mxu0 %v3509_v52 }
 0x360   :  { %2429 = vmatprep.subr.bf16.mxu0 %v3514_v53 }
 0x362   :  { %2503 = vmatmul.mubr.bf16.gmra.mxu1 %v3960_v24 }
 0x363   :  { %2430 = vmatpush2.bf16.msra.mxu0 %v3512_v49 }
 0x364   :  { %2431 = vmatprep.subr.bf16.mxu0 %v3517_v56 }
 0x367   :  { %2432 = vmatpush2.bf16.msra.mxu0 %v3515_v57 }
 0x368   :  { %2433 = vmatprep.subr.bf16.mxu0 %v3520_v47 }
 0x36b   :  { %2434 = vmatpush2.bf16.msra.mxu0 %v3518_v59 }
 0x36c   :  { %2435 = vmatprep.subr.bf16.mxu0 %v3523_v51 }
 0x36f   :  { %2436 = vmatpush2.bf16.msra.mxu0 %v3521_v61 }
 0x370   :  { %2437 = vmatprep.subr.bf16.mxu0 %v3526_v62 }
 0x373   :  { %2438 = vmatpush2.bf16.msra.mxu0 %v3524_v63 }
 0x374   :  { %2439 = vmatprep.subr.bf16.mxu0 %v3529_v0 }
 0x377   :  { %2440 = vmatpush2.bf16.msra.mxu0 %v3527_v1 }
 0x37a   :  { %2442 = vmatmul.mubr.bf16.vlgmr.msra.gmra.mxu0 %v3954_v5 }
 0x37b   :  { %2451 = vmatprep.mubr.bf16.mxu0 %v3958_v21 }
 0x382   :  { %2452 = vmatmul.mubr.bf16.gmra.mxu0 %v3960_v24 }
 0x383   :  { %3773 = shalt.err (!%p3770_p6)
}
 0x384   :  { %s3826_s12 = smov 256   ;;  %s3827_s13 = smov 16   ;;  %v1702_v54 = vsub.s32 2, %v3930_v55  ;;  %v3979_v2 = vld [vmem:[%s4006_s9] sm:$0xff]  ;;  %v1706_v3 = vsub.s32 3, %v3930_v55 }
 0x385   :  { %2738 = dma.vmem_to_hbm [thread:$0]  %s2733_s30, 1024, %s4008_s11, [#allocation15], %s3826_s12, %s3826_s12, %s3827_s13   ;;  %v1695_v4 = vrot.slane %v3979_v2, %v3939_v60  ;;  %v1699_v6 = vrot.slane %v3979_v2, %v3933_v58 }
 0x386   :  { %v1703_v5 = vrot.slane %v3979_v2, %v1702_v54  ;;  %v1707_v7 = vrot.slane %v3979_v2, %v1706_v3  ;;  %s3828_s9 = smov [#allocation13]  }
 0x387   :  { %s2720_s11 = sshll.u32 %s3828_s9, 4  ;;  %s2721_s11 = int_to_ptr.vmem [resolvable:$true] %s2720_s11 }
 0x388   :  { %s3782_s4 = scalar_lea.vmem %s2721_s11, 3584  ;;  %p3787_p8 = scmp.lt.s32.totalorder %s2721_s11, %s2721_s11 }
 0x389   :  { %p3783_p7 = scmp.ne.s32.totalorder %s2721_s11, %s3782_s4  ;;  %p3788_p9 = scmp.lt.s32.totalorder %s3782_s4, %s3782_s4 }
 0x38b   :  { %p3789_p10 = por %p3788_p9, %p3787_p8 }
 0x38d   :  { %p3790_p11 = pnand %p3789_p10, %p3783_p7 }
 0x3fa   :  { %v2337_v8 = vpop.f32.mrf.mxu0  ;;  %v2390_v9 = vpop.f32.mrf.mxu1 }
 0x3fb   :  { %v2338_v10 = vadd.f32 %v2337_v8, %v1695_v4  ;;  %v2391_v11 = vadd.f32 %v2390_v9, %v1703_v5 }
 0x3fc   :  { %v2339_v12 = vpop.f32.mrf.mxu0  ;;  %v2392_v13 = vpop.f32.mrf.mxu1 }
 0x3fd   :  { %v3037_v14 = vmul.f32 -1.442695, %v2338_v10  ;;  %v3039_v25 = vmul.f32 -1.442695, %v2391_v11  ;;  %v2340_v15 = vadd.f32 %v2339_v12, %v1699_v6  ;;  %v2393_v16 = vadd.f32 %v2392_v13, %v1707_v7 }
 0x3fe   :  { %v2341_v17 = vpop.f32.mrf.mxu0  ;;  %v2394_v18 = vpop.f32.mrf.mxu1 }
 0x3ff   :  { %3530 = vpow2.f32 %v3037_v14  ;;  %v3038_v60 = vmul.f32 -1.442695, %v2340_v15  ;;  %v3040_v19 = vmul.f32 -1.442695, %v2393_v16  ;;  %v2342_v20 = vadd.f32 %v2341_v17, %v1695_v4 }
 0x400   :  { %3532 = vpow2.f32 %v3039_v25  ;;  %v2395_v58 = vadd.f32 %v2394_v18, %v1703_v5  ;;  %v2343_v21 = vpop.f32.mrf.mxu0  ;;  %v2396_v22 = vpop.f32.mrf.mxu1  ;;  %v1718_v16 = vsub.s32 6, %v3930_v55 }
 0x401   :  { %3534 = vpow2.f32 %v3038_v60  ;;  %v3044_v23 = vmul.f32 -1.442695, %v2342_v20  ;;  %v2344_v24 = vadd.f32 %v2343_v21, %v1699_v6  ;;  %v2397_v26 = vadd.f32 %v2396_v22, %v1707_v7 }
 0x402   :  { %3536 = vpow2.f32 %v3040_v19  ;;  %v3046_v27 = vmul.f32 -1.442695, %v2395_v58  ;;  %v2347_v28 = vpop.f32.mrf.mxu0  ;;  %v2400_v29 = vpop.f32.mrf.mxu1 }
 0x403   :  { %3538 = vpow2.f32 %v3044_v23  ;;  %v3045_v30 = vmul.f32 -1.442695, %v2344_v24  ;;  %v3047_v31 = vmul.f32 -1.442695, %v2397_v26  ;;  %v2348_v32 = vadd.f32 %v2347_v28, %v1695_v4 }
 0x404   :  { %3540 = vpow2.f32 %v3046_v27  ;;  %v2401_v33 = vadd.f32 %v2400_v29, %v1703_v5  ;;  %v2349_v34 = vpop.f32.mrf.mxu0  ;;  %v2402_v35 = vpop.f32.mrf.mxu1  ;;  %v1719_v24 = vrot.slane %v3979_v2, %v1718_v16 }
 0x405   :  { %3542 = vpow2.f32 %v3045_v30  ;;  %v3051_v36 = vmul.f32 -1.442695, %v2348_v32  ;;  %v2350_v37 = vadd.f32 %v2349_v34, %v1699_v6  ;;  %v2403_v38 = vadd.f32 %v2402_v35, %v1707_v7 }
 0x406   :  { %3544 = vpow2.f32 %v3047_v31  ;;  %v3053_v39 = vmul.f32 -1.442695, %v2401_v33  ;;  %v2351_v40 = vpop.f32.mrf.mxu0  ;;  %v2404_v41 = vpop.f32.mrf.mxu1 }
 0x407   :  { %3546 = vpow2.f32 %v3051_v36  ;;  %v3052_v42 = vmul.f32 -1.442695, %v2350_v37  ;;  %v3054_v43 = vmul.f32 -1.442695, %v2403_v38  ;;  %v2352_v44 = vadd.f32 %v2351_v40, %v1695_v4 }
 0x408   :  { %3548 = vpow2.f32 %v3053_v39  ;;  %v2405_v45 = vadd.f32 %v2404_v41, %v1703_v5  ;;  %v2353_v46 = vpop.f32.mrf.mxu0  ;;  %v2406_v48 = vpop.f32.mrf.mxu1 }
 0x409   :  { %3550 = vpow2.f32 %v3052_v42  ;;  %v3058_v50 = vmul.f32 -1.442695, %v2352_v44  ;;  %v2354_v52 = vadd.f32 %v2353_v46, %v1699_v6  ;;  %v2407_v53 = vadd.f32 %v2406_v48, %v1707_v7 }
 0x40a   :  { %3552 = vpow2.f32 %v3054_v43  ;;  %v3060_v49 = vmul.f32 -1.442695, %v2405_v45 }
 0x40b   :  { %3554 = vpow2.f32 %v3058_v50  ;;  %v3059_v56 = vmul.f32 -1.442695, %v2354_v52  ;;  %v3061_v57 = vmul.f32 -1.442695, %v2407_v53 }
 0x40c   :  { %v3531_v47 = vpop.eup %3530  ;;  %3556 = vpow2.f32 %v3060_v49 }
 0x40d   :  { %v3533_v59 = vpop.eup %3532  ;;  %v2595_v51 = vadd.f32 1.0, %v3531_v47  ;;  %3558 = vpow2.f32 %v3059_v56 }
 0x40e   :  { %v3535_v61 = vpop.eup %3534  ;;  %v2597_v62 = vadd.f32 1.0, %v3533_v59  ;;  %3560 = vpow2.f32 %v3061_v57 }
 0x40f   :  { %v3537_v63 = vpop.eup %3536  ;;  %3562 = vrcp.f32 %v2595_v51  ;;  %v2596_v0 = vadd.f32 1.0, %v3535_v61 }
 0x410   :  { %v3539_v1 = vpop.eup %3538  ;;  %3564 = vrcp.f32 %v2597_v62  ;;  %v2598_v54 = vadd.f32 1.0, %v3537_v63 }
 0x411   :  { %v3541_v3 = vpop.eup %3540  ;;  %3566 = vrcp.f32 %v2596_v0  ;;  %v2602_v4 = vadd.f32 1.0, %v3539_v1 }
 0x412   :  { %v3543_v5 = vpop.eup %3542  ;;  %3568 = vrcp.f32 %v2598_v54  ;;  %v2604_v6 = vadd.f32 1.0, %v3541_v3 }
 0x413   :  { %v3545_v7 = vpop.eup %3544  ;;  %3570 = vrcp.f32 %v2602_v4  ;;  %v2603_v8 = vadd.f32 1.0, %v3543_v5  ;;  %v1710_v4 = vsub.s32 4, %v3930_v55 }
 0x414   :  { %v3547_v9 = vpop.eup %3546  ;;  %3572 = vrcp.f32 %v2604_v6  ;;  %v2605_v10 = vadd.f32 1.0, %v3545_v7  ;;  %v1714_v7 = vsub.s32 5, %v3930_v55 }
 0x415   :  { %v3549_v11 = vpop.eup %3548  ;;  %3574 = vrcp.f32 %v2603_v8  ;;  %v2609_v12 = vadd.f32 1.0, %v3547_v9  ;;  %v1711_v8 = vrot.slane %v3979_v2, %v1710_v4 }
 0x416   :  { %v3551_v13 = vpop.eup %3550  ;;  %3576 = vrcp.f32 %v2605_v10  ;;  %v2611_v14 = vadd.f32 1.0, %v3549_v11  ;;  %v1715_v11 = vrot.slane %v3979_v2, %v1714_v7 }
 0x417   :  { %v3553_v25 = vpop.eup %3552  ;;  %3578 = vrcp.f32 %v2609_v12  ;;  %v2610_v15 = vadd.f32 1.0, %v3551_v13 }
 0x418   :  { %v3555_v17 = vpop.eup %3554  ;;  %3580 = vrcp.f32 %v2611_v14  ;;  %v2612_v18 = vadd.f32 1.0, %v3553_v25 }
 0x419   :  { %v3557_v60 = vpop.eup %3556  ;;  %3582 = vrcp.f32 %v2610_v15  ;;  %v2616_v19 = vadd.f32 1.0, %v3555_v17 }
 0x41a   :  { %v3559_v20 = vpop.eup %3558  ;;  %3584 = vrcp.f32 %v2612_v18  ;;  %v2618_v58 = vadd.f32 1.0, %v3557_v60  ;;  %v3081_v21 = vpop.f32.mrf.mxu1 }
 0x41b   :  { %v3561_v22 = vpop.eup %3560  ;;  %3586 = vrcp.f32 %v2616_v19  ;;  %v2617_v23 = vadd.f32 1.0, %v3559_v20 }
 0x41c   :  { %v3563_v26 = vpop.eup %3562  ;;  %3588 = vrcp.f32 %v2618_v58  ;;  %v2619_v27 = vadd.f32 1.0, %v3561_v22  ;;  %v3082_v28 = vpop.f32.mrf.mxu1 }
 0x41d   :  { %v3565_v29 = vpop.eup %3564  ;;  %2679 = vst [vmem:[#allocation13] sm:$0xff] %v3563_v26  ;;  %3590 = vrcp.f32 %v2617_v23  ;;  %v3083_v30 = vadd.f32 %v3082_v28, %v3081_v21 }
 0x41e   :  { %v3567_v31 = vpop.eup %3566  ;;  %2681 = vst [vmem:[#allocation13 + $0x10] sm:$0xff] %v3565_v29  ;;  %3592 = vrcp.f32 %v2619_v27  ;;  %v3084_v32 = vpop.f32.mrf.mxu1 }
 0x41f   :  { %v3569_v33 = vpop.eup %3568  ;;  %2680 = vst [vmem:[#allocation13 + $0x8] sm:$0xff] %v3567_v31  ;;  %v2497_v34 = vadd.f32 %v3083_v30, %v1719_v24 }
 0x420   :  { %v3571_v35 = vpop.eup %3570  ;;  %2682 = vst [vmem:[#allocation13 + $0x18] sm:$0xff] %v3569_v33  ;;  %v3085_v36 = vpop.f32.mrf.mxu1 }
 0x421   :  { %v3573_v37 = vpop.eup %3572  ;;  %2686 = vst [vmem:[#allocation13 + $0x38] sm:$0xff] %v3571_v35  ;;  %v3043_v38 = vmul.f32 -1.442695, %v2497_v34  ;;  %v3086_v39 = vadd.f32 %v3085_v36, %v3084_v32 }
 0x422   :  { %v3575_v40 = vpop.eup %3574  ;;  %2688 = vst [vmem:[#allocation13 + $0x48] sm:$0xff] %v3573_v37  ;;  %v3087_v41 = vpop.f32.mrf.mxu1 }
 0x423   :  { %v3577_v42 = vpop.eup %3576  ;;  %2687 = vst [vmem:[#allocation13 + $0x40] sm:$0xff] %v3575_v40  ;;  %3594 = vpow2.f32 %v3043_v38  ;;  %v2500_v43 = vadd.f32 %v3086_v39, %v1719_v24 }
 0x424   :  { %v3579_v44 = vpop.eup %3578  ;;  %2689 = vst [vmem:[#allocation13 + $0x50] sm:$0xff] %v3577_v42  ;;  %v3088_v45 = vpop.f32.mrf.mxu1 }
 0x425   :  { %v3581_v46 = vpop.eup %3580  ;;  %2693 = vst [vmem:[#allocation13 + $0x70] sm:$0xff] %v3579_v44  ;;  %v3050_v48 = vmul.f32 -1.442695, %v2500_v43  ;;  %v3089_v50 = vadd.f32 %v3088_v45, %v3087_v41 }
 0x426   :  { %v3583_v52 = vpop.eup %3582  ;;  %2695 = vst [vmem:[#allocation13 + $0x80] sm:$0xff] %v3581_v46  ;;  %v3090_v53 = vpop.f32.mrf.mxu1 }
 0x427   :  { %v3585_v49 = vpop.eup %3584  ;;  %2694 = vst [vmem:[#allocation13 + $0x78] sm:$0xff] %v3583_v52  ;;  %3596 = vpow2.f32 %v3050_v48  ;;  %v2505_v56 = vadd.f32 %v3089_v50, %v1719_v24 }
 0x428   :  { %v3587_v57 = vpop.eup %3586  ;;  %2696 = vst [vmem:[#allocation13 + $0x88] sm:$0xff] %v3585_v49  ;;  %v3091_v47 = vpop.f32.mrf.mxu1 }
 0x429   :  { %v3589_v59 = vpop.eup %3588  ;;  %2700 = vst [vmem:[#allocation13 + $0xa8] sm:$0xff] %v3587_v57  ;;  %v3057_v51 = vmul.f32 -1.442695, %v2505_v56  ;;  %v3092_v61 = vadd.f32 %v3091_v47, %v3090_v53 }
 0x42a   :  { %v3591_v62 = vpop.eup %3590  ;;  %2702 = vst [vmem:[#allocation13 + $0xb8] sm:$0xff] %v3589_v59 }
 0x42b   :  { %v3593_v63 = vpop.eup %3592  ;;  %2701 = vst [vmem:[#allocation13 + $0xb0] sm:$0xff] %v3591_v62  ;;  %3598 = vpow2.f32 %v3057_v51  ;;  %v2508_v0 = vadd.f32 %v3092_v61, %v1719_v24 }
 0x42c   :  { %2703 = vst [vmem:[#allocation13 + $0xc0] sm:$0xff] %v3593_v63 }
 0x42d   :  { %v3064_v1 = vmul.f32 -1.442695, %v2508_v0 }
 0x42f   :  { %3600 = vpow2.f32 %v3064_v1 }
 0x430   :  { %v3595_v54 = vpop.eup %3594 }
 0x431   :  { %v2601_v3 = vadd.f32 1.0, %v3595_v54 }
 0x433   :  { %3602 = vrcp.f32 %v2601_v3 }
 0x434   :  { %v3597_v5 = vpop.eup %3596 }
 0x435   :  { %v2608_v6 = vadd.f32 1.0, %v3597_v5 }
 0x437   :  { %3604 = vrcp.f32 %v2608_v6 }
 0x438   :  { %v3599_v9 = vpop.eup %3598 }
 0x439   :  { %v2615_v10 = vadd.f32 1.0, %v3599_v9 }
 0x43a   :  { %v2443_v12 = vpop.f32.mrf.mxu0 }
 0x43b   :  { %3606 = vrcp.f32 %v2615_v10  ;;  %v2444_v13 = vadd.f32 %v2443_v12, %v1711_v8 }
 0x43c   :  { %v3601_v14 = vpop.eup %3600  ;;  %v2445_v25 = vpop.f32.mrf.mxu0 }
 0x43d   :  { %v2622_v15 = vadd.f32 1.0, %v3601_v14  ;;  %v3041_v16 = vmul.f32 -1.442695, %v2444_v13  ;;  %v2446_v17 = vadd.f32 %v2445_v25, %v1715_v11 }
 0x43e   :  { %v2447_v18 = vpop.f32.mrf.mxu0 }
 0x43f   :  { %3608 = vrcp.f32 %v2622_v15  ;;  %v3042_v60 = vmul.f32 -1.442695, %v2446_v17  ;;  %v2448_v19 = vadd.f32 %v2447_v18, %v1711_v8 }
 0x440   :  { %v3603_v55 = vpop.eup %3602  ;;  %3610 = vpow2.f32 %v3041_v16  ;;  %v2449_v20 = vpop.f32.mrf.mxu0 }
 0x441   :  { %2685 = vst [vmem:[#allocation13 + $0x30] sm:$0xff] %v3603_v55  ;;  %3612 = vpow2.f32 %v3042_v60  ;;  %v3048_v58 = vmul.f32 -1.442695, %v2448_v19  ;;  %v2450_v21 = vadd.f32 %v2449_v20, %v1715_v11 }
 0x442   :  { %v2453_v2 = vpop.f32.mrf.mxu0 }
 0x443   :  { %3614 = vpow2.f32 %v3048_v58  ;;  %v3049_v22 = vmul.f32 -1.442695, %v2450_v21  ;;  %v2454_v23 = vadd.f32 %v2453_v2, %v1711_v8 }
 0x444   :  { %v3605_v24 = vpop.eup %3604  ;;  %v2455_v26 = vpop.f32.mrf.mxu0 }
 0x445   :  { %2692 = vst [vmem:[#allocation13 + $0x68] sm:$0xff] %v3605_v24  ;;  %3616 = vpow2.f32 %v3049_v22  ;;  %v3055_v27 = vmul.f32 -1.442695, %v2454_v23  ;;  %v2456_v28 = vadd.f32 %v2455_v26, %v1715_v11 }
 0x446   :  { %v2457_v29 = vpop.f32.mrf.mxu0 }
 0x447   :  { %3618 = vpow2.f32 %v3055_v27  ;;  %v3056_v30 = vmul.f32 -1.442695, %v2456_v28  ;;  %v2458_v31 = vadd.f32 %v2457_v29, %v1711_v8 }
 0x448   :  { %v3607_v32 = vpop.eup %3606  ;;  %v2459_v33 = vpop.f32.mrf.mxu0 }
 0x449   :  { %2699 = vst [vmem:[#allocation13 + $0xa0] sm:$0xff] %v3607_v32  ;;  %3620 = vpow2.f32 %v3056_v30  ;;  %v3062_v34 = vmul.f32 -1.442695, %v2458_v31  ;;  %v2460_v35 = vadd.f32 %v2459_v33, %v1715_v11 }
 0x44b   :  { %3622 = vpow2.f32 %v3062_v34  ;;  %v3063_v36 = vmul.f32 -1.442695, %v2460_v35 }
 0x44c   :  { %v3609_v37 = vpop.eup %3608 }
 0x44d   :  { %v3611_v38 = vpop.eup %3610  ;;  %2706 = vst [vmem:[#allocation13 + $0xd8] sm:$0xff] %v3609_v37  ;;  %3624 = vpow2.f32 %v3063_v36 }
 0x44e   :  { %v3613_v39 = vpop.eup %3612  ;;  %v2599_v40 = vadd.f32 1.0, %v3611_v38 }
 0x44f   :  { %v2600_v41 = vadd.f32 1.0, %v3613_v39 }
 0x450   :  { %v3615_v42 = vpop.eup %3614  ;;  %3626 = vrcp.f32 %v2599_v40 }
 0x451   :  { %3628 = vrcp.f32 %v2600_v41  ;;  %v2606_v43 = vadd.f32 1.0, %v3615_v42 }
 0x452   :  { %v3617_v44 = vpop.eup %3616 }
 0x453   :  { %3630 = vrcp.f32 %v2606_v43  ;;  %v2607_v45 = vadd.f32 1.0, %v3617_v44 }
 0x454   :  { %v3619_v46 = vpop.eup %3618 }
 0x455   :  { %3632 = vrcp.f32 %v2607_v45  ;;  %v2613_v48 = vadd.f32 1.0, %v3619_v46 }
 0x456   :  { %v3621_v50 = vpop.eup %3620 }
 0x457   :  { %3634 = vrcp.f32 %v2613_v48  ;;  %v2614_v52 = vadd.f32 1.0, %v3621_v50 }
 0x458   :  { %v3623_v53 = vpop.eup %3622 }
 0x459   :  { %3636 = vrcp.f32 %v2614_v52  ;;  %v2620_v49 = vadd.f32 1.0, %v3623_v53 }
 0x45a   :  { %v3625_v56 = vpop.eup %3624 }
 0x45b   :  { %3638 = vrcp.f32 %v2620_v49  ;;  %v2621_v57 = vadd.f32 1.0, %v3625_v56 }
 0x45d   :  { %v3627_v47 = vpop.eup %3626  ;;  %3640 = vrcp.f32 %v2621_v57 }
 0x45e   :  { %v3629_v59 = vpop.eup %3628  ;;  %2683 = vst [vmem:[#allocation13 + $0x20] sm:$0xff] %v3627_v47 }
 0x45f   :  { %2684 = vst [vmem:[#allocation13 + $0x28] sm:$0xff] %v3629_v59 }
 0x460   :  { %v3631_v51 = vpop.eup %3630 }
 0x461   :  { %2690 = vst [vmem:[#allocation13 + $0x58] sm:$0xff] %v3631_v51 }
 0x462   :  { %v3633_v61 = vpop.eup %3632 }
 0x463   :  { %2691 = vst [vmem:[#allocation13 + $0x60] sm:$0xff] %v3633_v61 }
 0x464   :  { %v3635_v62 = vpop.eup %3634 }
 0x465   :  { %2697 = vst [vmem:[#allocation13 + $0x90] sm:$0xff] %v3635_v62 }
 0x466   :  { %v3637_v63 = vpop.eup %3636 }
 0x467   :  { %2698 = vst [vmem:[#allocation13 + $0x98] sm:$0xff] %v3637_v63 }
 0x468   :  { %v3639_v0 = vpop.eup %3638 }
 0x469   :  { %2704 = vst [vmem:[#allocation13 + $0xc8] sm:$0xff] %v3639_v0 }
 0x46a   :  { %v3641_v1 = vpop.eup %3640 }
 0x46b   :  { %2705 = vst [vmem:[#allocation13 + $0xd0] sm:$0xff] %v3641_v1 }
 0x46c   :  { %3793 = shalt.err (!%p3790_p11)
}
 0x46d   :  { %s3829_s18 = smov 896   ;;  %s3830_s19 = smov 56  }
 0x46e   :  { %2726 = dma.vmem_to_hbm [thread:$0]  %s2721_s11, 3584, %s4007_s10, [#allocation4], %s3829_s18, %s3829_s18, %s3830_s19  }
 0x46f   :  { %3810 = dma.done.wait [#allocation4], 3584  }
 0x470   :  { %3811 = vsyncadd [#allocation4], 4294963712 }
 0x471   :  { %3812 = dma.done.wait [#allocation15], 1024  }
 0x472   :  { %3813 = vsyncadd [#allocation15], 4294966272 }
 0x473   :  { %2745 = vsyncpa [#allocation3], 1 }
 0x474   :  { %2746 = vsyncpa [#allocation6], 1 }
 0x475   :  { %2747 = vsyncpa [#allocation9], 1 }
 0x476   :  { %2748 = vsyncpa [#allocation12], 1 }
 0x477   :  { %2749 = vsyncpa [#allocation4], 1 }
 0x478   :  { %2750 = vsyncpa [#allocation15], 1 }

// kernel: tpu_custom_call.1
= control target key start
LH: loop header
LB: loop body
LE: loop exit
PB: predicated region body
PF: predicated region fallthrough
CT: control target
= control target key end

     0   :  { %17 = vsyncpa [#allocation3], 0  ;;  %s3997_s0 = inlined_call_operand.hbm [shape: bf16[32,896], index: 0, kind: input, shape index: {}]   ;;  %s3998_s1 = inlined_call_operand.hbm [shape: f32[32,128], index: 1, kind: input, shape index: {}]   ;;  %s3999_s2 = inlined_call_operand.hbm [shape: bf16[896,256], index: 2, kind: input, shape index: {}]   ;;  %s4000_s3 = inlined_call_operand.vmem [shape: f32[1,256], index: 3, kind: input, shape index: {}]   ;;  %s4001_s4 = inlined_call_operand.hbm [shape: bf16[256,256], index: 4, kind: input, shape index: {}]   ;;  %s4002_s5 = inlined_call_operand.vmem [shape: f32[1,256], index: 5, kind: input, shape index: {}]   ;;  %s4003_s6 = inlined_call_operand.hbm [shape: bf16[128,256], index: 6, kind: input, shape index: {}]   ;;  %s4004_s7 = inlined_call_operand.vmem [shape: f32[1,256], index: 7, kind: input, shape index: {}]   ;;  %s4005_s8 = inlined_call_operand.hbm [shape: bf16[256,896], index: 8, kind: input, shape index: {}]   ;;  %s4006_s9 = inlined_call_operand.vmem [shape: f32[1,896], index: 9, kind: input, shape index: {}]   ;;  %s4007_s10 = inlined_call_operand.hbm [shape: f32[32,896], index: 10, kind: output, shape index: {0}]   ;;  %s4008_s11 = inlined_call_operand.hbm [shape: f32[32,256], index: 11, kind: output, shape index: {1}]  }
   0x1   :  { %18 = vsyncpa [#allocation6], 0 }
   0x2   :  { %19 = vsyncpa [#allocation9], 0 }
   0x3   :  { %20 = vsyncpa [#allocation12], 0 }
   0x4   :  { %21 = vsyncpa [#allocation4], 0 }
   0x5   :  { %22 = vsyncpa [#allocation15], 0  ;;  %s3814_s17 = smov [#allocation5]  }
   0x6   :  { %s40_s18 = sshll.u32 %s3814_s17, 4  ;;  %s41_s18 = int_to_ptr.vmem [resolvable:$true] %s40_s18 }
   0x7   :  { %s3650_s19 = scalar_lea.vmem %s41_s18, 512  ;;  %p3655_p1 = scmp.lt.s32.totalorder %s41_s18, %s41_s18 }
   0x8   :  { %p3651_p0 = scmp.ne.s32.totalorder %s41_s18, %s3650_s19  ;;  %p3656_p2 = scmp.lt.s32.totalorder %s3650_s19, %s3650_s19 }
   0xa   :  { %p3657_p3 = por %p3656_p2, %p3655_p1 }
   0xc   :  { %p3658_p4 = pnand %p3657_p3, %p3651_p0 }
   0xe   :  { %3661 = shalt.err (!%p3658_p4)
}
   0xf   :  { %s3815_s20 = smov 128   ;;  %s3816_s21 = smov 8  }
  0x10   :  { %46 = dma.hbm_to_vmem [thread:$0]  %s3998_s1, 512, %s41_s18, [#allocation6], %s3815_s20, %s3815_s20, %s3816_s21  }
  0x11   :  { %s3817_s24 = smov [#allocation8]   ;;  %s3818_s26 = smov [#allocation2]  }
  0x12   :  { %s66_s25 = sshll.u32 %s3817_s24, 4  ;;  %s28_s27 = sshll.u32 %s3818_s26, 4  ;;  %s67_s25 = int_to_ptr.vmem [resolvable:$true] %s66_s25  ;;  %s29_s27 = int_to_ptr.vmem [resolvable:$true] %s28_s27 }
  0x13   :  { %s3670_s28 = scalar_lea.vmem %s67_s25, 4096  ;;  %p3675_p6 = scmp.lt.s32.totalorder %s67_s25, %s67_s25 }
  0x14   :  { %p3671_p5 = scmp.ne.s32.totalorder %s67_s25, %s3670_s28  ;;  %p3676_p7 = scmp.lt.s32.totalorder %s3670_s28, %s3670_s28 }
  0x16   :  { %p3677_p8 = por %p3676_p7, %p3675_p6 }
  0x18   :  { %p3678_p9 = pnand %p3677_p8, %p3671_p5 }
  0x1a   :  { %3681 = shalt.err (!%p3678_p9)
}
  0x1b   :  { %72 = dma.hbm_to_vmem [thread:$0]  %s4001_s4, 4096, %s67_s25, [#allocation9], %s3815_s20, %s3815_s20, %s3816_s21  }
  0x1c   :  { %s3690_s1 = scalar_lea.vmem %s29_s27, 1792  ;;  %p3695_p11 = scmp.lt.s32.totalorder %s29_s27, %s29_s27 }
  0x1d   :  { %p3691_p10 = scmp.ne.s32.totalorder %s29_s27, %s3690_s1  ;;  %p3696_p12 = scmp.lt.s32.totalorder %s3690_s1, %s3690_s1 }
  0x1f   :  { %p3697_p13 = por %p3696_p12, %p3695_p11 }
  0x21   :  { %p3698_p0 = pnand %p3697_p13, %p3691_p10 }
  0x23   :  { %3701 = shalt.err (!%p3698_p0)
}
  0x24   :  { %s3819_s12 = smov 448   ;;  %s3820_s13 = smov 28  }
  0x25   :  { %34 = dma.hbm_to_vmem [thread:$0]  %s3997_s0, 1792, %s29_s27, [#allocation3], %s3819_s12, %s3819_s12, %s3820_s13  }
  0x26   :  { %s3821_s16 = smov [#allocation7]   ;;  %s3822_s4 = smov [#allocation10]  }
  0x27   :  { %s52_s17 = sshll.u32 %s3821_s16, 4  ;;  %s80_s18 = sshll.u32 %s3822_s4, 4  ;;  %s53_s17 = int_to_ptr.vmem [resolvable:$true] %s52_s17  ;;  %s81_s18 = int_to_ptr.vmem [resolvable:$true] %s80_s18 }
  0x28   :  { %s3710_s19 = scalar_lea.vmem %s53_s17, 14336  ;;  %p3715_p2 = scmp.lt.s32.totalorder %s53_s17, %s53_s17 }
  0x29   :  { %p3711_p1 = scmp.ne.s32.totalorder %s53_s17, %s3710_s19  ;;  %p3716_p3 = scmp.lt.s32.totalorder %s3710_s19, %s3710_s19 }
  0x2b   :  { %p3717_p4 = por %p3716_p3, %p3715_p2 }
  0x2d   :  { %p3718_p5 = pnand %p3717_p4, %p3711_p1 }
  0x2f   :  { %3721 = shalt.err (!%p3718_p5)
}
  0x30   :  { %58 = dma.hbm_to_vmem [thread:$0]  %s3999_s2, 14336, %s53_s17, [#allocation6], %s3815_s20, %s3815_s20, %s3816_s21  }
  0x31   :  { %s3730_s0 = scalar_lea.vmem %s81_s18, 2048  ;;  %p3735_p7 = scmp.lt.s32.totalorder %s81_s18, %s81_s18 }
  0x32   :  { %p3731_p6 = scmp.ne.s32.totalorder %s81_s18, %s3730_s0  ;;  %p3736_p8 = scmp.lt.s32.totalorder %s3730_s0, %s3730_s0 }
  0x34   :  { %p3737_p9 = por %p3736_p8, %p3735_p7 }
  0x36   :  { %p3738_p10 = pnand %p3737_p9, %p3731_p6 }
  0x38   :  { %3741 = shalt.err (!%p3738_p10)
}
  0x39   :  { %86 = dma.hbm_to_vmem [thread:$0]  %s4003_s6, 2048, %s81_s18, [#allocation9], %s3815_s20, %s3815_s20, %s3816_s21  }
  0x3a   :  { %s3823_s26 = smov [#allocation11]  }
  0x3b   :  { %s94_s27 = sshll.u32 %s3823_s26, 4  ;;  %s95_s27 = int_to_ptr.vmem [resolvable:$true] %s94_s27 }
  0x3c   :  { %s3750_s28 = scalar_lea.vmem %s95_s27, 14336  ;;  %p3755_p12 = scmp.lt.s32.totalorder %s95_s27, %s95_s27 }
  0x3d   :  { %p3751_p11 = scmp.ne.s32.totalorder %s95_s27, %s3750_s28  ;;  %p3756_p13 = scmp.lt.s32.totalorder %s3750_s28, %s3750_s28 }
  0x3f   :  { %p3757_p0 = por %p3756_p13, %p3755_p12 }
  0x41   :  { %p3758_p1 = pnand %p3757_p0, %p3751_p11 }
  0x43   :  { %3761 = shalt.err (!%p3758_p1)
}
  0x44   :  { %100 = dma.hbm_to_vmem [thread:$0]  %s4005_s8, 14336, %s95_s27, [#allocation12], %s3819_s12, %s3819_s12, %s3820_s13  }
  0x45   :  { %3802 = dma.done.wait [#allocation3], 1792  }
  0x46   :  { %3803 = vsyncadd [#allocation3], 4294965504 }
  0x47   :  { %3804 = dma.done.wait [#allocation6], 14848  }
  0x48   :  { %3805 = vsyncadd [#allocation6], 4294952448 }
  0x49   :  { %3806 = dma.done.wait [#allocation9], 6144  }
  0x4a   :  { %3807 = vsyncadd [#allocation9], 4294961152 }
  0x4b   :  { %3808 = dma.done.wait [#allocation12], 14336  }
  0x4c   :  { %3809 = vsyncadd [#allocation12], 4294952960  ;;  %v3110_v0 = vld [vmem:[#allocation7 + $0x74] ss:$8 sps:$4 sm:$0xff]   ;;  %v3112_v1 = vld [vmem:[#allocation7 + $0x70] ss:$8 sps:$4 sm:$0xff]  }
  0x4d   :  { %894 = vmatprep.subr.bf16.mxu0 %v3110_v0  ;;  %v3113_v2 = vld [vmem:[#allocation7 + $0x174] ss:$8 sps:$4 sm:$0xff]   ;;  %v3115_v3 = vld [vmem:[#allocation7 + $0x170] ss:$8 sps:$4 sm:$0xff]   ;;  %v3116_v4 = vld [vmem:[#allocation7 + $0x64] ss:$8 sps:$4 sm:$0xff]  }
  0x4e   :  { %895 = vmatpush1.bf16.msra.mxu0 %v3112_v1  ;;  %v3118_v5 = vld [vmem:[#allocation7 + $0x60] ss:$8 sps:$4 sm:$0xff]   ;;  %947 = vmatprep.subr.bf16.mxu1 %v3113_v2  ;;  %v3119_v6 = vld [vmem:[#allocation7 + $0x164] ss:$8 sps:$4 sm:$0xff]   ;;  %v3122_v8 = vld [vmem:[#allocation7 + $0x54] ss:$8 sps:$4 sm:$0xff]  }
  0x4f   :  { %948 = vmatpush1.bf16.msra.mxu1 %v3115_v3  ;;  %896 = vmatprep.subr.bf16.mxu0 %v3116_v4  ;;  %v3121_v7 = vld [vmem:[#allocation7 + $0x160] ss:$8 sps:$4 sm:$0xff]   ;;  %v3124_v9 = vld [vmem:[#allocation7 + $0x50] ss:$8 sps:$4 sm:$0xff]   ;;  %v3125_v10 = vld [vmem:[#allocation7 + $0x154] ss:$8 sps:$4 sm:$0xff]  }
  0x50   :  { %949 = vmatprep.subr.bf16.mxu1 %v3119_v6  ;;  %v3128_v11 = vld [vmem:[#allocation7 + $0x44] ss:$8 sps:$4 sm:$0xff]   ;;  %v3127_v12 = vld [vmem:[#allocation7 + $0x150] ss:$8 sps:$4 sm:$0xff]   ;;  %v3130_v14 = vld [vmem:[#allocation7 + $0x40] ss:$8 sps:$4 sm:$0xff]  }
  0x51   :  { %v3131_v13 = vld [vmem:[#allocation7 + $0x144] ss:$8 sps:$4 sm:$0xff]   ;;  %v3134_v15 = vld [vmem:[#allocation7 + $0x34] ss:$8 sps:$4 sm:$0xff]   ;;  %v3133_v16 = vld [vmem:[#allocation7 + $0x140] ss:$8 sps:$4 sm:$0xff]  }
  0x52   :  { %897 = vmatpush1.bf16.msra.mxu0 %v3118_v5  ;;  %v3137_v17 = vld [vmem:[#allocation7 + $0x134] ss:$8 sps:$4 sm:$0xff]   ;;  %v3136_v18 = vld [vmem:[#allocation7 + $0x30] ss:$8 sps:$4 sm:$0xff]   ;;  %v3140_v19 = vld [vmem:[#allocation7 + $0x24] ss:$8 sps:$4 sm:$0xff]  }
  0x53   :  { %898 = vmatprep.subr.bf16.mxu0 %v3122_v8  ;;  %950 = vmatpush1.bf16.msra.mxu1 %v3121_v7  ;;  %v3139_v20 = vld [vmem:[#allocation7 + $0x130] ss:$8 sps:$4 sm:$0xff]   ;;  %v3143_v21 = vld [vmem:[#allocation7 + $0x124] ss:$8 sps:$4 sm:$0xff]   ;;  %v3142_v22 = vld [vmem:[#allocation7 + $0x20] ss:$8 sps:$4 sm:$0xff]  }
  0x54   :  { %951 = vmatprep.subr.bf16.mxu1 %v3125_v10  ;;  %v3146_v23 = vld [vmem:[#allocation7 + $0x14] ss:$8 sps:$4 sm:$0xff]   ;;  %v3145_v24 = vld [vmem:[#allocation7 + $0x120] ss:$8 sps:$4 sm:$0xff]   ;;  %v3148_v26 = vld [vmem:[#allocation7 + $0x10] ss:$8 sps:$4 sm:$0xff]  }
  0x55   :  { %v3149_v25 = vld [vmem:[#allocation7 + $0x114] ss:$8 sps:$4 sm:$0xff]   ;;  %v3152_v27 = vld [vmem:[#allocation7 + $0x4] ss:$8 sps:$4 sm:$0xff]   ;;  %v3151_v28 = vld [vmem:[#allocation7 + $0x110] ss:$8 sps:$4 sm:$0xff]  }
  0x56   :  { %899 = vmatpush1.bf16.msra.mxu0 %v3124_v9  ;;  %v3155_v29 = vld [vmem:[#allocation7 + $0x104] ss:$8 sps:$4 sm:$0xff]   ;;  %v3154_v30 = vld [vmem:[#allocation7] ss:$8 sps:$4 sm:$0xff]   ;;  %v3158_v31 = vld [vmem:[#allocation7 + $0xf4] ss:$8 sps:$4 sm:$0xff]  }
  0x57   :  { %900 = vmatprep.subr.bf16.mxu0 %v3128_v11  ;;  %952 = vmatpush1.bf16.msra.mxu1 %v3127_v12  ;;  %v3157_v32 = vld [vmem:[#allocation7 + $0x100] ss:$8 sps:$4 sm:$0xff]   ;;  %v3161_v33 = vld [vmem:[#allocation7 + $0x1f4] ss:$8 sps:$4 sm:$0xff]   ;;  %v3160_v34 = vld [vmem:[#allocation7 + $0xf0] ss:$8 sps:$4 sm:$0xff]  }
  0x58   :  { %953 = vmatprep.subr.bf16.mxu1 %v3131_v13  ;;  %v3164_v35 = vld [vmem:[#allocation7 + $0xe4] ss:$8 sps:$4 sm:$0xff]   ;;  %v3163_v36 = vld [vmem:[#allocation7 + $0x1f0] ss:$8 sps:$4 sm:$0xff]   ;;  %v3166_v38 = vld [vmem:[#allocation7 + $0xe0] ss:$8 sps:$4 sm:$0xff]  }
  0x59   :  { %v3167_v37 = vld [vmem:[#allocation7 + $0x1e4] ss:$8 sps:$4 sm:$0xff]   ;;  %v3170_v39 = vld [vmem:[#allocation7 + $0xd4] ss:$8 sps:$4 sm:$0xff]   ;;  %v3169_v40 = vld [vmem:[#allocation7 + $0x1e0] ss:$8 sps:$4 sm:$0xff]  }
  0x5a   :  { %901 = vmatpush1.bf16.msra.mxu0 %v3130_v14  ;;  %v3173_v41 = vld [vmem:[#allocation7 + $0x1d4] ss:$8 sps:$4 sm:$0xff]   ;;  %v3172_v42 = vld [vmem:[#allocation7 + $0xd0] ss:$8 sps:$4 sm:$0xff]   ;;  %v3176_v43 = vld [vmem:[#allocation7 + $0xc4] ss:$8 sps:$4 sm:$0xff]  }
  0x5b   :  { %902 = vmatprep.subr.bf16.mxu0 %v3134_v15  ;;  %954 = vmatpush1.bf16.msra.mxu1 %v3133_v16  ;;  %v3175_v44 = vld [vmem:[#allocation7 + $0x1d0] ss:$8 sps:$4 sm:$0xff]   ;;  %v3179_v45 = vld [vmem:[#allocation7 + $0x1c4] ss:$8 sps:$4 sm:$0xff]   ;;  %v3178_v46 = vld [vmem:[#allocation7 + $0xc0] ss:$8 sps:$4 sm:$0xff]  }
  0x5c   :  { %955 = vmatprep.subr.bf16.mxu1 %v3137_v17  ;;  %v3207_v47 = vld [vmem:[#allocation2 + $0x4] ss:$28 sps:$4 sm:$0xff]   ;;  %v3181_v49 = vld [vmem:[#allocation7 + $0x1c0] ss:$8 sps:$4 sm:$0xff]   ;;  %v3214_v51 = vld [vmem:[#allocation2 + $0xc] ss:$28 sps:$4 sm:$0xff]  }
  0x5d   :  { %v3182_v48 = vld [vmem:[#allocation7 + $0xb4] ss:$8 sps:$4 sm:$0xff]   ;;  %926 = vmatprep.mubr.bf16.mxu0 %v3207_v47  ;;  %v3184_v52 = vld [vmem:[#allocation7 + $0xb0] ss:$8 sps:$4 sm:$0xff]   ;;  %v3188_v53 = vld [vmem:[#allocation7 + $0xa4] ss:$8 sps:$4 sm:$0xff]   ;;  %979 = vmatprep.mubr.bf16.mxu1 %v3214_v51 }
  0x5e   :  { %903 = vmatpush1.bf16.msra.mxu0 %v3136_v18  ;;  %v3185_v50 = vld [vmem:[#allocation7 + $0x1b4] ss:$8 sps:$4 sm:$0xff]   ;;  %v3187_v54 = vld [vmem:[#allocation7 + $0x1b0] ss:$8 sps:$4 sm:$0xff]   ;;  %v3191_v55 = vld [vmem:[#allocation7 + $0x1a4] ss:$8 sps:$4 sm:$0xff]  }
  0x5f   :  { %904 = vmatprep.subr.bf16.mxu0 %v3140_v19  ;;  %956 = vmatpush1.bf16.msra.mxu1 %v3139_v20  ;;  %v3190_v56 = vld [vmem:[#allocation7 + $0xa0] ss:$8 sps:$4 sm:$0xff]   ;;  %v3194_v57 = vld [vmem:[#allocation7 + $0x94] ss:$8 sps:$4 sm:$0xff]   ;;  %v3196_v60 = vld [vmem:[#allocation7 + $0x90] ss:$8 sps:$4 sm:$0xff]  }
  0x60   :  { %957 = vmatprep.subr.bf16.mxu1 %v3143_v21  ;;  %v3193_v58 = vld [vmem:[#allocation7 + $0x1a0] ss:$8 sps:$4 sm:$0xff]   ;;  %v3197_v59 = vld [vmem:[#allocation7 + $0x194] ss:$8 sps:$4 sm:$0xff]   ;;  %v3200_v61 = vld [vmem:[#allocation7 + $0x84] ss:$8 sps:$4 sm:$0xff]  }
  0x61   :  { %v3199_v62 = vld [vmem:[#allocation7 + $0x190] ss:$8 sps:$4 sm:$0xff]   ;;  %v3203_v63 = vld [vmem:[#allocation7 + $0x184] ss:$8 sps:$4 sm:$0xff]   ;;  %v3202_v0 = vld [vmem:[#allocation7 + $0x80] ss:$8 sps:$4 sm:$0xff]  }
  0x62   :  { %905 = vmatpush1.bf16.msra.mxu0 %v3142_v22  ;;  %v3211_v1 = vld [vmem:[#allocation7 + $0x274] ss:$8 sps:$4 sm:$0xff]   ;;  %v3208_v2 = vld [vmem:[#allocation7 + $0x180] ss:$8 sps:$4 sm:$0xff]   ;;  %v3205_v3 = vld [vmem:[#allocation2] ss:$28 sps:$4 sm:$0xff]  }
  0x63   :  { %906 = vmatprep.subr.bf16.mxu0 %v3146_v23  ;;  %958 = vmatpush1.bf16.msra.mxu1 %v3145_v24  ;;  %v3238_v4 = vld [vmem:[#allocation7 + $0x374] ss:$8 sps:$4 sm:$0xff]   ;;  %v3209_v5 = vld [vmem:[#allocation7 + $0x270] ss:$8 sps:$4 sm:$0xff]   ;;  %v3217_v7 = vld [vmem:[#allocation7 + $0x264] ss:$8 sps:$4 sm:$0xff]  }
  0x64   :  { %959 = vmatprep.subr.bf16.mxu1 %v3149_v25  ;;  %v3212_v6 = vld [vmem:[#allocation2 + $0x8] ss:$28 sps:$4 sm:$0xff]   ;;  %v3244_v9 = vld [vmem:[#allocation7 + $0x364] ss:$8 sps:$4 sm:$0xff]   ;;  %v3215_v10 = vld [vmem:[#allocation7 + $0x260] ss:$8 sps:$4 sm:$0xff]  }
  0x65   :  { %v3236_v8 = vld [vmem:[#allocation7 + $0x370] ss:$8 sps:$4 sm:$0xff]   ;;  %v3220_v11 = vld [vmem:[#allocation7 + $0x254] ss:$8 sps:$4 sm:$0xff]   ;;  %v3242_v13 = vld [vmem:[#allocation7 + $0x360] ss:$8 sps:$4 sm:$0xff]  }
  0x66   :  { %907 = vmatpush1.bf16.msra.mxu0 %v3148_v26  ;;  %v3218_v12 = vld [vmem:[#allocation7 + $0x250] ss:$8 sps:$4 sm:$0xff]   ;;  %v3223_v14 = vld [vmem:[#allocation7 + $0x244] ss:$8 sps:$4 sm:$0xff]   ;;  %v3250_v15 = vld [vmem:[#allocation7 + $0x354] ss:$8 sps:$4 sm:$0xff]  }
  0x67   :  { %908 = vmatprep.subr.bf16.mxu0 %v3152_v27  ;;  %960 = vmatpush1.bf16.msra.mxu1 %v3151_v28  ;;  %v3248_v16 = vld [vmem:[#allocation7 + $0x350] ss:$8 sps:$4 sm:$0xff]   ;;  %v3269_v17 = vld [vmem:[#allocation2 + $0x3c] ss:$28 sps:$4 sm:$0xff]   ;;  %v3226_v23 = vld [vmem:[#allocation7 + $0x234] ss:$8 sps:$4 sm:$0xff]  }
  0x68   :  { %961 = vmatprep.subr.bf16.mxu1 %v3155_v29  ;;  %v3271_v18 = vld [vmem:[#allocation2 + $0x38] ss:$28 sps:$4 sm:$0xff]   ;;  %v3272_v19 = vld [vmem:[#allocation2 + $0x44] ss:$28 sps:$4 sm:$0xff]   ;;  %v3824_v25 = vmov 0  }
  0x69   :  { %v3274_v20 = vld [vmem:[#allocation2 + $0x40] ss:$28 sps:$4 sm:$0xff]   ;;  %v3221_v22 = vld [vmem:[#allocation7 + $0x240] ss:$8 sps:$4 sm:$0xff]   ;;  %v3262_v26 = vld [vmem:[#allocation7 + $0x334] ss:$8 sps:$4 sm:$0xff]  }
  0x6a   :  { %909 = vmatpush1.bf16.msra.mxu0 %v3154_v30  ;;  %v3256_v21 = vld [vmem:[#allocation7 + $0x344] ss:$8 sps:$4 sm:$0xff]   ;;  %v3254_v24 = vld [vmem:[#allocation7 + $0x340] ss:$8 sps:$4 sm:$0xff]   ;;  %v3224_v27 = vld [vmem:[#allocation7 + $0x230] ss:$8 sps:$4 sm:$0xff]  }
  0x6b   :  { %910 = vmatprep.subr.bf16.mxu0 %v3158_v31  ;;  %962 = vmatpush1.bf16.msra.mxu1 %v3157_v32  ;;  %v3229_v28 = vld [vmem:[#allocation7 + $0x224] ss:$8 sps:$4 sm:$0xff]   ;;  %v3260_v29 = vld [vmem:[#allocation7 + $0x330] ss:$8 sps:$4 sm:$0xff]   ;;  %v3227_v32 = vld [vmem:[#allocation7 + $0x220] ss:$8 sps:$4 sm:$0xff]  }
  0x6c   :  { %963 = vmatprep.subr.bf16.mxu1 %v3161_v33  ;;  %v3268_v30 = vld [vmem:[#allocation7 + $0x324] ss:$8 sps:$4 sm:$0xff]   ;;  %v3232_v33 = vld [vmem:[#allocation7 + $0x214] ss:$8 sps:$4 sm:$0xff]   ;;  %v3257_v51 = vld [vmem:[#allocation7 + $0x2c0] ss:$8 sps:$4 sm:$0xff]  }
  0x6d   :  { %v3293_v31 = vld [vmem:[#allocation2 + $0x14] ss:$28 sps:$4 sm:$0xff]   ;;  %v3253_v47 = vld [vmem:[#allocation7 + $0x2d4] ss:$8 sps:$4 sm:$0xff]  }
  0x6e   :  { %911 = vmatpush2.bf16.msra.mxu0 %v3160_v34  ;;  %v3266_v34 = vld [vmem:[#allocation7 + $0x320] ss:$8 sps:$4 sm:$0xff]  }
  0x6f   :  { %912 = vmatprep.subr.bf16.mxu0 %v3164_v35  ;;  %964 = vmatpush2.bf16.msra.mxu1 %v3163_v36  ;;  %v3280_v35 = vld [vmem:[#allocation7 + $0x314] ss:$8 sps:$4 sm:$0xff]   ;;  %v3230_v36 = vld [vmem:[#allocation7 + $0x210] ss:$8 sps:$4 sm:$0xff]  }
  0x70   :  { %965 = vmatprep.subr.bf16.mxu1 %v3167_v37  ;;  %v3235_v37 = vld [vmem:[#allocation7 + $0x204] ss:$8 sps:$4 sm:$0xff]  }
  0x72   :  { %913 = vmatpush2.bf16.msra.mxu0 %v3166_v38  ;;  %v3278_v38 = vld [vmem:[#allocation7 + $0x310] ss:$8 sps:$4 sm:$0xff]  }
  0x73   :  { %914 = vmatprep.subr.bf16.mxu0 %v3170_v39  ;;  %966 = vmatpush2.bf16.msra.mxu1 %v3169_v40  ;;  %v3286_v39 = vld [vmem:[#allocation7 + $0x304] ss:$8 sps:$4 sm:$0xff]   ;;  %v3233_v40 = vld [vmem:[#allocation7 + $0x200] ss:$8 sps:$4 sm:$0xff]  }
  0x74   :  { %967 = vmatprep.subr.bf16.mxu1 %v3173_v41  ;;  %v3241_v41 = vld [vmem:[#allocation7 + $0x2f4] ss:$8 sps:$4 sm:$0xff]  }
  0x76   :  { %915 = vmatpush2.bf16.msra.mxu0 %v3172_v42  ;;  %v3284_v42 = vld [vmem:[#allocation7 + $0x300] ss:$8 sps:$4 sm:$0xff]  }
  0x77   :  { %916 = vmatprep.subr.bf16.mxu0 %v3176_v43  ;;  %968 = vmatpush2.bf16.msra.mxu1 %v3175_v44  ;;  %v3239_v43 = vld [vmem:[#allocation7 + $0x2f0] ss:$8 sps:$4 sm:$0xff]   ;;  %v3247_v44 = vld [vmem:[#allocation7 + $0x2e4] ss:$8 sps:$4 sm:$0xff]  }
  0x78   :  { %969 = vmatprep.subr.bf16.mxu1 %v3179_v45  ;;  %v3290_v45 = vld [vmem:[#allocation2 + $0x18] ss:$28 sps:$4 sm:$0xff]  }
  0x7a   :  { %917 = vmatpush2.bf16.msra.mxu0 %v3178_v46  ;;  %v3245_v46 = vld [vmem:[#allocation7 + $0x2e0] ss:$8 sps:$4 sm:$0xff]  }
  0x7b   :  { %918 = vmatprep.subr.bf16.mxu0 %v3182_v48  ;;  %970 = vmatpush2.bf16.msra.mxu1 %v3181_v49  ;;  %v3251_v48 = vld [vmem:[#allocation7 + $0x2d0] ss:$8 sps:$4 sm:$0xff]   ;;  %v3259_v49 = vld [vmem:[#allocation7 + $0x2c4] ss:$8 sps:$4 sm:$0xff]  }
  0x7c   :  { %971 = vmatprep.subr.bf16.mxu1 %v3185_v50  ;;  %v3297_v50 = vld [vmem:[#allocation2 + $0x50] ss:$28 sps:$4 sm:$0xff]  }
  0x7e   :  { %919 = vmatpush2.bf16.msra.mxu0 %v3184_v52  ;;  %v3265_v52 = vld [vmem:[#allocation7 + $0x2b4] ss:$8 sps:$4 sm:$0xff]  }
  0x7f   :  { %920 = vmatprep.subr.bf16.mxu0 %v3188_v53  ;;  %972 = vmatpush2.bf16.msra.mxu1 %v3187_v54  ;;  %v3263_v53 = vld [vmem:[#allocation7 + $0x2b0] ss:$8 sps:$4 sm:$0xff]   ;;  %v3277_v54 = vld [vmem:[#allocation7 + $0x2a4] ss:$8 sps:$4 sm:$0xff]  }
  0x80   :  { %973 = vmatprep.subr.bf16.mxu1 %v3191_v55  ;;  %v3275_v55 = vld [vmem:[#allocation7 + $0x2a0] ss:$8 sps:$4 sm:$0xff]  }
  0x82   :  { %921 = vmatpush2.bf16.msra.mxu0 %v3190_v56  ;;  %v3283_v56 = vld [vmem:[#allocation7 + $0x294] ss:$8 sps:$4 sm:$0xff]  }
  0x83   :  { %922 = vmatprep.subr.bf16.mxu0 %v3194_v57  ;;  %974 = vmatpush2.bf16.msra.mxu1 %v3193_v58  ;;  %v3281_v57 = vld [vmem:[#allocation7 + $0x290] ss:$8 sps:$4 sm:$0xff]   ;;  %v3289_v58 = vld [vmem:[#allocation7 + $0x284] ss:$8 sps:$4 sm:$0xff]  }
  0x84   :  { %975 = vmatprep.subr.bf16.mxu1 %v3197_v59  ;;  %v3287_v59 = vld [vmem:[#allocation7 + $0x280] ss:$8 sps:$4 sm:$0xff]  }
  0x86   :  { %923 = vmatpush2.bf16.msra.mxu0 %v3196_v60  ;;  %v3291_v60 = vld [vmem:[#allocation2 + $0x10] ss:$28 sps:$4 sm:$0xff]  }
  0x87   :  { %924 = vmatprep.subr.bf16.mxu0 %v3200_v61  ;;  %976 = vmatpush2.bf16.msra.mxu1 %v3199_v62  ;;  %v3294_v61 = vld [vmem:[#allocation2 + $0x4c] ss:$28 sps:$4 sm:$0xff]  }
  0x88   :  { %977 = vmatprep.subr.bf16.mxu1 %v3203_v63  ;;  %v3296_v62 = vld [vmem:[#allocation2 + $0x48] ss:$28 sps:$4 sm:$0xff]  }
  0x89   :  { %v3298_v63 = vld [vmem:[#allocation8 + $0x70] ss:$8 sps:$4 sm:$0xff]  }
  0x8a   :  { %925 = vmatpush2.bf16.msra.mxu0 %v3202_v0  ;;  %v3300_v0 = vld [vmem:[#allocation8 + $0x74] ss:$8 sps:$4 sm:$0xff]  }
  0x8b   :  { %1000 = vmatprep.subr.bf16.mxu0 %v3211_v1  ;;  %978 = vmatpush2.bf16.msra.mxu1 %v3208_v2  ;;  %v3303_v1 = vld [vmem:[#allocation8 + $0x64] ss:$8 sps:$4 sm:$0xff]   ;;  %v3301_v2 = vld [vmem:[#allocation8 + $0x60] ss:$8 sps:$4 sm:$0xff]  }
  0x8c   :  { %1053 = vmatprep.subr.bf16.mxu1 %v3238_v4  ;;  %v3304_v4 = vld [vmem:[#allocation8 + $0x50] ss:$8 sps:$4 sm:$0xff]  }
  0x8d   :  { %927 = vmatmul.mubr.bf16.vlgmr.msra.gmra.mxu0 %v3205_v3  ;;  %v3306_v3 = vld [vmem:[#allocation8 + $0x54] ss:$8 sps:$4 sm:$0xff]  }
  0x8e   :  { %1001 = vmatpush1.bf16.msra.mxu0 %v3209_v5  ;;  %980 = vmatmul.mubr.bf16.vlgmr.msra.gmra.mxu1 %v3212_v6  ;;  %v3309_v5 = vld [vmem:[#allocation8 + $0x44] ss:$8 sps:$4 sm:$0xff]   ;;  %v3307_v6 = vld [vmem:[#allocation8 + $0x40] ss:$8 sps:$4 sm:$0xff]  }
  0x8f   :  { %1002 = vmatprep.subr.bf16.mxu0 %v3217_v7  ;;  %1054 = vmatpush1.bf16.msra.mxu1 %v3236_v8  ;;  %v3312_v7 = vld [vmem:[#allocation8 + $0x34] ss:$8 sps:$4 sm:$0xff]   ;;  %v3310_v8 = vld [vmem:[#allocation8 + $0x30] ss:$8 sps:$4 sm:$0xff]  }
  0x90   :  { %1055 = vmatprep.subr.bf16.mxu1 %v3244_v9  ;;  %936 = vmatprep.mubr.bf16.mxu0 %v3269_v17  ;;  %v3315_v9 = vld [vmem:[#allocation8 + $0x24] ss:$8 sps:$4 sm:$0xff]  }
  0x91   :  { %989 = vmatprep.mubr.bf16.mxu1 %v3272_v19  ;;  %v3327_v17 = vld [vmem:[#allocation8 + $0xe4] ss:$8 sps:$4 sm:$0xff]   ;;  %v3330_v19 = vld [vmem:[#allocation8 + $0xd4] ss:$8 sps:$4 sm:$0xff]  }
  0x92   :  { %1003 = vmatpush1.bf16.msra.mxu0 %v3215_v10  ;;  %v3313_v10 = vld [vmem:[#allocation8 + $0x20] ss:$8 sps:$4 sm:$0xff]  }
  0x93   :  { %1004 = vmatprep.subr.bf16.mxu0 %v3220_v11  ;;  %1056 = vmatpush1.bf16.msra.mxu1 %v3242_v13  ;;  %v3318_v11 = vld [vmem:[#allocation8 + $0x14] ss:$8 sps:$4 sm:$0xff]   ;;  %v3321_v13 = vld [vmem:[#allocation8 + $0x4] ss:$8 sps:$4 sm:$0xff]  }
  0x94   :  { %1057 = vmatprep.subr.bf16.mxu1 %v3250_v15  ;;  %v3324_v15 = vld [vmem:[#allocation8 + $0xf4] ss:$8 sps:$4 sm:$0xff]  }
  0x95   :  { %937 = vmatmul.mubr.bf16.gmra.mxu0 %v3271_v18  ;;  %v3325_v18 = vld [vmem:[#allocation8 + $0xe0] ss:$8 sps:$4 sm:$0xff]  }
  0x96   :  { %1005 = vmatpush1.bf16.msra.mxu0 %v3218_v12  ;;  %990 = vmatmul.mubr.bf16.gmra.mxu1 %v3274_v20  ;;  %v3316_v12 = vld [vmem:[#allocation8 + $0x10] ss:$8 sps:$4 sm:$0xff]  }
  0x97   :  { %1006 = vmatprep.subr.bf16.mxu0 %v3223_v14  ;;  %1058 = vmatpush1.bf16.msra.mxu1 %v3248_v16  ;;  %v3319_v14 = vld [vmem:[#allocation8] ss:$8 sps:$4 sm:$0xff]   ;;  %v3322_v16 = vld [vmem:[#allocation8 + $0xf0] ss:$8 sps:$4 sm:$0xff]  }
  0x98   :  { %1085 = vmatprep.mubr.bf16.mxu1 %v3824_v25  ;;  %1059 = vmatprep.subr.bf16.mxu1 %v3256_v21  ;;  %v3328_v20 = vld [vmem:[#allocation8 + $0xd0] ss:$8 sps:$4 sm:$0xff]   ;;  %v3333_v21 = vld [vmem:[#allocation8 + $0xc4] ss:$8 sps:$4 sm:$0xff]  }
  0x99   :  { %1032 = vmatprep.mubr.bf16.mxu0 %v3293_v31  ;;  %v3343_v31 = vld [vmem:[#allocation8 + $0x80] ss:$8 sps:$4 sm:$0xff]  }
  0x9a   :  { %1007 = vmatpush1.bf16.msra.mxu0 %v3221_v22  ;;  %v3331_v22 = vld [vmem:[#allocation8 + $0xc0] ss:$8 sps:$4 sm:$0xff]  }
  0x9b   :  { %1008 = vmatprep.subr.bf16.mxu0 %v3226_v23  ;;  %1060 = vmatpush1.bf16.msra.mxu1 %v3254_v24  ;;  %v3336_v23 = vld [vmem:[#allocation8 + $0xb4] ss:$8 sps:$4 sm:$0xff]   ;;  %v3334_v24 = vld [vmem:[#allocation8 + $0xb0] ss:$8 sps:$4 sm:$0xff]  }
  0x9c   :  { %1061 = vmatprep.subr.bf16.mxu1 %v3262_v26  ;;  %v3339_v26 = vld [vmem:[#allocation8 + $0xa4] ss:$8 sps:$4 sm:$0xff]  }
  0x9e   :  { %1009 = vmatpush1.bf16.msra.mxu0 %v3224_v27  ;;  %v3337_v27 = vld [vmem:[#allocation8 + $0xa0] ss:$8 sps:$4 sm:$0xff]  }
  0x9f   :  { %1010 = vmatprep.subr.bf16.mxu0 %v3229_v28  ;;  %1062 = vmatpush1.bf16.msra.mxu1 %v3260_v29  ;;  %v3342_v28 = vld [vmem:[#allocation8 + $0x94] ss:$8 sps:$4 sm:$0xff]   ;;  %v3340_v29 = vld [vmem:[#allocation8 + $0x90] ss:$8 sps:$4 sm:$0xff]  }
  0xa0   :  { %1063 = vmatprep.subr.bf16.mxu1 %v3268_v30  ;;  %v3345_v30 = vld [vmem:[#allocation8 + $0x84] ss:$8 sps:$4 sm:$0xff]  }
  0xa2   :  { %1011 = vmatpush1.bf16.msra.mxu0 %v3227_v32  ;;  %v3346_v32 = vld [vmem:[#allocation10 + $0x70] ss:$8 sps:$4 sm:$0xff]  }
  0xa3   :  { %1012 = vmatprep.subr.bf16.mxu0 %v3232_v33  ;;  %1064 = vmatpush1.bf16.msra.mxu1 %v3266_v34  ;;  %v3348_v33 = vld [vmem:[#allocation10 + $0x74] ss:$8 sps:$4 sm:$0xff]   ;;  %v3351_v34 = vld [vmem:[#allocation10 + $0x64] ss:$8 sps:$4 sm:$0xff]  }
  0xa4   :  { %1065 = vmatprep.subr.bf16.mxu1 %v3280_v35  ;;  %v3349_v35 = vld [vmem:[#allocation10 + $0x60] ss:$8 sps:$4 sm:$0xff]  }
  0xa6   :  { %1013 = vmatpush1.bf16.msra.mxu0 %v3230_v36  ;;  %v3354_v36 = vld [vmem:[#allocation10 + $0x54] ss:$8 sps:$4 sm:$0xff]  }
  0xa7   :  { %1014 = vmatprep.subr.bf16.mxu0 %v3235_v37  ;;  %1066 = vmatpush1.bf16.msra.mxu1 %v3278_v38  ;;  %v3352_v37 = vld [vmem:[#allocation10 + $0x50] ss:$8 sps:$4 sm:$0xff]   ;;  %v3357_v38 = vld [vmem:[#allocation10 + $0x44] ss:$8 sps:$4 sm:$0xff]  }
  0xa8   :  { %1067 = vmatprep.subr.bf16.mxu1 %v3286_v39  ;;  %v3355_v39 = vld [vmem:[#allocation10 + $0x40] ss:$8 sps:$4 sm:$0xff]  }
  0xaa   :  { %1015 = vmatpush1.bf16.msra.mxu0 %v3233_v40  ;;  %v3360_v40 = vld [vmem:[#allocation10 + $0x34] ss:$8 sps:$4 sm:$0xff]  }
  0xab   :  { %1016 = vmatprep.subr.bf16.mxu0 %v3241_v41  ;;  %1068 = vmatpush1.bf16.msra.mxu1 %v3284_v42  ;;  %v3358_v41 = vld [vmem:[#allocation10 + $0x30] ss:$8 sps:$4 sm:$0xff]  }
  0xac   :  { %1322 = vmatprep.subr.bf16.mxu1 %v3300_v0 }
  0xae   :  { %1017 = vmatpush2.bf16.msra.mxu0 %v3239_v43  ;;  %1086 = vmatmul.mubr.bf16.vlgmr.msra.gmra.mxu1 %v3290_v45 }
  0xaf   :  { %1018 = vmatprep.subr.bf16.mxu0 %v3247_v44  ;;  %1095 = vmatprep.mubr.bf16.mxu1 %v3824_v25 }
  0xb0   :  { %1323 = vmatpush1.bf16.msra.mxu1 %v3298_v63 }
  0xb1   :  { %1324 = vmatprep.subr.bf16.mxu1 %v3303_v1 }
  0xb2   :  { %1019 = vmatpush2.bf16.msra.mxu0 %v3245_v46 }
  0xb3   :  { %1020 = vmatprep.subr.bf16.mxu0 %v3253_v47 }
  0xb4   :  { %1325 = vmatpush1.bf16.msra.mxu1 %v3301_v2 }
  0xb5   :  { %1326 = vmatprep.subr.bf16.mxu1 %v3306_v3 }
  0xb6   :  { %1021 = vmatpush2.bf16.msra.mxu0 %v3251_v48  ;;  %1096 = vmatmul.mubr.bf16.gmra.mxu1 %v3297_v50 }
  0xb7   :  { %1022 = vmatprep.subr.bf16.mxu0 %v3259_v49 }
  0xb8   :  { %1327 = vmatpush1.bf16.msra.mxu1 %v3304_v4 }
  0xb9   :  { %1328 = vmatprep.subr.bf16.mxu1 %v3309_v5 }
  0xba   :  { %1023 = vmatpush2.bf16.msra.mxu0 %v3257_v51 }
  0xbb   :  { %1024 = vmatprep.subr.bf16.mxu0 %v3265_v52  ;;  %v252_v52 = vlaneseq }
  0xbc   :  { %1329 = vmatpush1.bf16.msra.mxu1 %v3307_v6 }
  0xbd   :  { %1330 = vmatprep.subr.bf16.mxu1 %v3312_v7 }
  0xbe   :  { %1025 = vmatpush2.bf16.msra.mxu0 %v3263_v53 }
  0xbf   :  { %1026 = vmatprep.subr.bf16.mxu0 %v3277_v54 }
  0xc0   :  { %1331 = vmatpush1.bf16.msra.mxu1 %v3310_v8 }
  0xc1   :  { %1332 = vmatprep.subr.bf16.mxu1 %v3315_v9 }
  0xc2   :  { %1027 = vmatpush2.bf16.msra.mxu0 %v3275_v55  ;;  %v3930_v55 = vshrl.u32 %v252_v52, 7 }
  0xc3   :  { %1028 = vmatprep.subr.bf16.mxu0 %v3283_v56 }
  0xc4   :  { %1333 = vmatpush1.bf16.msra.mxu1 %v3313_v10 }
  0xc5   :  { %1334 = vmatprep.subr.bf16.mxu1 %v3318_v11 }
  0xc6   :  { %1029 = vmatpush2.bf16.msra.mxu0 %v3281_v57 }
  0xc7   :  { %1030 = vmatprep.subr.bf16.mxu0 %v3289_v58  ;;  %v3933_v58 = vsub.s32 1, %v3930_v55 }
  0xc8   :  { %1335 = vmatpush1.bf16.msra.mxu1 %v3316_v12 }
  0xc9   :  { %1336 = vmatprep.subr.bf16.mxu1 %v3321_v13 }
  0xca   :  { %1031 = vmatpush2.bf16.msra.mxu0 %v3287_v59  ;;  %v250_v59 = vld [vmem:[%s4000_s3] sm:$0x3] }
  0xcb   :  { %1497 = vmatprep.subr.bf16.mxu0 %v3348_v33  ;;  %v259_v63 = vrot.slane %v250_v59, %v3933_v58 }
  0xcc   :  { %1337 = vmatpush1.bf16.msra.mxu1 %v3319_v14 }
  0xcd   :  { %1033 = vmatmul.mubr.bf16.vlgmr.msra.gmra.mxu0 %v3291_v60  ;;  %1338 = vmatprep.subr.bf16.mxu1 %v3324_v15  ;;  %v3939_v60 = vsub.s32 0, %v3930_v55 }
  0xce   :  { %1042 = vmatprep.mubr.bf16.mxu0 %v3294_v61  ;;  %1498 = vmatpush1.bf16.msra.mxu0 %v3346_v32 }
  0xcf   :  { %1499 = vmatprep.subr.bf16.mxu0 %v3351_v34  ;;  %v255_v0 = vrot.slane %v250_v59, %v3939_v60 }
  0xd0   :  { %1339 = vmatpush2.bf16.msra.mxu1 %v3322_v16 }
  0xd1   :  { %1340 = vmatprep.subr.bf16.mxu1 %v3327_v17 }
  0xd2   :  { %1500 = vmatpush1.bf16.msra.mxu0 %v3349_v35 }
  0xd3   :  { %1501 = vmatprep.subr.bf16.mxu0 %v3354_v36 }
  0xd4   :  { %1341 = vmatpush2.bf16.msra.mxu1 %v3325_v18 }
  0xd5   :  { %1043 = vmatmul.mubr.bf16.gmra.mxu0 %v3296_v62  ;;  %1342 = vmatprep.subr.bf16.mxu1 %v3330_v19 }
  0xd6   :  { %1529 = vmatprep.mubr.bf16.mxu0 %v3824_v25  ;;  %1502 = vmatpush1.bf16.msra.mxu0 %v3352_v37 }
  0xd7   :  { %1503 = vmatprep.subr.bf16.mxu0 %v3357_v38 }
  0xd8   :  { %1343 = vmatpush2.bf16.msra.mxu1 %v3328_v20 }
  0xd9   :  { %1344 = vmatprep.subr.bf16.mxu1 %v3333_v21 }
  0xda   :  { %1504 = vmatpush1.bf16.msra.mxu0 %v3355_v39 }
  0xdb   :  { %1505 = vmatprep.subr.bf16.mxu0 %v3360_v40 }
  0xdc   :  { %1345 = vmatpush2.bf16.msra.mxu1 %v3331_v22 }
  0xdd   :  { %1346 = vmatprep.subr.bf16.mxu1 %v3336_v23 }
  0xde   :  { %1506 = vmatpush1.bf16.msra.mxu0 %v3358_v41 }
  0xe0   :  { %1347 = vmatpush2.bf16.msra.mxu1 %v3334_v24 }
  0xe1   :  { %1348 = vmatprep.subr.bf16.mxu1 %v3339_v26 }
  0xe4   :  { %1349 = vmatpush2.bf16.msra.mxu1 %v3337_v27 }
  0xe5   :  { %1350 = vmatprep.subr.bf16.mxu1 %v3342_v28 }
  0xe8   :  { %1351 = vmatpush2.bf16.msra.mxu1 %v3340_v29 }
  0xe9   :  { %1352 = vmatprep.subr.bf16.mxu1 %v3345_v30 }
  0xec   :  { %1353 = vmatpush2.bf16.msra.mxu1 %v3343_v31 }
 0x14d   :  { %v928_v46 = vpop.f32.mrf.mxu0 }
 0x14e   :  { %v981_v42 = vpop.f32.mrf.mxu1  ;;  %v929_v4 = vadd.f32 %v928_v46, %v255_v0 }
 0x14f   :  { %v930_v48 = vpop.f32.mrf.mxu0 }
 0x150   :  { %v983_v43 = vpop.f32.mrf.mxu1  ;;  %v931_v3 = vadd.f32 %v930_v48, %v259_v63  ;;  %v982_v11 = vadd.f32 %v981_v42, %v929_v4  ;;  %v3364_v4 = vld [vmem:[#allocation10 + $0x10] ss:$8 sps:$4 sm:$0xff]  }
 0x151   :  { %v932_v50 = vpop.f32.mrf.mxu0 }
 0x152   :  { %v985_v44 = vpop.f32.mrf.mxu1  ;;  %v933_v6 = vadd.f32 %v932_v50, %v255_v0  ;;  %v984_v9 = vadd.f32 %v983_v43, %v931_v3  ;;  %v3366_v3 = vld [vmem:[#allocation10 + $0x14] ss:$8 sps:$4 sm:$0xff]  }
 0x153   :  { %v934_v53 = vpop.f32.mrf.mxu0 }
 0x154   :  { %v987_v45 = vpop.f32.mrf.mxu1  ;;  %v935_v10 = vadd.f32 %v934_v53, %v259_v63  ;;  %v986_v14 = vadd.f32 %v985_v44, %v933_v6  ;;  %v3367_v6 = vld [vmem:[#allocation10] ss:$8 sps:$4 sm:$0xff]  }
 0x155   :  { %v938_v56 = vpop.f32.mrf.mxu0 }
 0x156   :  { %v991_v47 = vpop.f32.mrf.mxu1  ;;  %v988_v18 = vadd.f32 %v987_v45, %v935_v10  ;;  %v939_v21 = vadd.f32 %v938_v56, %v255_v0  ;;  %v3381_v10 = vld [vmem:[#allocation11 + $0x15c] ss:$28 sps:$4 sm:$0xff]  }
 0x157   :  { %v940_v61 = vpop.f32.mrf.mxu0 }
 0x158   :  { %v993_v49 = vpop.f32.mrf.mxu1  ;;  %v941_v19 = vadd.f32 %v940_v61, %v259_v63  ;;  %v992_v34 = vadd.f32 %v991_v47, %v939_v21  ;;  %v3409_v21 = vld [vmem:[#allocation11 + $0x40] ss:$28 sps:$4 sm:$0xff]  }
 0x159   :  { %v942_v1 = vpop.f32.mrf.mxu0 }
 0x15a   :  { %v995_v51 = vpop.f32.mrf.mxu1  ;;  %v943_v24 = vadd.f32 %v942_v1, %v255_v0  ;;  %v994_v31 = vadd.f32 %v993_v49, %v941_v19  ;;  %v3403_v19 = vld [vmem:[#allocation11 + $0x78] ss:$28 sps:$4 sm:$0xff]  }
 0x15b   :  { %v944_v5 = vpop.f32.mrf.mxu0 }
 0x15c   :  { %v997_v54 = vpop.f32.mrf.mxu1  ;;  %v945_v32 = vadd.f32 %v944_v5, %v259_v63  ;;  %v996_v38 = vadd.f32 %v995_v51, %v943_v24  ;;  %v3369_v5 = vld [vmem:[#allocation10 + $0x4] ss:$8 sps:$4 sm:$0xff]   ;;  %v3423_v24 = vld [vmem:[#allocation11 + $0x354] ss:$28 sps:$4 sm:$0xff]  }
 0x15e   :  { %v998_v45 = vadd.f32 %v997_v54, %v945_v32  ;;  %v3363_v54 = vld [vmem:[#allocation10 + $0x24] ss:$8 sps:$4 sm:$0xff]  }
 0x15f   :  { %1507 = vmatprep.subr.bf16.mxu0 %v3363_v54  ;;  %v3439_v32 = vld [vmem:[#allocation11 + $0x2a8] ss:$28 sps:$4 sm:$0xff]  }
 0x16e   :  { %v1087_v57 = vpop.f32.mrf.mxu1 }
 0x170   :  { %v1089_v62 = vpop.f32.mrf.mxu1 }
 0x172   :  { %v1091_v2 = vpop.f32.mrf.mxu1 }
 0x174   :  { %v1093_v8 = vpop.f32.mrf.mxu1 }
 0x176   :  { %v1097_v13 = vpop.f32.mrf.mxu1 }
 0x178   :  { %v1099_v23 = vpop.f32.mrf.mxu1 }
 0x17a   :  { %v1101_v37 = vpop.f32.mrf.mxu1 }
 0x17c   :  { %v1103_v53 = vpop.f32.mrf.mxu1 }
 0x18d   :  { %v1034_v7 = vpop.f32.mrf.mxu0 }
 0x18e   :  { %v1035_v16 = vadd.f32 %v1034_v7, %v982_v11  ;;  %v3372_v7 = vld [vmem:[#allocation11 + $0x18c] ss:$28 sps:$4 sm:$0xff]   ;;  %v3379_v11 = vld [vmem:[#allocation11 + $0x158] ss:$28 sps:$4 sm:$0xff]  }
 0x18f   :  { %v1036_v12 = vpop.f32.mrf.mxu0 }
 0x190   :  { %v1037_v15 = vadd.f32 %v1036_v12, %v984_v9  ;;  %v1088_v29 = vadd.f32 %v1087_v57, %v1035_v16  ;;  %v3375_v9 = vld [vmem:[#allocation11 + $0x194] ss:$28 sps:$4 sm:$0xff]   ;;  %v3387_v12 = vld [vmem:[#allocation11 + $0x124] ss:$28 sps:$4 sm:$0xff]  }
 0x191   :  { %v1038_v17 = vpop.f32.mrf.mxu0  ;;  %2356 = vmatprep.subr.bf16.mxu1 %v3375_v9  ;;  %v3399_v16 = vld [vmem:[#allocation11 + $0xb4] ss:$28 sps:$4 sm:$0xff]  }
 0x192   :  { %v1039_v20 = vadd.f32 %v1038_v17, %v986_v14  ;;  %v1090_v26 = vadd.f32 %v1089_v62, %v1037_v15  ;;  %v1106_v42 = vmax.f32 %v1088_v29, 0.0  ;;  %v3393_v14 = vld [vmem:[#allocation11 + $0xec] ss:$28 sps:$4 sm:$0xff]   ;;  %v3435_v29 = vld [vmem:[#allocation11 + $0x2e4] ss:$28 sps:$4 sm:$0xff]  }
 0x193   :  { %v1040_v22 = vpop.f32.mrf.mxu0  ;;  %v3391_v15 = vld [vmem:[#allocation11 + $0xe8] ss:$28 sps:$4 sm:$0xff]   ;;  %v3397_v17 = vld [vmem:[#allocation11 + $0xb0] ss:$28 sps:$4 sm:$0xff]  }
 0x194   :  { %v1092_v27 = vadd.f32 %v1091_v2, %v1039_v20  ;;  %v1041_v28 = vadd.f32 %v1040_v22, %v988_v18  ;;  %v1107_v39 = vmax.f32 %v1090_v26, 0.0  ;;  %v3361_v2 = vld [vmem:[#allocation10 + $0x20] ss:$8 sps:$4 sm:$0xff]   ;;  %v3405_v18 = vld [vmem:[#allocation11 + $0x7c] ss:$28 sps:$4 sm:$0xff]  }
 0x195   :  { %v1044_v30 = vpop.f32.mrf.mxu0  ;;  %1508 = vmatpush1.bf16.msra.mxu0 %v3361_v2  ;;  %v3411_v20 = vld [vmem:[#allocation11 + $0x44] ss:$28 sps:$4 sm:$0xff]   ;;  %v3417_v22 = vld [vmem:[#allocation11 + $0xc] ss:$28 sps:$4 sm:$0xff]   ;;  %v1378_v2 = vld [vmem:[#allocation5 + $0x18] sm:$0xff] }
 0x196   :  { %v1094_v33 = vadd.f32 %v1093_v8, %v1041_v28  ;;  %v1108_v35 = vmax.f32 %v1092_v27, 0.0  ;;  %v1045_v43 = vadd.f32 %v1044_v30, %v992_v34  ;;  %1509 = vmatprep.subr.bf16.mxu0 %v3366_v3  ;;  %v3373_v8 = vld [vmem:[#allocation11 + $0x190] ss:$28 sps:$4 sm:$0xff]   ;;  %v3429_v27 = vld [vmem:[#allocation11 + $0x31c] ss:$28 sps:$4 sm:$0xff]  }
 0x197   :  { %v1046_v36 = vpop.f32.mrf.mxu0  ;;  %v3421_v26 = vld [vmem:[#allocation11 + $0x350] ss:$28 sps:$4 sm:$0xff]   ;;  %v3427_v28 = vld [vmem:[#allocation11 + $0x318] ss:$28 sps:$4 sm:$0xff]   ;;  %v3433_v30 = vld [vmem:[#allocation11 + $0x2e0] ss:$28 sps:$4 sm:$0xff]  }
 0x198   :  { %v1109_v40 = vmax.f32 %v1094_v33, 0.0  ;;  %v1047_v41 = vadd.f32 %v1046_v36, %v994_v31  ;;  %v1114_v50 = vpack.c.bf16 %v1108_v35, %v1106_v42  ;;  %v1098_v47 = vadd.f32 %v1097_v13, %v1045_v43  ;;  %v3385_v13 = vld [vmem:[#allocation11 + $0x120] ss:$28 sps:$4 sm:$0xff]   ;;  %v3441_v31 = vld [vmem:[#allocation11 + $0x2ac] ss:$28 sps:$4 sm:$0xff]  }
 0x199   :  { %v1048_v44 = vpop.f32.mrf.mxu0  ;;  %1510 = vmatpush1.bf16.msra.mxu0 %v3364_v4  ;;  %v3447_v33 = vld [vmem:[#allocation11 + $0x274] ss:$28 sps:$4 sm:$0xff]   ;;  %v1375_v42 = vld [vmem:[#allocation5] sm:$0xff] }
 0x19a   :  { %v1049_v46 = vadd.f32 %v1048_v44, %v996_v38  ;;  %v1115_v48 = vpack.c.bf16 %v1109_v40, %v1107_v39  ;;  %v1100_v49 = vadd.f32 %v1099_v23, %v1047_v41  ;;  %v1110_v63 = vmax.f32 %v1098_v47, 0.0  ;;  %1511 = vmatprep.subr.bf16.mxu0 %v3369_v5  ;;  %v3415_v23 = vld [vmem:[#allocation11 + $0x8] ss:$28 sps:$4 sm:$0xff]   ;;  %v3445_v34 = vld [vmem:[#allocation11 + $0x270] ss:$28 sps:$4 sm:$0xff]  }
 0x19b   :  { %v1050_v52 = vpop.f32.mrf.mxu0  ;;  %v1150_v35 = vld [vmem:[%s4002_s5] sm:$0x3] }
 0x19c   :  { %v1051_v56 = vadd.f32 %v1050_v52, %v998_v45  ;;  %v1102_v57 = vadd.f32 %v1101_v37, %v1049_v46  ;;  %1354 = vmatprep.mubr.bf16.mxu1 %v1115_v48  ;;  %v1111_v61 = vmax.f32 %v1100_v49, 0.0  ;;  %v1155_v36 = vrot.slane %v1150_v35, %v3939_v60  ;;  %v1376_v46 = vld [vmem:[#allocation5 + $0x8] sm:$0xff] }
 0x19d   :  { %1355 = vmatmul.mubr.bf16.vlgmr.msra.gmra.mxu1 %v1114_v50  ;;  %1512 = vmatpush1.bf16.msra.mxu0 %v3367_v6  ;;  %v1159_v37 = vrot.slane %v1150_v35, %v3933_v58  ;;  %v3376_v5 = vld [vmem:[#allocation11 + $0x150] ss:$28 sps:$4 sm:$0xff]   ;;  %v3451_v35 = vld [vmem:[#allocation11 + $0x238] ss:$28 sps:$4 sm:$0xff]  }
 0x19e   :  { %v1104_v59 = vadd.f32 %v1103_v53, %v1051_v56  ;;  %v1112_v51 = vmax.f32 %v1102_v57, 0.0  ;;  %2303 = vmatprep.subr.bf16.mxu0 %v3372_v7  ;;  %2357 = vmatpush1.bf16.msra.mxu1 %v3373_v8  ;;  %v3384_v7 = vld [vmem:[#allocation11 + $0x11c] ss:$28 sps:$4 sm:$0xff]  }
 0x19f   :  { %2358 = vmatprep.subr.bf16.mxu1 %v3381_v10  ;;  %v3382_v10 = vld [vmem:[#allocation11 + $0x118] ss:$28 sps:$4 sm:$0xff]  }
 0x1a0   :  { %v1113_v62 = vmax.f32 %v1104_v59, 0.0  ;;  %v1116_v1 = vpack.c.bf16 %v1112_v51, %v1110_v63  ;;  %v1377_v51 = vld [vmem:[#allocation5 + $0x10] sm:$0xff] }
 0x1a2   :  { %v1117_v0 = vpack.c.bf16 %v1113_v62, %v1111_v61  ;;  %2359 = vmatpush1.bf16.msra.mxu1 %v3379_v11  ;;  %v3370_v62 = vld [vmem:[#allocation11 + $0x188] ss:$28 sps:$4 sm:$0xff]  }
 0x1a3   :  { %2360 = vmatprep.subr.bf16.mxu1 %v3387_v12  ;;  %v3390_v12 = vld [vmem:[#allocation11 + $0xe4] ss:$28 sps:$4 sm:$0xff]  }
 0x1a4   :  { %1364 = vmatprep.mubr.bf16.mxu1 %v1117_v0 }
 0x1a5   :  { %1365 = vmatmul.mubr.bf16.gmra.mxu1 %v1116_v1  ;;  %v3378_v1 = vld [vmem:[#allocation11 + $0x154] ss:$28 sps:$4 sm:$0xff]  }
 0x1a6   :  { %2361 = vmatpush1.bf16.msra.mxu1 %v3385_v13  ;;  %v3388_v13 = vld [vmem:[#allocation11 + $0xe0] ss:$28 sps:$4 sm:$0xff]  }
 0x1a7   :  { %2362 = vmatprep.subr.bf16.mxu1 %v3393_v14  ;;  %v3396_v14 = vld [vmem:[#allocation11 + $0xac] ss:$28 sps:$4 sm:$0xff]  }
 0x1aa   :  { %2363 = vmatpush1.bf16.msra.mxu1 %v3391_v15  ;;  %v3402_v15 = vld [vmem:[#allocation11 + $0x74] ss:$28 sps:$4 sm:$0xff]  }
 0x1ab   :  { %2364 = vmatprep.subr.bf16.mxu1 %v3399_v16  ;;  %v3400_v16 = vld [vmem:[#allocation11 + $0x70] ss:$28 sps:$4 sm:$0xff]  }
 0x1ae   :  { %2365 = vmatpush1.bf16.msra.mxu1 %v3397_v17  ;;  %v3408_v17 = vld [vmem:[#allocation11 + $0x3c] ss:$28 sps:$4 sm:$0xff]  }
 0x1af   :  { %2366 = vmatprep.subr.bf16.mxu1 %v3405_v18  ;;  %v3406_v18 = vld [vmem:[#allocation11 + $0x38] ss:$28 sps:$4 sm:$0xff]  }
 0x1b2   :  { %2367 = vmatpush1.bf16.msra.mxu1 %v3403_v19  ;;  %v3414_v19 = vld [vmem:[#allocation11 + $0x4] ss:$28 sps:$4 sm:$0xff]  }
 0x1b3   :  { %2368 = vmatprep.subr.bf16.mxu1 %v3411_v20  ;;  %v3412_v20 = vld [vmem:[#allocation11] ss:$28 sps:$4 sm:$0xff]  }
 0x1b6   :  { %2369 = vmatpush1.bf16.msra.mxu1 %v3409_v21  ;;  %v3420_v21 = vld [vmem:[#allocation11 + $0x34c] ss:$28 sps:$4 sm:$0xff]  }
 0x1b7   :  { %2370 = vmatprep.subr.bf16.mxu1 %v3417_v22  ;;  %v3418_v22 = vld [vmem:[#allocation11 + $0x348] ss:$28 sps:$4 sm:$0xff]  }
 0x1ba   :  { %2371 = vmatpush1.bf16.msra.mxu1 %v3415_v23  ;;  %v3426_v23 = vld [vmem:[#allocation11 + $0x314] ss:$28 sps:$4 sm:$0xff]  }
 0x1bb   :  { %2372 = vmatprep.subr.bf16.mxu1 %v3423_v24  ;;  %v3424_v24 = vld [vmem:[#allocation11 + $0x310] ss:$28 sps:$4 sm:$0xff]  }
 0x1be   :  { %2373 = vmatpush2.bf16.msra.mxu1 %v3421_v26  ;;  %v3432_v26 = vld [vmem:[#allocation11 + $0x2dc] ss:$28 sps:$4 sm:$0xff]  }
 0x1bf   :  { %2374 = vmatprep.subr.bf16.mxu1 %v3429_v27  ;;  %v3430_v27 = vld [vmem:[#allocation11 + $0x2d8] ss:$28 sps:$4 sm:$0xff]  }
 0x1c2   :  { %2375 = vmatpush2.bf16.msra.mxu1 %v3427_v28  ;;  %v3438_v28 = vld [vmem:[#allocation11 + $0x2a4] ss:$28 sps:$4 sm:$0xff]  }
 0x1c3   :  { %2376 = vmatprep.subr.bf16.mxu1 %v3435_v29  ;;  %v3436_v29 = vld [vmem:[#allocation11 + $0x2a0] ss:$28 sps:$4 sm:$0xff]  }
 0x1c6   :  { %2377 = vmatpush2.bf16.msra.mxu1 %v3433_v30  ;;  %v3444_v30 = vld [vmem:[#allocation11 + $0x26c] ss:$28 sps:$4 sm:$0xff]  }
 0x1c7   :  { %2378 = vmatprep.subr.bf16.mxu1 %v3441_v31  ;;  %v3442_v31 = vld [vmem:[#allocation11 + $0x268] ss:$28 sps:$4 sm:$0xff]  }
 0x1ca   :  { %2379 = vmatpush2.bf16.msra.mxu1 %v3439_v32  ;;  %v3450_v32 = vld [vmem:[#allocation11 + $0x234] ss:$28 sps:$4 sm:$0xff]  }
 0x1cb   :  { %2380 = vmatprep.subr.bf16.mxu1 %v3447_v33  ;;  %v3453_v33 = vld [vmem:[#allocation11 + $0x23c] ss:$28 sps:$4 sm:$0xff]  }
 0x1ce   :  { %2381 = vmatpush2.bf16.msra.mxu1 %v3445_v34  ;;  %v3448_v34 = vld [vmem:[#allocation11 + $0x230] ss:$28 sps:$4 sm:$0xff]  }
 0x1cf   :  { %2382 = vmatprep.subr.bf16.mxu1 %v3453_v33  ;;  %v3490_v33 = vld [vmem:[#allocation11 + $0xc0] ss:$28 sps:$4 sm:$0xff]  }
 0x1d2   :  { %2383 = vmatpush2.bf16.msra.mxu1 %v3451_v35  ;;  %v3494_v35 = vld [vmem:[#allocation11 + $0x248] ss:$28 sps:$4 sm:$0xff]  }
 0x25d   :  { %v1356_v38 = vpop.f32.mrf.mxu1 }
 0x25e   :  { %v1357_v39 = vadd.f32 %v1356_v38, %v1155_v36  ;;  %v3454_v38 = vld [vmem:[#allocation11 + $0x1f8] ss:$28 sps:$4 sm:$0xff]  }
 0x25f   :  { %v1358_v40 = vpop.f32.mrf.mxu1 }
 0x260   :  { %2707 = vst [vmem:[#allocation14] sm:$0xff] %v1357_v39  ;;  %v1359_v41 = vadd.f32 %v1358_v40, %v1159_v37  ;;  %v3462_v40 = vld [vmem:[#allocation11 + $0x1c4] ss:$28 sps:$4 sm:$0xff]  }
 0x261   :  { %v1360_v43 = vpop.f32.mrf.mxu1 }
 0x262   :  { %2708 = vst [vmem:[#allocation14 + $0x8] sm:$0xff] %v1359_v41  ;;  %v1361_v44 = vadd.f32 %v1360_v43, %v1155_v36  ;;  %v1379_v48 = vmul.f32 %v1375_v42, %v1359_v41  ;;  %v3465_v41 = vld [vmem:[#allocation11 + $0x1cc] ss:$28 sps:$4 sm:$0xff]   ;;  %v3460_v42 = vld [vmem:[#allocation11 + $0x1c0] ss:$28 sps:$4 sm:$0xff]  }
 0x263   :  { %v1362_v45 = vpop.f32.mrf.mxu1  ;;  %v3463_v43 = vld [vmem:[#allocation11 + $0x1c8] ss:$28 sps:$4 sm:$0xff]  }
 0x264   :  { %2709 = vst [vmem:[#allocation14 + $0x10] sm:$0xff] %v1361_v44  ;;  %v1363_v50 = vadd.f32 %v1362_v45, %v1159_v37  ;;  %v1383_v57 = vadd.f32 %v1379_v48, %v1357_v39  ;;  %v3457_v39 = vld [vmem:[#allocation11 + $0x200] ss:$28 sps:$4 sm:$0xff]  }
 0x265   :  { %v1366_v52 = vpop.f32.mrf.mxu1  ;;  %v3469_v45 = vld [vmem:[#allocation11 + $0x360] ss:$28 sps:$4 sm:$0xff]  }
 0x266   :  { %v1380_v53 = vmul.f32 %v1376_v46, %v1363_v50  ;;  %2710 = vst [vmem:[#allocation14 + $0x18] sm:$0xff] %v1363_v50  ;;  %v1367_v49 = vadd.f32 %v1366_v52, %v1155_v36  ;;  %v1405_v46 = vld [vmem:[%s4004_s7] sm:$0x3]  ;;  %s3825_s7 = smov [#allocation14]  }
 0x267   :  { %v1368_v56 = vpop.f32.mrf.mxu1  ;;  %v1414_v50 = vrot.slane %v1405_v46, %v3933_v58  ;;  %v1410_v52 = vrot.slane %v1405_v46, %v3939_v60  ;;  %v3508_v46 = vld [vmem:[#allocation11 + $0x35c] ss:$28 sps:$4 sm:$0xff]   ;;  %s2732_s30 = sshll.u32 %s3825_s7, 4  ;;  %s2733_s30 = int_to_ptr.vmem [resolvable:$true] %s2732_s30 }
 0x268   :  { %v1384_v47 = vadd.f32 %v1380_v53, %v1361_v44  ;;  %2711 = vst [vmem:[#allocation14 + $0x20] sm:$0xff] %v1367_v49  ;;  %v1369_v59 = vadd.f32 %v1368_v56, %v1159_v37  ;;  %v3468_v44 = vld [vmem:[#allocation11 + $0x19c] ss:$28 sps:$4 sm:$0xff]   ;;  %s3762_s1 = scalar_lea.vmem %s2733_s30, 1024  ;;  %p3767_p3 = scmp.lt.s32.totalorder %s2733_s30, %s2733_s30 }
 0x269   :  { %v1370_v61 = vpop.f32.mrf.mxu1  ;;  %p3763_p2 = scmp.ne.s32.totalorder %s2733_s30, %s3762_s1  ;;  %p3768_p4 = scmp.lt.s32.totalorder %s3762_s1, %s3762_s1 }
 0x26a   :  { %v1387_v63 = vpack.c.bf16 %v1384_v47, %v1383_v57  ;;  %2712 = vst [vmem:[#allocation14 + $0x28] sm:$0xff] %v1369_v59  ;;  %v1371_v0 = vadd.f32 %v1370_v61, %v1155_v36  ;;  %v1381_v3 = vmul.f32 %v1377_v51, %v1369_v59  ;;  %v3456_v36 = vld [vmem:[#allocation11 + $0x1fc] ss:$28 sps:$4 sm:$0xff]  }
 0x26b   :  { %v1372_v54 = vpop.f32.mrf.mxu1  ;;  %p3769_p5 = por %p3768_p4, %p3767_p3 }
 0x26c   :  { %2713 = vst [vmem:[#allocation14 + $0x30] sm:$0xff] %v1371_v0  ;;  %v1373_v4 = vadd.f32 %v1372_v54, %v1159_v37  ;;  %1530 = vmatmul.mubr.bf16.vlgmr.msra.gmra.mxu0 %v1387_v63  ;;  %v1385_v8 = vadd.f32 %v1381_v3, %v1367_v49  ;;  %v3459_v37 = vld [vmem:[#allocation11 + $0x204] ss:$28 sps:$4 sm:$0xff]   ;;  %v3466_v3 = vld [vmem:[#allocation11 + $0x198] ss:$28 sps:$4 sm:$0xff]  }
 0x26d   :  { %1539 = vmatprep.mubr.bf16.mxu0 %v3824_v25  ;;  %2304 = vmatpush1.bf16.msra.mxu0 %v3370_v62  ;;  %v3394_v25 = vld [vmem:[#allocation11 + $0xa8] ss:$28 sps:$4 sm:$0xff]   ;;  %p3770_p6 = pnand %p3769_p5, %p3763_p2 }
 0x26e   :  { %v1382_v6 = vmul.f32 %v1378_v2, %v1373_v4  ;;  %2714 = vst [vmem:[#allocation14 + $0x38] sm:$0xff] %v1373_v4  ;;  %2305 = vmatprep.subr.bf16.mxu0 %v3378_v1  ;;  %2384 = vmatprep.subr.bf16.mxu1 %v3459_v37  ;;  %v3470_v4 = vld [vmem:[#allocation11 + $0x1a0] ss:$28 sps:$4 sm:$0xff]   ;;  %v3495_v37 = vld [vmem:[#allocation11 + $0x88] ss:$28 sps:$4 sm:$0xff]  }
 0x26f   :  { %2385 = vmatpush2.bf16.msra.mxu1 %v3457_v39  ;;  %v3499_v39 = vld [vmem:[#allocation11 + $0x210] ss:$28 sps:$4 sm:$0xff]  }
 0x270   :  { %v1386_v9 = vadd.f32 %v1382_v6, %v1371_v0  ;;  %2386 = vmatprep.subr.bf16.mxu1 %v3465_v41  ;;  %v3500_v41 = vld [vmem:[#allocation11 + $0x50] ss:$28 sps:$4 sm:$0xff]  }
 0x271   :  { %2306 = vmatpush1.bf16.msra.mxu0 %v3376_v5 }
 0x272   :  { %v1388_v11 = vpack.c.bf16 %v1386_v9, %v1385_v8  ;;  %2307 = vmatprep.subr.bf16.mxu0 %v3384_v7  ;;  %v3473_v7 = vld [vmem:[#allocation11 + $0x164] ss:$28 sps:$4 sm:$0xff]  }
 0x273   :  { %2387 = vmatpush2.bf16.msra.mxu1 %v3463_v43  ;;  %v3474_v8 = vld [vmem:[#allocation11 + $0x328] ss:$28 sps:$4 sm:$0xff]   ;;  %v3504_v43 = vld [vmem:[#allocation11 + $0x1d8] ss:$28 sps:$4 sm:$0xff]  }
 0x274   :  { %1540 = vmatmul.mubr.bf16.gmra.mxu0 %v1388_v11  ;;  %3065 = vmatprep.subr.bf16.mxu1 %v3469_v45  ;;  %v3505_v45 = vld [vmem:[#allocation11 + $0x18] ss:$28 sps:$4 sm:$0xff]  }
 0x275   :  { %2308 = vmatpush1.bf16.msra.mxu0 %v3382_v10 }
 0x276   :  { %2309 = vmatprep.subr.bf16.mxu0 %v3390_v12 }
 0x279   :  { %2310 = vmatpush1.bf16.msra.mxu0 %v3388_v13 }
 0x27a   :  { %2311 = vmatprep.subr.bf16.mxu0 %v3396_v14  ;;  %v3471_v14 = vld [vmem:[#allocation11 + $0x160] ss:$28 sps:$4 sm:$0xff]  }
 0x27d   :  { %2312 = vmatpush1.bf16.msra.mxu0 %v3394_v25  ;;  %v3475_v25 = vld [vmem:[#allocation11 + $0x168] ss:$28 sps:$4 sm:$0xff]  }
 0x27e   :  { %2313 = vmatprep.subr.bf16.mxu0 %v3402_v15 }
 0x281   :  { %2314 = vmatpush1.bf16.msra.mxu0 %v3400_v16  ;;  %v3478_v16 = vld [vmem:[#allocation11 + $0x12c] ss:$28 sps:$4 sm:$0xff]  }
 0x282   :  { %2315 = vmatprep.subr.bf16.mxu0 %v3408_v17  ;;  %v3479_v17 = vld [vmem:[#allocation11 + $0x2f0] ss:$28 sps:$4 sm:$0xff]  }
 0x285   :  { %2316 = vmatpush1.bf16.msra.mxu0 %v3406_v18 }
 0x286   :  { %2317 = vmatprep.subr.bf16.mxu0 %v3414_v19 }
 0x289   :  { %2318 = vmatpush1.bf16.msra.mxu0 %v3412_v20 }
 0x28a   :  { %2319 = vmatprep.subr.bf16.mxu0 %v3420_v21 }
 0x28d   :  { %2320 = vmatpush2.bf16.msra.mxu0 %v3418_v22  ;;  %v3476_v22 = vld [vmem:[#allocation11 + $0x128] ss:$28 sps:$4 sm:$0xff]  }
 0x28e   :  { %2321 = vmatprep.subr.bf16.mxu0 %v3426_v23  ;;  %v3480_v23 = vld [vmem:[#allocation11 + $0x130] ss:$28 sps:$4 sm:$0xff]  }
 0x291   :  { %2322 = vmatpush2.bf16.msra.mxu0 %v3424_v24 }
 0x292   :  { %2323 = vmatprep.subr.bf16.mxu0 %v3432_v26  ;;  %v3483_v26 = vld [vmem:[#allocation11 + $0xf4] ss:$28 sps:$4 sm:$0xff]  }
 0x295   :  { %2324 = vmatpush2.bf16.msra.mxu0 %v3430_v27  ;;  %v3484_v27 = vld [vmem:[#allocation11 + $0x2b8] ss:$28 sps:$4 sm:$0xff]  }
 0x296   :  { %2325 = vmatprep.subr.bf16.mxu0 %v3438_v28  ;;  %v3481_v28 = vld [vmem:[#allocation11 + $0xf0] ss:$28 sps:$4 sm:$0xff]  }
 0x299   :  { %2326 = vmatpush2.bf16.msra.mxu0 %v3436_v29  ;;  %v3485_v29 = vld [vmem:[#allocation11 + $0xf8] ss:$28 sps:$4 sm:$0xff]  }
 0x29a   :  { %2327 = vmatprep.subr.bf16.mxu0 %v3444_v30  ;;  %v3488_v30 = vld [vmem:[#allocation11 + $0xbc] ss:$28 sps:$4 sm:$0xff]  }
 0x29d   :  { %2328 = vmatpush2.bf16.msra.mxu0 %v3442_v31  ;;  %v3489_v31 = vld [vmem:[#allocation11 + $0x280] ss:$28 sps:$4 sm:$0xff]  }
 0x29e   :  { %2329 = vmatprep.subr.bf16.mxu0 %v3450_v32  ;;  %v3486_v32 = vld [vmem:[#allocation11 + $0xb8] ss:$28 sps:$4 sm:$0xff]  }
 0x2a1   :  { %2330 = vmatpush2.bf16.msra.mxu0 %v3448_v34  ;;  %v3493_v34 = vld [vmem:[#allocation11 + $0x84] ss:$28 sps:$4 sm:$0xff]  }
 0x2a2   :  { %2331 = vmatprep.subr.bf16.mxu0 %v3456_v36  ;;  %v3491_v36 = vld [vmem:[#allocation11 + $0x80] ss:$28 sps:$4 sm:$0xff]  }
 0x2a5   :  { %2332 = vmatpush2.bf16.msra.mxu0 %v3454_v38  ;;  %v3498_v38 = vld [vmem:[#allocation11 + $0x4c] ss:$28 sps:$4 sm:$0xff]  }
 0x2a6   :  { %2333 = vmatprep.subr.bf16.mxu0 %v3462_v40  ;;  %v3496_v40 = vld [vmem:[#allocation11 + $0x48] ss:$28 sps:$4 sm:$0xff]  }
 0x2a9   :  { %2334 = vmatpush2.bf16.msra.mxu0 %v3460_v42  ;;  %v3503_v42 = vld [vmem:[#allocation11 + $0x14] ss:$28 sps:$4 sm:$0xff]  }
 0x2aa   :  { %2409 = vmatprep.subr.bf16.mxu0 %v3468_v44  ;;  %v3501_v44 = vld [vmem:[#allocation11 + $0x10] ss:$28 sps:$4 sm:$0xff]  }
 0x32c   :  { %v1531_v48 = vpop.f32.mrf.mxu0 }
 0x32d   :  { %v1532_v47 = vadd.f32 %v1531_v48, %v1410_v52  ;;  %v3506_v48 = vld [vmem:[#allocation11 + $0x358] ss:$28 sps:$4 sm:$0xff]  }
 0x32e   :  { %v1533_v53 = vpop.f32.mrf.mxu0 }
 0x32f   :  { %v1534_v56 = vadd.f32 %v1533_v53, %v1414_v50  ;;  %v1550_v1 = vmax.f32 %v1532_v47, 0.0  ;;  %v3514_v53 = vld [vmem:[#allocation11 + $0x2ec] ss:$28 sps:$4 sm:$0xff]   ;;  %v3520_v47 = vld [vmem:[#allocation11 + $0x27c] ss:$28 sps:$4 sm:$0xff]  }
 0x330   :  { %v1535_v49 = vpop.f32.mrf.mxu0 }
 0x331   :  { %v1536_v57 = vadd.f32 %v1535_v49, %v1410_v52  ;;  %v1551_v63 = vmax.f32 %v1534_v56, 0.0  ;;  %v3512_v49 = vld [vmem:[#allocation11 + $0x2e8] ss:$28 sps:$4 sm:$0xff]   ;;  %v3517_v56 = vld [vmem:[#allocation11 + $0x2b4] ss:$28 sps:$4 sm:$0xff]  }
 0x332   :  { %v1537_v59 = vpop.f32.mrf.mxu0 }
 0x333   :  { %v1538_v51 = vadd.f32 %v1537_v59, %v1414_v50  ;;  %v1552_v61 = vmax.f32 %v1536_v57, 0.0  ;;  %v3515_v57 = vld [vmem:[#allocation11 + $0x2b0] ss:$28 sps:$4 sm:$0xff]   ;;  %v3518_v59 = vld [vmem:[#allocation11 + $0x278] ss:$28 sps:$4 sm:$0xff]  }
 0x334   :  { %v1541_v62 = vpop.f32.mrf.mxu0 }
 0x335   :  { %v1553_v0 = vmax.f32 %v1538_v51, 0.0  ;;  %v3954_v5 = vpack.c.bf16 %v1552_v61, %v1550_v1  ;;  %v1542_v11 = vadd.f32 %v1541_v62, %v1410_v52  ;;  %v3523_v51 = vld [vmem:[#allocation11 + $0x244] ss:$28 sps:$4 sm:$0xff]   ;;  %v3526_v62 = vld [vmem:[#allocation11 + $0x20c] ss:$28 sps:$4 sm:$0xff]  }
 0x336   :  { %v1543_v54 = vpop.f32.mrf.mxu0  ;;  %v3521_v61 = vld [vmem:[#allocation11 + $0x240] ss:$28 sps:$4 sm:$0xff]   ;;  %v3527_v1 = vld [vmem:[#allocation11 + $0x1d0] ss:$28 sps:$4 sm:$0xff]  }
 0x337   :  { %v1559_v2 = vpack.c.bf16 %v1553_v0, %v1551_v63  ;;  %v1544_v9 = vadd.f32 %v1543_v54, %v1414_v50  ;;  %v1554_v20 = vmax.f32 %v1542_v11, 0.0  ;;  %v3524_v63 = vld [vmem:[#allocation11 + $0x208] ss:$28 sps:$4 sm:$0xff]   ;;  %v3529_v0 = vld [vmem:[#allocation11 + $0x1d4] ss:$28 sps:$4 sm:$0xff]  }
 0x338   :  { %v1545_v6 = vpop.f32.mrf.mxu0 }
 0x339   :  { %v1546_v10 = vadd.f32 %v1545_v6, %v1410_v52  ;;  %2335 = vmatprep.mubr.bf16.mxu0 %v1559_v2  ;;  %2388 = vmatprep.mubr.bf16.mxu1 %v1559_v2  ;;  %v1555_v18 = vmax.f32 %v1544_v9, 0.0  ;;  %v3509_v52 = vld [vmem:[#allocation11 + $0x320] ss:$28 sps:$4 sm:$0xff]  }
 0x33a   :  { %v1547_v12 = vpop.f32.mrf.mxu0  ;;  %2336 = vmatmul.mubr.bf16.vlgmr.msra.gmra.mxu0 %v3954_v5  ;;  %2389 = vmatmul.mubr.bf16.vlgmr.msra.gmra.mxu1 %v3954_v5 }
 0x33b   :  { %v1548_v13 = vadd.f32 %v1547_v12, %v1414_v50  ;;  %2410 = vmatpush1.bf16.msra.mxu0 %v3466_v3  ;;  %3066 = vmatpush3.bf16.msra.mxu1 %v3470_v4  ;;  %v1556_v15 = vmax.f32 %v1546_v10, 0.0  ;;  %v3511_v50 = vld [vmem:[#allocation11 + $0x324] ss:$28 sps:$4 sm:$0xff]  }
 0x33c   :  { %2411 = vmatprep.subr.bf16.mxu0 %v3473_v7  ;;  %3067 = vmatprep.subr.bf16.mxu1 %v3474_v8 }
 0x33d   :  { %v1557_v19 = vmax.f32 %v1548_v13, 0.0  ;;  %v3960_v24 = vpack.c.bf16 %v1556_v15, %v1554_v20 }
 0x33f   :  { %v3958_v21 = vpack.c.bf16 %v1557_v19, %v1555_v18  ;;  %2412 = vmatpush1.bf16.msra.mxu0 %v3471_v14  ;;  %3068 = vmatpush3.bf16.msra.mxu1 %v3475_v25 }
 0x340   :  { %2413 = vmatprep.subr.bf16.mxu0 %v3478_v16  ;;  %3069 = vmatprep.subr.bf16.mxu1 %v3479_v17 }
 0x341   :  { %2345 = vmatprep.mubr.bf16.mxu0 %v3958_v21  ;;  %2398 = vmatprep.mubr.bf16.mxu1 %v3958_v21 }
 0x342   :  { %2346 = vmatmul.mubr.bf16.gmra.mxu0 %v3960_v24  ;;  %2399 = vmatmul.mubr.bf16.gmra.mxu1 %v3960_v24 }
 0x343   :  { %2414 = vmatpush1.bf16.msra.mxu0 %v3476_v22  ;;  %3070 = vmatpush3.bf16.msra.mxu1 %v3480_v23 }
 0x344   :  { %2441 = vmatprep.mubr.bf16.mxu0 %v1559_v2  ;;  %2494 = vmatprep.mubr.bf16.mxu1 %v1559_v2 }
 0x345   :  { %2415 = vmatprep.subr.bf16.mxu0 %v3483_v26  ;;  %3071 = vmatprep.subr.bf16.mxu1 %v3484_v27 }
 0x347   :  { %2416 = vmatpush1.bf16.msra.mxu0 %v3481_v28  ;;  %3072 = vmatpush3.bf16.msra.mxu1 %v3485_v29 }
 0x348   :  { %2417 = vmatprep.subr.bf16.mxu0 %v3488_v30  ;;  %3073 = vmatprep.subr.bf16.mxu1 %v3489_v31 }
 0x34b   :  { %2418 = vmatpush1.bf16.msra.mxu0 %v3486_v32  ;;  %3074 = vmatpush3.bf16.msra.mxu1 %v3490_v33 }
 0x34c   :  { %2419 = vmatprep.subr.bf16.mxu0 %v3493_v34  ;;  %3075 = vmatprep.subr.bf16.mxu1 %v3494_v35 }
 0x34f   :  { %2420 = vmatpush1.bf16.msra.mxu0 %v3491_v36  ;;  %3076 = vmatpush3.bf16.msra.mxu1 %v3495_v37 }
 0x350   :  { %2421 = vmatprep.subr.bf16.mxu0 %v3498_v38  ;;  %3077 = vmatprep.subr.bf16.mxu1 %v3499_v39 }
 0x353   :  { %2422 = vmatpush1.bf16.msra.mxu0 %v3496_v40  ;;  %3078 = vmatpush3.bf16.msra.mxu1 %v3500_v41 }
 0x354   :  { %2423 = vmatprep.subr.bf16.mxu0 %v3503_v42  ;;  %3079 = vmatprep.subr.bf16.mxu1 %v3504_v43 }
 0x357   :  { %2424 = vmatpush1.bf16.msra.mxu0 %v3501_v44  ;;  %3080 = vmatpush3.bf16.msra.mxu1 %v3505_v45 }
 0x358   :  { %2425 = vmatprep.subr.bf16.mxu0 %v3508_v46 }
 0x35a   :  { %2495 = vmatmul.mubr.bf16.vlgmr.msra.gmra.mxu1 %v3954_v5 }
 0x35b   :  { %2426 = vmatpush2.bf16.msra.mxu0 %v3506_v48  ;;  %2502 = vmatprep.mubr.bf16.mxu1 %v3958_v21 }
 0x35c   :  { %2427 = vmatprep.subr.bf16.mxu0 %v3511_v50 }
 0x35f   :  { %2428 = vmatpush2.bf16.msra.mxu0 %v3509_v52 }
 0x360   :  { %2429 = vmatprep.subr.bf16.mxu0 %v3514_v53 }
 0x362   :  { %2503 = vmatmul.mubr.bf16.gmra.mxu1 %v3960_v24 }
 0x363   :  { %2430 = vmatpush2.bf16.msra.mxu0 %v3512_v49 }
 0x364   :  { %2431 = vmatprep.subr.bf16.mxu0 %v3517_v56 }
 0x367   :  { %2432 = vmatpush2.bf16.msra.mxu0 %v3515_v57 }
 0x368   :  { %2433 = vmatprep.subr.bf16.mxu0 %v3520_v47 }
 0x36b   :  { %2434 = vmatpush2.bf16.msra.mxu0 %v3518_v59 }
 0x36c   :  { %2435 = vmatprep.subr.bf16.mxu0 %v3523_v51 }
 0x36f   :  { %2436 = vmatpush2.bf16.msra.mxu0 %v3521_v61 }
 0x370   :  { %2437 = vmatprep.subr.bf16.mxu0 %v3526_v62 }
 0x373   :  { %2438 = vmatpush2.bf16.msra.mxu0 %v3524_v63 }
 0x374   :  { %2439 = vmatprep.subr.bf16.mxu0 %v3529_v0 }
 0x377   :  { %2440 = vmatpush2.bf16.msra.mxu0 %v3527_v1 }
 0x37a   :  { %2442 = vmatmul.mubr.bf16.vlgmr.msra.gmra.mxu0 %v3954_v5 }
 0x37b   :  { %2451 = vmatprep.mubr.bf16.mxu0 %v3958_v21 }
 0x382   :  { %2452 = vmatmul.mubr.bf16.gmra.mxu0 %v3960_v24 }
 0x383   :  { %3773 = shalt.err (!%p3770_p6)
}
 0x384   :  { %s3826_s12 = smov 256   ;;  %s3827_s13 = smov 16   ;;  %v1702_v54 = vsub.s32 2, %v3930_v55  ;;  %v3979_v2 = vld [vmem:[%s4006_s9] sm:$0xff]  ;;  %v1706_v3 = vsub.s32 3, %v3930_v55 }
 0x385   :  { %2738 = dma.vmem_to_hbm [thread:$0]  %s2733_s30, 1024, %s4008_s11, [#allocation15], %s3826_s12, %s3826_s12, %s3827_s13   ;;  %v1695_v4 = vrot.slane %v3979_v2, %v3939_v60  ;;  %v1699_v6 = vrot.slane %v3979_v2, %v3933_v58 }
 0x386   :  { %v1703_v5 = vrot.slane %v3979_v2, %v1702_v54  ;;  %v1707_v7 = vrot.slane %v3979_v2, %v1706_v3  ;;  %s3828_s9 = smov [#allocation13]  }
 0x387   :  { %s2720_s11 = sshll.u32 %s3828_s9, 4  ;;  %s2721_s11 = int_to_ptr.vmem [resolvable:$true] %s2720_s11 }
 0x388   :  { %s3782_s4 = scalar_lea.vmem %s2721_s11, 3584  ;;  %p3787_p8 = scmp.lt.s32.totalorder %s2721_s11, %s2721_s11 }
 0x389   :  { %p3783_p7 = scmp.ne.s32.totalorder %s2721_s11, %s3782_s4  ;;  %p3788_p9 = scmp.lt.s32.totalorder %s3782_s4, %s3782_s4 }
 0x38b   :  { %p3789_p10 = por %p3788_p9, %p3787_p8 }
 0x38d   :  { %p3790_p11 = pnand %p3789_p10, %p3783_p7 }
 0x3fa   :  { %v2337_v8 = vpop.f32.mrf.mxu0  ;;  %v2390_v9 = vpop.f32.mrf.mxu1 }
 0x3fb   :  { %v2338_v10 = vadd.f32 %v2337_v8, %v1695_v4  ;;  %v2391_v11 = vadd.f32 %v2390_v9, %v1703_v5 }
 0x3fc   :  { %v2339_v12 = vpop.f32.mrf.mxu0  ;;  %v2392_v13 = vpop.f32.mrf.mxu1 }
 0x3fd   :  { %v3037_v14 = vmul.f32 -1.442695, %v2338_v10  ;;  %v3039_v25 = vmul.f32 -1.442695, %v2391_v11  ;;  %v2340_v15 = vadd.f32 %v2339_v12, %v1699_v6  ;;  %v2393_v16 = vadd.f32 %v2392_v13, %v1707_v7 }
 0x3fe   :  { %v2341_v17 = vpop.f32.mrf.mxu0  ;;  %v2394_v18 = vpop.f32.mrf.mxu1 }
 0x3ff   :  { %3530 = vpow2.f32 %v3037_v14  ;;  %v3038_v60 = vmul.f32 -1.442695, %v2340_v15  ;;  %v3040_v19 = vmul.f32 -1.442695, %v2393_v16  ;;  %v2342_v20 = vadd.f32 %v2341_v17, %v1695_v4 }
 0x400   :  { %3532 = vpow2.f32 %v3039_v25  ;;  %v2395_v58 = vadd.f32 %v2394_v18, %v1703_v5  ;;  %v2343_v21 = vpop.f32.mrf.mxu0  ;;  %v2396_v22 = vpop.f32.mrf.mxu1  ;;  %v1718_v16 = vsub.s32 6, %v3930_v55 }
 0x401   :  { %3534 = vpow2.f32 %v3038_v60  ;;  %v3044_v23 = vmul.f32 -1.442695, %v2342_v20  ;;  %v2344_v24 = vadd.f32 %v2343_v21, %v1699_v6  ;;  %v2397_v26 = vadd.f32 %v2396_v22, %v1707_v7 }
 0x402   :  { %3536 = vpow2.f32 %v3040_v19  ;;  %v3046_v27 = vmul.f32 -1.442695, %v2395_v58  ;;  %v2347_v28 = vpop.f32.mrf.mxu0  ;;  %v2400_v29 = vpop.f32.mrf.mxu1 }
 0x403   :  { %3538 = vpow2.f32 %v3044_v23  ;;  %v3045_v30 = vmul.f32 -1.442695, %v2344_v24  ;;  %v3047_v31 = vmul.f32 -1.442695, %v2397_v26  ;;  %v2348_v32 = vadd.f32 %v2347_v28, %v1695_v4 }
 0x404   :  { %3540 = vpow2.f32 %v3046_v27  ;;  %v2401_v33 = vadd.f32 %v2400_v29, %v1703_v5  ;;  %v2349_v34 = vpop.f32.mrf.mxu0  ;;  %v2402_v35 = vpop.f32.mrf.mxu1  ;;  %v1719_v24 = vrot.slane %v3979_v2, %v1718_v16 }
 0x405   :  { %3542 = vpow2.f32 %v3045_v30  ;;  %v3051_v36 = vmul.f32 -1.442695, %v2348_v32  ;;  %v2350_v37 = vadd.f32 %v2349_v34, %v1699_v6  ;;  %v2403_v38 = vadd.f32 %v2402_v35, %v1707_v7 }
 0x406   :  { %3544 = vpow2.f32 %v3047_v31  ;;  %v3053_v39 = vmul.f32 -1.442695, %v2401_v33  ;;  %v2351_v40 = vpop.f32.mrf.mxu0  ;;  %v2404_v41 = vpop.f32.mrf.mxu1 }
 0x407   :  { %3546 = vpow2.f32 %v3051_v36  ;;  %v3052_v42 = vmul.f32 -1.442695, %v2350_v37  ;;  %v3054_v43 = vmul.f32 -1.442695, %v2403_v38  ;;  %v2352_v44 = vadd.f32 %v2351_v40, %v1695_v4 }
 0x408   :  { %3548 = vpow2.f32 %v3053_v39  ;;  %v2405_v45 = vadd.f32 %v2404_v41, %v1703_v5  ;;  %v2353_v46 = vpop.f32.mrf.mxu0  ;;  %v2406_v48 = vpop.f32.mrf.mxu1 }
 0x409   :  { %3550 = vpow2.f32 %v3052_v42  ;;  %v3058_v50 = vmul.f32 -1.442695, %v2352_v44  ;;  %v2354_v52 = vadd.f32 %v2353_v46, %v1699_v6  ;;  %v2407_v53 = vadd.f32 %v2406_v48, %v1707_v7 }
 0x40a   :  { %3552 = vpow2.f32 %v3054_v43  ;;  %v3060_v49 = vmul.f32 -1.442695, %v2405_v45 }
 0x40b   :  { %3554 = vpow2.f32 %v3058_v50  ;;  %v3059_v56 = vmul.f32 -1.442695, %v2354_v52  ;;  %v3061_v57 = vmul.f32 -1.442695, %v2407_v53 }
 0x40c   :  { %v3531_v47 = vpop.eup %3530  ;;  %3556 = vpow2.f32 %v3060_v49 }
 0x40d   :  { %v3533_v59 = vpop.eup %3532  ;;  %v2595_v51 = vadd.f32 1.0, %v3531_v47  ;;  %3558 = vpow2.f32 %v3059_v56 }
 0x40e   :  { %v3535_v61 = vpop.eup %3534  ;;  %v2597_v62 = vadd.f32 1.0, %v3533_v59  ;;  %3560 = vpow2.f32 %v3061_v57 }
 0x40f   :  { %v3537_v63 = vpop.eup %3536  ;;  %3562 = vrcp.f32 %v2595_v51  ;;  %v2596_v0 = vadd.f32 1.0, %v3535_v61 }
 0x410   :  { %v3539_v1 = vpop.eup %3538  ;;  %3564 = vrcp.f32 %v2597_v62  ;;  %v2598_v54 = vadd.f32 1.0, %v3537_v63 }
 0x411   :  { %v3541_v3 = vpop.eup %3540  ;;  %3566 = vrcp.f32 %v2596_v0  ;;  %v2602_v4 = vadd.f32 1.0, %v3539_v1 }
 0x412   :  { %v3543_v5 = vpop.eup %3542  ;;  %3568 = vrcp.f32 %v2598_v54  ;;  %v2604_v6 = vadd.f32 1.0, %v3541_v3 }
 0x413   :  { %v3545_v7 = vpop.eup %3544  ;;  %3570 = vrcp.f32 %v2602_v4  ;;  %v2603_v8 = vadd.f32 1.0, %v3543_v5  ;;  %v1710_v4 = vsub.s32 4, %v3930_v55 }
 0x414   :  { %v3547_v9 = vpop.eup %3546  ;;  %3572 = vrcp.f32 %v2604_v6  ;;  %v2605_v10 = vadd.f32 1.0, %v3545_v7  ;;  %v1714_v7 = vsub.s32 5, %v3930_v55 }
 0x415   :  { %v3549_v11 = vpop.eup %3548  ;;  %3574 = vrcp.f32 %v2603_v8  ;;  %v2609_v12 = vadd.f32 1.0, %v3547_v9  ;;  %v1711_v8 = vrot.slane %v3979_v2, %v1710_v4 }
 0x416   :  { %v3551_v13 = vpop.eup %3550  ;;  %3576 = vrcp.f32 %v2605_v10  ;;  %v2611_v14 = vadd.f32 1.0, %v3549_v11  ;;  %v1715_v11 = vrot.slane %v3979_v2, %v1714_v7 }
 0x417   :  { %v3553_v25 = vpop.eup %3552  ;;  %3578 = vrcp.f32 %v2609_v12  ;;  %v2610_v15 = vadd.f32 1.0, %v3551_v13 }
 0x418   :  { %v3555_v17 = vpop.eup %3554  ;;  %3580 = vrcp.f32 %v2611_v14  ;;  %v2612_v18 = vadd.f32 1.0, %v3553_v25 }
 0x419   :  { %v3557_v60 = vpop.eup %3556  ;;  %3582 = vrcp.f32 %v2610_v15  ;;  %v2616_v19 = vadd.f32 1.0, %v3555_v17 }
 0x41a   :  { %v3559_v20 = vpop.eup %3558  ;;  %3584 = vrcp.f32 %v2612_v18  ;;  %v2618_v58 = vadd.f32 1.0, %v3557_v60  ;;  %v3081_v21 = vpop.f32.mrf.mxu1 }
 0x41b   :  { %v3561_v22 = vpop.eup %3560  ;;  %3586 = vrcp.f32 %v2616_v19  ;;  %v2617_v23 = vadd.f32 1.0, %v3559_v20 }
 0x41c   :  { %v3563_v26 = vpop.eup %3562  ;;  %3588 = vrcp.f32 %v2618_v58  ;;  %v2619_v27 = vadd.f32 1.0, %v3561_v22  ;;  %v3082_v28 = vpop.f32.mrf.mxu1 }
 0x41d   :  { %v3565_v29 = vpop.eup %3564  ;;  %2679 = vst [vmem:[#allocation13] sm:$0xff] %v3563_v26  ;;  %3590 = vrcp.f32 %v2617_v23  ;;  %v3083_v30 = vadd.f32 %v3082_v28, %v3081_v21 }
 0x41e   :  { %v3567_v31 = vpop.eup %3566  ;;  %2681 = vst [vmem:[#allocation13 + $0x10] sm:$0xff] %v3565_v29  ;;  %3592 = vrcp.f32 %v2619_v27  ;;  %v3084_v32 = vpop.f32.mrf.mxu1 }
 0x41f   :  { %v3569_v33 = vpop.eup %3568  ;;  %2680 = vst [vmem:[#allocation13 + $0x8] sm:$0xff] %v3567_v31  ;;  %v2497_v34 = vadd.f32 %v3083_v30, %v1719_v24 }
 0x420   :  { %v3571_v35 = vpop.eup %3570  ;;  %2682 = vst [vmem:[#allocation13 + $0x18] sm:$0xff] %v3569_v33  ;;  %v3085_v36 = vpop.f32.mrf.mxu1 }
 0x421   :  { %v3573_v37 = vpop.eup %3572  ;;  %2686 = vst [vmem:[#allocation13 + $0x38] sm:$0xff] %v3571_v35  ;;  %v3043_v38 = vmul.f32 -1.442695, %v2497_v34  ;;  %v3086_v39 = vadd.f32 %v3085_v36, %v3084_v32 }
 0x422   :  { %v3575_v40 = vpop.eup %3574  ;;  %2688 = vst [vmem:[#allocation13 + $0x48] sm:$0xff] %v3573_v37  ;;  %v3087_v41 = vpop.f32.mrf.mxu1 }
 0x423   :  { %v3577_v42 = vpop.eup %3576  ;;  %2687 = vst [vmem:[#allocation13 + $0x40] sm:$0xff] %v3575_v40  ;;  %3594 = vpow2.f32 %v3043_v38  ;;  %v2500_v43 = vadd.f32 %v3086_v39, %v1719_v24 }
 0x424   :  { %v3579_v44 = vpop.eup %3578  ;;  %2689 = vst [vmem:[#allocation13 + $0x50] sm:$0xff] %v3577_v42  ;;  %v3088_v45 = vpop.f32.mrf.mxu1 }
 0x425   :  { %v3581_v46 = vpop.eup %3580  ;;  %2693 = vst [vmem:[#allocation13 + $0x70] sm:$0xff] %v3579_v44  ;;  %v3050_v48 = vmul.f32 -1.442695, %v2500_v43  ;;  %v3089_v50 = vadd.f32 %v3088_v45, %v3087_v41 }
 0x426   :  { %v3583_v52 = vpop.eup %3582  ;;  %2695 = vst [vmem:[#allocation13 + $0x80] sm:$0xff] %v3581_v46  ;;  %v3090_v53 = vpop.f32.mrf.mxu1 }
 0x427   :  { %v3585_v49 = vpop.eup %3584  ;;  %2694 = vst [vmem:[#allocation13 + $0x78] sm:$0xff] %v3583_v52  ;;  %3596 = vpow2.f32 %v3050_v48  ;;  %v2505_v56 = vadd.f32 %v3089_v50, %v1719_v24 }
 0x428   :  { %v3587_v57 = vpop.eup %3586  ;;  %2696 = vst [vmem:[#allocation13 + $0x88] sm:$0xff] %v3585_v49  ;;  %v3091_v47 = vpop.f32.mrf.mxu1 }
 0x429   :  { %v3589_v59 = vpop.eup %3588  ;;  %2700 = vst [vmem:[#allocation13 + $0xa8] sm:$0xff] %v3587_v57  ;;  %v3057_v51 = vmul.f32 -1.442695, %v2505_v56  ;;  %v3092_v61 = vadd.f32 %v3091_v47, %v3090_v53 }
 0x42a   :  { %v3591_v62 = vpop.eup %3590  ;;  %2702 = vst [vmem:[#allocation13 + $0xb8] sm:$0xff] %v3589_v59 }
 0x42b   :  { %v3593_v63 = vpop.eup %3592  ;;  %2701 = vst [vmem:[#allocation13 + $0xb0] sm:$0xff] %v3591_v62  ;;  %3598 = vpow2.f32 %v3057_v51  ;;  %v2508_v0 = vadd.f32 %v3092_v61, %v1719_v24 }
 0x42c   :  { %2703 = vst [vmem:[#allocation13 + $0xc0] sm:$0xff] %v3593_v63 }
 0x42d   :  { %v3064_v1 = vmul.f32 -1.442695, %v2508_v0 }
 0x42f   :  { %3600 = vpow2.f32 %v3064_v1 }
 0x430   :  { %v3595_v54 = vpop.eup %3594 }
 0x431   :  { %v2601_v3 = vadd.f32 1.0, %v3595_v54 }
 0x433   :  { %3602 = vrcp.f32 %v2601_v3 }
 0x434   :  { %v3597_v5 = vpop.eup %3596 }
 0x435   :  { %v2608_v6 = vadd.f32 1.0, %v3597_v5 }
 0x437   :  { %3604 = vrcp.f32 %v2608_v6 }
 0x438   :  { %v3599_v9 = vpop.eup %3598 }
 0x439   :  { %v2615_v10 = vadd.f32 1.0, %v3599_v9 }
 0x43a   :  { %v2443_v12 = vpop.f32.mrf.mxu0 }
 0x43b   :  { %3606 = vrcp.f32 %v2615_v10  ;;  %v2444_v13 = vadd.f32 %v2443_v12, %v1711_v8 }
 0x43c   :  { %v3601_v14 = vpop.eup %3600  ;;  %v2445_v25 = vpop.f32.mrf.mxu0 }
 0x43d   :  { %v2622_v15 = vadd.f32 1.0, %v3601_v14  ;;  %v3041_v16 = vmul.f32 -1.442695, %v2444_v13  ;;  %v2446_v17 = vadd.f32 %v2445_v25, %v1715_v11 }
 0x43e   :  { %v2447_v18 = vpop.f32.mrf.mxu0 }
 0x43f   :  { %3608 = vrcp.f32 %v2622_v15  ;;  %v3042_v60 = vmul.f32 -1.442695, %v2446_v17  ;;  %v2448_v19 = vadd.f32 %v2447_v18, %v1711_v8 }
 0x440   :  { %v3603_v55 = vpop.eup %3602  ;;  %3610 = vpow2.f32 %v3041_v16  ;;  %v2449_v20 = vpop.f32.mrf.mxu0 }
 0x441   :  { %2685 = vst [vmem:[#allocation13 + $0x30] sm:$0xff] %v3603_v55  ;;  %3612 = vpow2.f32 %v3042_v60  ;;  %v3048_v58 = vmul.f32 -1.442695, %v2448_v19  ;;  %v2450_v21 = vadd.f32 %v2449_v20, %v1715_v11 }
 0x442   :  { %v2453_v2 = vpop.f32.mrf.mxu0 }
 0x443   :  { %3614 = vpow2.f32 %v3048_v58  ;;  %v3049_v22 = vmul.f32 -1.442695, %v2450_v21  ;;  %v2454_v23 = vadd.f32 %v2453_v2, %v1711_v8 }
 0x444   :  { %v3605_v24 = vpop.eup %3604  ;;  %v2455_v26 = vpop.f32.mrf.mxu0 }
 0x445   :  { %2692 = vst [vmem:[#allocation13 + $0x68] sm:$0xff] %v3605_v24  ;;  %3616 = vpow2.f32 %v3049_v22  ;;  %v3055_v27 = vmul.f32 -1.442695, %v2454_v23  ;;  %v2456_v28 = vadd.f32 %v2455_v26, %v1715_v11 }
 0x446   :  { %v2457_v29 = vpop.f32.mrf.mxu0 }
 0x447   :  { %3618 = vpow2.f32 %v3055_v27  ;;  %v3056_v30 = vmul.f32 -1.442695, %v2456_v28  ;;  %v2458_v31 = vadd.f32 %v2457_v29, %v1711_v8 }
 0x448   :  { %v3607_v32 = vpop.eup %3606  ;;  %v2459_v33 = vpop.f32.mrf.mxu0 }
 0x449   :  { %2699 = vst [vmem:[#allocation13 + $0xa0] sm:$0xff] %v3607_v32  ;;  %3620 = vpow2.f32 %v3056_v30  ;;  %v3062_v34 = vmul.f32 -1.442695, %v2458_v31  ;;  %v2460_v35 = vadd.f32 %v2459_v33, %v1715_v11 }
 0x44b   :  { %3622 = vpow2.f32 %v3062_v34  ;;  %v3063_v36 = vmul.f32 -1.442695, %v2460_v35 }
 0x44c   :  { %v3609_v37 = vpop.eup %3608 }
 0x44d   :  { %v3611_v38 = vpop.eup %3610  ;;  %2706 = vst [vmem:[#allocation13 + $0xd8] sm:$0xff] %v3609_v37  ;;  %3624 = vpow2.f32 %v3063_v36 }
 0x44e   :  { %v3613_v39 = vpop.eup %3612  ;;  %v2599_v40 = vadd.f32 1.0, %v3611_v38 }
 0x44f   :  { %v2600_v41 = vadd.f32 1.0, %v3613_v39 }
 0x450   :  { %v3615_v42 = vpop.eup %3614  ;;  %3626 = vrcp.f32 %v2599_v40 }
 0x451   :  { %3628 = vrcp.f32 %v2600_v41  ;;  %v2606_v43 = vadd.f32 1.0, %v3615_v42 }
 0x452   :  { %v3617_v44 = vpop.eup %3616 }
 0x453   :  { %3630 = vrcp.f32 %v2606_v43  ;;  %v2607_v45 = vadd.f32 1.0, %v3617_v44 }
 0x454   :  { %v3619_v46 = vpop.eup %3618 }
 0x455   :  { %3632 = vrcp.f32 %v2607_v45  ;;  %v2613_v48 = vadd.f32 1.0, %v3619_v46 }
 0x456   :  { %v3621_v50 = vpop.eup %3620 }
 0x457   :  { %3634 = vrcp.f32 %v2613_v48  ;;  %v2614_v52 = vadd.f32 1.0, %v3621_v50 }
 0x458   :  { %v3623_v53 = vpop.eup %3622 }
 0x459   :  { %3636 = vrcp.f32 %v2614_v52  ;;  %v2620_v49 = vadd.f32 1.0, %v3623_v53 }
 0x45a   :  { %v3625_v56 = vpop.eup %3624 }
 0x45b   :  { %3638 = vrcp.f32 %v2620_v49  ;;  %v2621_v57 = vadd.f32 1.0, %v3625_v56 }
 0x45d   :  { %v3627_v47 = vpop.eup %3626  ;;  %3640 = vrcp.f32 %v2621_v57 }
 0x45e   :  { %v3629_v59 = vpop.eup %3628  ;;  %2683 = vst [vmem:[#allocation13 + $0x20] sm:$0xff] %v3627_v47 }
 0x45f   :  { %2684 = vst [vmem:[#allocation13 + $0x28] sm:$0xff] %v3629_v59 }
 0x460   :  { %v3631_v51 = vpop.eup %3630 }
 0x461   :  { %2690 = vst [vmem:[#allocation13 + $0x58] sm:$0xff] %v3631_v51 }
 0x462   :  { %v3633_v61 = vpop.eup %3632 }
 0x463   :  { %2691 = vst [vmem:[#allocation13 + $0x60] sm:$0xff] %v3633_v61 }
 0x464   :  { %v3635_v62 = vpop.eup %3634 }
 0x465   :  { %2697 = vst [vmem:[#allocation13 + $0x90] sm:$0xff] %v3635_v62 }
 0x466   :  { %v3637_v63 = vpop.eup %3636 }
 0x467   :  { %2698 = vst [vmem:[#allocation13 + $0x98] sm:$0xff] %v3637_v63 }
 0x468   :  { %v3639_v0 = vpop.eup %3638 }
 0x469   :  { %2704 = vst [vmem:[#allocation13 + $0xc8] sm:$0xff] %v3639_v0 }
 0x46a   :  { %v3641_v1 = vpop.eup %3640 }
 0x46b   :  { %2705 = vst [vmem:[#allocation13 + $0xd0] sm:$0xff] %v3641_v1 }
 0x46c   :  { %3793 = shalt.err (!%p3790_p11)
}
 0x46d   :  { %s3829_s18 = smov 896   ;;  %s3830_s19 = smov 56  }
 0x46e   :  { %2726 = dma.vmem_to_hbm [thread:$0]  %s2721_s11, 3584, %s4007_s10, [#allocation4], %s3829_s18, %s3829_s18, %s3830_s19  }
 0x46f   :  { %3810 = dma.done.wait [#allocation4], 3584  }
 0x470   :  { %3811 = vsyncadd [#allocation4], 4294963712 }
 0x471   :  { %3812 = dma.done.wait [#allocation15], 1024  }
 0x472   :  { %3813 = vsyncadd [#allocation15], 4294966272 }
 0x473   :  { %2745 = vsyncpa [#allocation3], 1 }
 0x474   :  { %2746 = vsyncpa [#allocation6], 1 }
 0x475   :  { %2747 = vsyncpa [#allocation9], 1 }
 0x476   :  { %2748 = vsyncpa [#allocation12], 1 }
 0x477   :  { %2749 = vsyncpa [#allocation4], 1 }
 0x478   :  { %2750 = vsyncpa [#allocation15], 1 }

</bundles_post_ra>
